<compile_context>
chip_gen: v7x
topology: tpu7x:2x2x1
jax: 0.10.0
libtpu: 0.0.40
codegen_flags: <defaults>
</compile_context>

<pallas_src>
import numpy as np

import jax
import jax.numpy as jnp
from jax.experimental import pallas as pl
from jax.experimental.pallas import tpu as pltpu


# ----------------------------------------------------------------------------
# db4 wavelet filters and DWT matrix construction (glue, plain numpy)
# ----------------------------------------------------------------------------
_DB4_LO = np.array(
    [-0.010597401784997278, 0.032883011666982945, 0.030841381835986965,
     -0.18703481171888114, -0.02798376941698385, 0.6308807679295904,
     0.7148465705525415, 0.23037781330885523], dtype=np.float32)
_DB4_HI = np.array(
    [((-1) ** k) * _DB4_LO[::-1][k] for k in range(len(_DB4_LO))],
    dtype=np.float32)


def _dwt_matrix(filt, L):
  """(L//2, L) matrix implementing a stride-2 periodic DWT along time."""
  L2 = L // 2
  W = np.zeros((L2, L), dtype=np.float32)
  for t in range(L2):
    for k in range(len(filt)):
      W[t, (2 * t + k) % L] += filt[k]
  return W


# ----------------------------------------------------------------------------
# Pallas kernel
# ----------------------------------------------------------------------------
def _make_kernel(*, num_heads, d_model, win_size, block_b, e_layers,
                 compute_dtype):
  H, D, L = num_heads, d_model, win_size
  dh = D // H
  BL = block_b * L
  eps = 1e-5
  cdt = compute_dtype

  def layer_norm(v, g, b):
    # single-pass stats (one fewer cross-lane reduction); stats in fp32
    mu = jnp.mean(v, axis=-1, keepdims=True)
    ms = jnp.mean(v * v, axis=-1, keepdims=True)
    var = ms - mu * mu
    return (v - mu) * jax.lax.rsqrt(var + eps) * g + b

  def kernel(x_ref, w_emb_ref, b_emb_ref, w_dwt_ref,
             wqkv_ref, bqkv_ref, wo_ref, bo_ref,
             w1_ref, b1_ref, w2_ref, b2_ref, ln_ref,
             wc_ref, bc_ref, out_ref):
    # ---- stem: embedding (one 2-D matmul, M = Bb*L) + stacked db4 DWT ----
    x2 = x_ref[...].astype(cdt).reshape(BL, -1)                     # (BL, F)
    emb = jnp.dot(x2, w_emb_ref[...],
                  preferred_element_type=jnp.float32) + b_emb_ref[...]
    emb3 = emb.reshape(block_b, L, D).astype(cdt)
    # batched (per-sample) DWT along time; small matrix, broadcast is cheap
    w_dwt = jnp.broadcast_to(w_dwt_ref[...], (block_b, L, L))
    seq = jnp.einsum('btl,bld->btd', w_dwt, emb3,
                     preferred_element_type=jnp.float32).reshape(BL, D)

    # ---- e_layers post-LN encoder layers (weights resident in VMEM) ----
    for l in range(e_layers):                                       # static
      ln = ln_ref[l]                                                 # (4, D)
      seq_c = seq.astype(cdt)                                        # one cast

      # fused QKV: one (BL, D) x (D, 128-padded) matmul; one cast of result
      qkv = (jnp.dot(seq_c, wqkv_ref[l],
                     preferred_element_type=jnp.float32)
             + bqkv_ref[l]).astype(cdt)
      qkv3 = qkv.reshape(block_b, L, -1)                             # (Bb,L,128)

      heads = []
      for h in range(H):                                             # static
        qh = qkv3[..., h * dh:(h + 1) * dh]
        kh = qkv3[..., D + h * dh:D + (h + 1) * dh]
        vh = qkv3[..., 2 * D + h * dh:2 * D + (h + 1) * dh]
        # 1/sqrt(dh) is folded into Wq/bq at init.
        s = jnp.einsum('bld,bmd->blm', qh, kh,
                       preferred_element_type=jnp.float32)
        s = s - jnp.max(s, axis=-1, keepdims=True)
        p = jnp.exp(s)
        inv = pl.reciprocal(jnp.sum(p, axis=-1, keepdims=True), approx=True)
        oh = jnp.einsum('blm,bmd->bld', p.astype(cdt), vh,
                        preferred_element_type=jnp.float32)          # (Bb,L,dh)
        heads.append(oh * inv)          # normalize the PV rows (dh lanes/row)

      # merge heads along lanes, then ONE (BL, D) x (D, D) Wo matmul
      attn = jnp.concatenate(heads, axis=-1).reshape(BL, D)
      attn = jnp.dot(attn.astype(cdt), wo_ref[l],
                     preferred_element_type=jnp.float32) + bo_ref[l]

      seq1 = layer_norm(seq + attn, ln[0:1, :], ln[1:2, :])

      ffn = jnp.dot(seq1.astype(cdt), w1_ref[l],
                    preferred_element_type=jnp.float32) + b1_ref[l]
      ffn = jnp.maximum(ffn, 0.0)
      ffn = jnp.dot(ffn.astype(cdt), w2_ref[l],
                    preferred_element_type=jnp.float32) + b2_ref[l]
      seq = layer_norm(seq1 + ffn, ln[2:3, :], ln[3:4, :])

    # ---- classification head: mean-pool over time + linear ----
    pooled = jnp.mean(seq.reshape(block_b, L, D), axis=1)            # (Bb, D)
    out_ref[...] = (jnp.dot(pooled.astype(cdt), wc_ref[...],
                            preferred_element_type=jnp.float32)
                    + bc_ref[...])

  return kernel


# ----------------------------------------------------------------------------
# Wrapper
# ----------------------------------------------------------------------------
def wavelet_adformer2_forward(x, params, *, e_layers, num_heads, block_b=None):
  B, L, F = x.shape
  D = params['W_emb'].shape[1]
  C = params['Wc'].shape[1]

  if block_b is None:
    # Two batch blocks so both TensorCores get work on dual-TC chips (v7x);
    # the one extra ~0.35us grid step is negligible on single-TC v5e/v6e.
    block_b = B // 2 if (B % 2 == 0 and B >= 2) else B
  assert B % block_b == 0
  nb = B // block_b

  kernel = _make_kernel(num_heads=num_heads, d_model=D, win_size=L,
                        block_b=block_b, e_layers=e_layers,
                        compute_dtype=jnp.bfloat16)

  def resident(a):               # whole array in VMEM, same block every step
    nd = a.ndim
    return pl.BlockSpec(a.shape, lambda b, _nd=nd: (0,) * _nd)

  in_specs = [
      pl.BlockSpec((block_b, L, F), lambda b: (b, 0, 0)),
      resident(params['W_emb']), resident(params['b_emb']),
      resident(params['W_dwt']),
      resident(params['Wqkv']), resident(params['bqkv']),
      resident(params['Wo']), resident(params['bo']),
      resident(params['W1']), resident(params['b1']),
      resident(params['W2']), resident(params['b2']),
      resident(params['ln']),
      resident(params['Wc']), resident(params['bc']),
  ]
  out_specs = pl.BlockSpec((pl.Squeezed(), block_b, C), lambda b: (b, 0, 0))

  out = pl.pallas_call(
      kernel,
      out_shape=jax.ShapeDtypeStruct((nb, block_b, C), jnp.float32),
      grid_spec=pltpu.PrefetchScalarGridSpec(
          num_scalar_prefetch=0,
          grid=(nb,),
          in_specs=in_specs,
          out_specs=out_specs,
      ),
      compiler_params=pltpu.CompilerParams(
          dimension_semantics=("parallel",),
          vmem_limit_bytes=32 * 1024 * 1024,   # fits v5e/v6e/v7x scoped VMEM
      ),
  )(x, params['W_emb'], params['b_emb'], params['W_dwt'],
    params['Wqkv'], params['bqkv'], params['Wo'], params['bo'],
    params['W1'], params['b1'], params['W2'], params['b2'], params['ln'],
    params['Wc'], params['bc'])
  return out.reshape(B, C)


# ----------------------------------------------------------------------------
# Pure-JAX reference (same math / same mixed precision) for validation
# ----------------------------------------------------------------------------
def reference_forward(x, params, *, e_layers, num_heads):
  cdt = jnp.bfloat16
  D = params['W_emb'].shape[1]
  H = num_heads
  dh = D // H

  def layer_norm(v, g, b):
    mu = jnp.mean(v, axis=-1, keepdims=True)
    var = jnp.mean((v - mu) ** 2, axis=-1, keepdims=True)
    return (v - mu) * jax.lax.rsqrt(var + 1e-5) * g + b

  emb = jnp.einsum('blf,fd->bld', x.astype(cdt), params['W_emb'],
                   preferred_element_type=jnp.float32) + params['b_emb']
  seq = jnp.einsum('tl,bld->btd', params['W_dwt'], emb.astype(cdt),
                   preferred_element_type=jnp.float32)

  for l in range(e_layers):
    Wqkv = params['Wqkv'][l]; bqkv = params['bqkv'][l]
    Wo = params['Wo'][l]; bo = params['bo'][l]
    W1 = params['W1'][l]; b1 = params['b1'][l]
    W2 = params['W2'][l]; b2 = params['b2'][l]
    ln = params['ln'][l]

    qkv = jnp.einsum('bld,de->ble', seq.astype(cdt), Wqkv,
                     preferred_element_type=jnp.float32) + bqkv
    q, k, v = qkv[..., :D], qkv[..., D:2 * D], qkv[..., 2 * D:3 * D]
    heads = []
    for h in range(H):
      sl = slice(h * dh, (h + 1) * dh)
      s = jnp.einsum('bld,bmd->blm', q[..., sl].astype(cdt),
                     k[..., sl].astype(cdt),
                     preferred_element_type=jnp.float32)
      p = jax.nn.softmax(s, axis=-1)
      heads.append(jnp.einsum('blm,bmd->bld', p.astype(cdt),
                              v[..., sl].astype(cdt),
                              preferred_element_type=jnp.float32))
    attn = jnp.einsum('bld,de->ble', jnp.concatenate(heads, -1).astype(cdt),
                      Wo, preferred_element_type=jnp.float32) + bo
    seq = layer_norm(seq + attn, ln[0:1], ln[1:2])

    ffn = jnp.einsum('bld,de->ble', seq.astype(cdt), W1,
                     preferred_element_type=jnp.float32) + b1
    ffn = jnp.maximum(ffn, 0.0)
    ffn = jnp.einsum('bld,de->ble', ffn.astype(cdt), W2,
                     preferred_element_type=jnp.float32) + b2
    seq = layer_norm(seq + ffn, ln[2:3], ln[3:4])

  pooled = jnp.mean(seq, axis=1)
  return jnp.dot(pooled.astype(cdt), params['Wc'],
                 preferred_element_type=jnp.float32) + params['bc']


# ----------------------------------------------------------------------------
# Deterministic parameter construction (packed, lane-padded layout)
# ----------------------------------------------------------------------------
def init_params(key, feature_num, d_model, d_ff, e_layers, num_classes,
                win_size, num_heads, compute_dtype=jnp.bfloat16):
  dh = d_model // num_heads
  scale = 1.0 / float(np.sqrt(dh))
  qkv_w = 3 * d_model
  qkv_pad = ((qkv_w + 127) // 128) * 128       # lane-dense fused QKV width
  keys = iter(jax.random.split(key, 4 + 16 * e_layers))

  def dense(k, fi, fo):
    return jax.random.normal(k, (fi, fo), jnp.float32) / np.sqrt(fi)

  def bias(k, n):
    return 0.1 * jax.random.normal(k, (1, n), jnp.float32)

  p = {}
  p['W_emb'] = dense(next(keys), feature_num, d_model).astype(compute_dtype)
  p['b_emb'] = bias(next(keys), d_model)

  W_lo = _dwt_matrix(_DB4_LO, win_size)
  W_hi = _dwt_matrix(_DB4_HI, win_size)
  p['W_dwt'] = jnp.asarray(np.concatenate([W_lo, W_hi], axis=0)
                           ).astype(compute_dtype)                  # (L, L)

  Wqkv, bqkv, Wo, bo, W1, b1, W2, b2, ln = ([] for _ in range(9))
  for _ in range(e_layers):
    Wq = dense(next(keys), d_model, d_model) * scale   # fold 1/sqrt(dh) here
    bq = bias(next(keys), d_model) * scale
    Wk = dense(next(keys), d_model, d_model); bk = bias(next(keys), d_model)
    Wv = dense(next(keys), d_model, d_model); bv = bias(next(keys), d_model)
    Wf = jnp.concatenate([Wq, Wk, Wv], axis=1)                      # (D, 3D)
    bf = jnp.concatenate([bq, bk, bv], axis=1)                      # (1, 3D)
    if qkv_pad > qkv_w:                           # zero-pad to 128 lanes
      Wf = jnp.pad(Wf, ((0, 0), (0, qkv_pad - qkv_w)))
      bf = jnp.pad(bf, ((0, 0), (0, qkv_pad - qkv_w)))
    Wqkv.append(Wf); bqkv.append(bf)
    Wo.append(dense(next(keys), d_model, d_model))
    bo.append(bias(next(keys), d_model))
    W1.append(dense(next(keys), d_model, d_ff))
    b1.append(bias(next(keys), d_ff))
    W2.append(dense(next(keys), d_ff, d_model))
    b2.append(bias(next(keys), d_model))
    g1 = 1.0 + 0.1 * jax.random.normal(next(keys), (1, d_model), jnp.float32)
    be1 = bias(next(keys), d_model)
    g2 = 1.0 + 0.1 * jax.random.normal(next(keys), (1, d_model), jnp.float32)
    be2 = bias(next(keys), d_model)
    ln.append(jnp.concatenate([g1, be1, g2, be2], axis=0))          # (4, D)

  p['Wqkv'] = jnp.stack(Wqkv).astype(compute_dtype)
  p['bqkv'] = jnp.stack(bqkv)
  p['Wo'] = jnp.stack(Wo).astype(compute_dtype)
  p['bo'] = jnp.stack(bo)
  p['W1'] = jnp.stack(W1).astype(compute_dtype)
  p['b1'] = jnp.stack(b1)
  p['W2'] = jnp.stack(W2).astype(compute_dtype)
  p['b2'] = jnp.stack(b2)
  p['ln'] = jnp.stack(ln)
  p['Wc'] = dense(next(keys), d_model, num_classes).astype(compute_dtype)
  p['bc'] = bias(next(keys), num_classes)
  return p


# ----------------------------------------------------------------------------
# Main
# ----------------------------------------------------------------------------
if __name__ == "__main__":
  batch = 8              # split into 2 parallel batch blocks of 4
  win_size = 16          # time length
  feature_num = 4
  d_model = 32
  d_ff = 64
  num_heads = 4
  e_layers = 2
  num_classes = 2

  key = jax.random.PRNGKey(0)
  k_x, k_p = jax.random.split(key)
  x = jax.random.normal(k_x, (batch, win_size, feature_num), jnp.float32)
  params = init_params(k_p, feature_num, d_model, d_ff, e_layers,
                       num_classes, win_size, num_heads)

  out = wavelet_adformer2_forward(x, params,
                                  e_layers=e_layers, num_heads=num_heads)
  out = jax.block_until_ready(out)

  ref = jax.block_until_ready(
      reference_forward(x, params, e_layers=e_layers, num_heads=num_heads))

  np.testing.assert_allclose(np.asarray(out), np.asarray(ref),
                             rtol=1e-2, atol=1e-2)
  assert out.shape == (batch, num_classes)
  print("KERNEL_OK")
</pallas_src>

<mosaic_0001>
module attributes {stable_mosaic.version = 11 : i64} {
  func.func @kernel(%arg0: i32, %arg1: memref<4x16x4xf32, #tpu.memory_space<vmem>>, %arg2: memref<4x32xbf16, #tpu.memory_space<vmem>>, %arg3: memref<1x32xf32, #tpu.memory_space<vmem>>, %arg4: memref<16x16xbf16, #tpu.memory_space<vmem>>, %arg5: memref<2x32x128xbf16, #tpu.memory_space<vmem>>, %arg6: memref<2x1x128xf32, #tpu.memory_space<vmem>>, %arg7: memref<2x32x32xbf16, #tpu.memory_space<vmem>>, %arg8: memref<2x1x32xf32, #tpu.memory_space<vmem>>, %arg9: memref<2x32x64xbf16, #tpu.memory_space<vmem>>, %arg10: memref<2x1x64xf32, #tpu.memory_space<vmem>>, %arg11: memref<2x64x32xbf16, #tpu.memory_space<vmem>>, %arg12: memref<2x1x32xf32, #tpu.memory_space<vmem>>, %arg13: memref<2x4x32xf32, #tpu.memory_space<vmem>>, %arg14: memref<32x2xbf16, #tpu.memory_space<vmem>>, %arg15: memref<1x2xf32, #tpu.memory_space<vmem>>, %arg16: memref<1x4x2xf32, #tpu.memory_space<vmem>>) attributes {dimension_semantics = [#tpu.dimension_semantics<parallel>], iteration_bounds = array<i64: 2>, scalar_prefetch = 0 : i64, scratch_operands = 0 : i64, tpu.core_type = #tpu.core_type<tc>, window_params = [{transform_indices = @transform_0, window_bounds = array<i64: 4, 16, 4>}, {pipeline_mode = #tpu.pipeline_mode<synchronous>, transform_indices = @transform_1, window_bounds = array<i64: 4, 32>}, {pipeline_mode = #tpu.pipeline_mode<synchronous>, transform_indices = @transform_2, window_bounds = array<i64: 1, 32>}, {pipeline_mode = #tpu.pipeline_mode<synchronous>, transform_indices = @transform_3, window_bounds = array<i64: 16, 16>}, {pipeline_mode = #tpu.pipeline_mode<synchronous>, transform_indices = @transform_4, window_bounds = array<i64: 2, 32, 128>}, {pipeline_mode = #tpu.pipeline_mode<synchronous>, transform_indices = @transform_5, window_bounds = array<i64: 2, 1, 128>}, {pipeline_mode = #tpu.pipeline_mode<synchronous>, transform_indices = @transform_6, window_bounds = array<i64: 2, 32, 32>}, {pipeline_mode = #tpu.pipeline_mode<synchronous>, transform_indices = @transform_7, window_bounds = array<i64: 2, 1, 32>}, {pipeline_mode = #tpu.pipeline_mode<synchronous>, transform_indices = @transform_8, window_bounds = array<i64: 2, 32, 64>}, {pipeline_mode = #tpu.pipeline_mode<synchronous>, transform_indices = @transform_9, window_bounds = array<i64: 2, 1, 64>}, {pipeline_mode = #tpu.pipeline_mode<synchronous>, transform_indices = @transform_10, window_bounds = array<i64: 2, 64, 32>}, {pipeline_mode = #tpu.pipeline_mode<synchronous>, transform_indices = @transform_11, window_bounds = array<i64: 2, 1, 32>}, {pipeline_mode = #tpu.pipeline_mode<synchronous>, transform_indices = @transform_12, window_bounds = array<i64: 2, 4, 32>}, {pipeline_mode = #tpu.pipeline_mode<synchronous>, transform_indices = @transform_13, window_bounds = array<i64: 32, 2>}, {pipeline_mode = #tpu.pipeline_mode<synchronous>, transform_indices = @transform_14, window_bounds = array<i64: 1, 2>}, {transform_indices = @transform_15, window_bounds = array<i64: 1, 4, 2>}]} {
    %c0 = arith.constant 0 : index
    %c0_0 = arith.constant 0 : index
    %c0_1 = arith.constant 0 : index
    %0 = vector.load %arg1[%c0, %c0_0, %c0_1] : memref<4x16x4xf32, #tpu.memory_space<vmem>>, vector<4x16x4xf32>
    %1 = arith.truncf %0 : vector<4x16x4xf32> to vector<4x16x4xbf16>
    %2 = vector.shape_cast %1 : vector<4x16x4xbf16> to vector<64x4xbf16>
    %c0_2 = arith.constant 0 : index
    %c0_3 = arith.constant 0 : index
    %3 = vector.load %arg2[%c0_2, %c0_3] : memref<4x32xbf16, #tpu.memory_space<vmem>>, vector<4x32xbf16>
    %cst = arith.constant dense<0.000000e+00> : vector<64x32xf32>
    %4 = tpu.matmul %2, %3, %cst {dimension_numbers = #tpu.dot_dimension_numbers<[1], [0], [0], [1], [0, 0, 1, 1], [], []>} : vector<64x4xbf16>, vector<4x32xbf16>, vector<64x32xf32> -> vector<64x32xf32>
    %c0_4 = arith.constant 0 : index
    %c0_5 = arith.constant 0 : index
    %5 = vector.load %arg3[%c0_4, %c0_5] : memref<1x32xf32, #tpu.memory_space<vmem>>, vector<1x32xf32>
    %6 = vector.broadcast %5 : vector<1x32xf32> to vector<64x32xf32>
    %7 = arith.addf %4, %6 : vector<64x32xf32>
    %8 = vector.shape_cast %7 : vector<64x32xf32> to vector<4x16x32xf32>
    %9 = arith.truncf %8 : vector<4x16x32xf32> to vector<4x16x32xbf16>
    %c0_6 = arith.constant 0 : index
    %c0_7 = arith.constant 0 : index
    %10 = vector.load %arg4[%c0_6, %c0_7] : memref<16x16xbf16, #tpu.memory_space<vmem>>, vector<16x16xbf16>
    %11 = vector.shape_cast %10 : vector<16x16xbf16> to vector<1x16x16xbf16>
    %12 = vector.broadcast %11 : vector<1x16x16xbf16> to vector<4x16x16xbf16>
    "tpu.trace_start"() <{level = 10 : i32, message = "btl,bld->btd"}> : () -> ()
    %cst_8 = arith.constant dense<0.000000e+00> : vector<4x16x32xf32>
    %13 = tpu.matmul %12, %9, %cst_8 {dimension_numbers = #tpu.dot_dimension_numbers<[2], [1], [1], [2], [0, 0, 0, 1, 1, 2], [0], [0]>} : vector<4x16x16xbf16>, vector<4x16x32xbf16>, vector<4x16x32xf32> -> vector<4x16x32xf32>
    "tpu.trace_stop"() : () -> ()
    %14 = vector.shape_cast %13 : vector<4x16x32xf32> to vector<64x32xf32>
    %c0_9 = arith.constant 0 : index
    %c0_10 = arith.constant 0 : index
    %c0_11 = arith.constant 0 : index
    %15 = vector.load %arg13[%c0_9, %c0_10, %c0_11] : memref<2x4x32xf32, #tpu.memory_space<vmem>>, vector<1x4x32xf32>
    %16 = vector.shape_cast %15 : vector<1x4x32xf32> to vector<4x32xf32>
    %17 = arith.truncf %14 : vector<64x32xf32> to vector<64x32xbf16>
    %c0_12 = arith.constant 0 : index
    %c0_13 = arith.constant 0 : index
    %c0_14 = arith.constant 0 : index
    %18 = vector.load %arg5[%c0_12, %c0_13, %c0_14] : memref<2x32x128xbf16, #tpu.memory_space<vmem>>, vector<1x32x128xbf16>
    %19 = vector.shape_cast %18 : vector<1x32x128xbf16> to vector<32x128xbf16>
    %cst_15 = arith.constant dense<0.000000e+00> : vector<64x128xf32>
    %20 = tpu.matmul %17, %19, %cst_15 {dimension_numbers = #tpu.dot_dimension_numbers<[1], [0], [0], [1], [0, 0, 1, 1], [], []>} : vector<64x32xbf16>, vector<32x128xbf16>, vector<64x128xf32> -> vector<64x128xf32>
    %c0_16 = arith.constant 0 : index
    %c0_17 = arith.constant 0 : index
    %c0_18 = arith.constant 0 : index
    %21 = vector.load %arg6[%c0_16, %c0_17, %c0_18] : memref<2x1x128xf32, #tpu.memory_space<vmem>>, vector<1x1x128xf32>
    %22 = vector.shape_cast %21 : vector<1x1x128xf32> to vector<1x128xf32>
    %23 = vector.broadcast %22 : vector<1x128xf32> to vector<64x128xf32>
    %24 = arith.addf %20, %23 : vector<64x128xf32>
    %25 = arith.truncf %24 : vector<64x128xf32> to vector<64x128xbf16>
    %26 = vector.shape_cast %25 : vector<64x128xbf16> to vector<4x16x128xbf16>
    %27 = vector.extract_strided_slice %26 {offsets = [0, 0, 0], sizes = [4, 16, 8], strides = [1, 1, 1]} : vector<4x16x128xbf16> to vector<4x16x8xbf16>
    %28 = vector.extract_strided_slice %26 {offsets = [0, 0, 32], sizes = [4, 16, 8], strides = [1, 1, 1]} : vector<4x16x128xbf16> to vector<4x16x8xbf16>
    %29 = vector.extract_strided_slice %26 {offsets = [0, 0, 64], sizes = [4, 16, 8], strides = [1, 1, 1]} : vector<4x16x128xbf16> to vector<4x16x8xbf16>
    "tpu.trace_start"() <{level = 10 : i32, message = "bld,bmd->blm"}> : () -> ()
    %cst_19 = arith.constant dense<0.000000e+00> : vector<4x16x16xf32>
    %30 = tpu.matmul %27, %28, %cst_19 {dimension_numbers = #tpu.dot_dimension_numbers<[2], [2], [1], [1], [0, 0, 0, 1, 1, 1], [0], [0]>} : vector<4x16x8xbf16>, vector<4x16x8xbf16>, vector<4x16x16xf32> -> vector<4x16x16xf32>
    "tpu.trace_stop"() : () -> ()
    %cst_20 = arith.constant dense<0xFF800000> : vector<4x16xf32>
    %31 = vector.multi_reduction <maximumf>, %30, %cst_20 [2] : vector<4x16x16xf32> to vector<4x16xf32>
    %32 = vector.shape_cast %31 : vector<4x16xf32> to vector<4x16x1xf32>
    %33 = vector.broadcast %32 : vector<4x16x1xf32> to vector<4x16x16xf32>
    %34 = arith.subf %30, %33 : vector<4x16x16xf32>
    %35 = math.exp %34 : vector<4x16x16xf32>
    %cst_21 = arith.constant dense<0.000000e+00> : vector<4x16xf32>
    %36 = vector.multi_reduction <add>, %35, %cst_21 [2] : vector<4x16x16xf32> to vector<4x16xf32>
    %37 = vector.shape_cast %36 : vector<4x16xf32> to vector<4x16x1xf32>
    %38 = tpu.reciprocal %37 {approx = true} : vector<4x16x1xf32> -> vector<4x16x1xf32>
    %39 = arith.truncf %35 : vector<4x16x16xf32> to vector<4x16x16xbf16>
    "tpu.trace_start"() <{level = 10 : i32, message = "blm,bmd->bld"}> : () -> ()
    %cst_22 = arith.constant dense<0.000000e+00> : vector<4x16x8xf32>
    %40 = tpu.matmul %39, %29, %cst_22 {dimension_numbers = #tpu.dot_dimension_numbers<[2], [1], [1], [2], [0, 0, 0, 1, 1, 2], [0], [0]>} : vector<4x16x16xbf16>, vector<4x16x8xbf16>, vector<4x16x8xf32> -> vector<4x16x8xf32>
    "tpu.trace_stop"() : () -> ()
    %41 = vector.broadcast %38 : vector<4x16x1xf32> to vector<4x16x8xf32>
    %42 = arith.mulf %40, %41 : vector<4x16x8xf32>
    %43 = vector.extract_strided_slice %26 {offsets = [0, 0, 8], sizes = [4, 16, 8], strides = [1, 1, 1]} : vector<4x16x128xbf16> to vector<4x16x8xbf16>
    %44 = vector.extract_strided_slice %26 {offsets = [0, 0, 40], sizes = [4, 16, 8], strides = [1, 1, 1]} : vector<4x16x128xbf16> to vector<4x16x8xbf16>
    %45 = vector.extract_strided_slice %26 {offsets = [0, 0, 72], sizes = [4, 16, 8], strides = [1, 1, 1]} : vector<4x16x128xbf16> to vector<4x16x8xbf16>
    "tpu.trace_start"() <{level = 10 : i32, message = "bld,bmd->blm"}> : () -> ()
    %cst_23 = arith.constant dense<0.000000e+00> : vector<4x16x16xf32>
    %46 = tpu.matmul %43, %44, %cst_23 {dimension_numbers = #tpu.dot_dimension_numbers<[2], [2], [1], [1], [0, 0, 0, 1, 1, 1], [0], [0]>} : vector<4x16x8xbf16>, vector<4x16x8xbf16>, vector<4x16x16xf32> -> vector<4x16x16xf32>
    "tpu.trace_stop"() : () -> ()
    %cst_24 = arith.constant dense<0xFF800000> : vector<4x16xf32>
    %47 = vector.multi_reduction <maximumf>, %46, %cst_24 [2] : vector<4x16x16xf32> to vector<4x16xf32>
    %48 = vector.shape_cast %47 : vector<4x16xf32> to vector<4x16x1xf32>
    %49 = vector.broadcast %48 : vector<4x16x1xf32> to vector<4x16x16xf32>
    %50 = arith.subf %46, %49 : vector<4x16x16xf32>
    %51 = math.exp %50 : vector<4x16x16xf32>
    %cst_25 = arith.constant dense<0.000000e+00> : vector<4x16xf32>
    %52 = vector.multi_reduction <add>, %51, %cst_25 [2] : vector<4x16x16xf32> to vector<4x16xf32>
    %53 = vector.shape_cast %52 : vector<4x16xf32> to vector<4x16x1xf32>
    %54 = tpu.reciprocal %53 {approx = true} : vector<4x16x1xf32> -> vector<4x16x1xf32>
    %55 = arith.truncf %51 : vector<4x16x16xf32> to vector<4x16x16xbf16>
    "tpu.trace_start"() <{level = 10 : i32, message = "blm,bmd->bld"}> : () -> ()
    %cst_26 = arith.constant dense<0.000000e+00> : vector<4x16x8xf32>
    %56 = tpu.matmul %55, %45, %cst_26 {dimension_numbers = #tpu.dot_dimension_numbers<[2], [1], [1], [2], [0, 0, 0, 1, 1, 2], [0], [0]>} : vector<4x16x16xbf16>, vector<4x16x8xbf16>, vector<4x16x8xf32> -> vector<4x16x8xf32>
    "tpu.trace_stop"() : () -> ()
    %57 = vector.broadcast %54 : vector<4x16x1xf32> to vector<4x16x8xf32>
    %58 = arith.mulf %56, %57 : vector<4x16x8xf32>
    %59 = vector.extract_strided_slice %26 {offsets = [0, 0, 16], sizes = [4, 16, 8], strides = [1, 1, 1]} : vector<4x16x128xbf16> to vector<4x16x8xbf16>
    %60 = vector.extract_strided_slice %26 {offsets = [0, 0, 48], sizes = [4, 16, 8], strides = [1, 1, 1]} : vector<4x16x128xbf16> to vector<4x16x8xbf16>
    %61 = vector.extract_strided_slice %26 {offsets = [0, 0, 80], sizes = [4, 16, 8], strides = [1, 1, 1]} : vector<4x16x128xbf16> to vector<4x16x8xbf16>
    "tpu.trace_start"() <{level = 10 : i32, message = "bld,bmd->blm"}> : () -> ()
    %cst_27 = arith.constant dense<0.000000e+00> : vector<4x16x16xf32>
    %62 = tpu.matmul %59, %60, %cst_27 {dimension_numbers = #tpu.dot_dimension_numbers<[2], [2], [1], [1], [0, 0, 0, 1, 1, 1], [0], [0]>} : vector<4x16x8xbf16>, vector<4x16x8xbf16>, vector<4x16x16xf32> -> vector<4x16x16xf32>
    "tpu.trace_stop"() : () -> ()
    %cst_28 = arith.constant dense<0xFF800000> : vector<4x16xf32>
    %63 = vector.multi_reduction <maximumf>, %62, %cst_28 [2] : vector<4x16x16xf32> to vector<4x16xf32>
    %64 = vector.shape_cast %63 : vector<4x16xf32> to vector<4x16x1xf32>
    %65 = vector.broadcast %64 : vector<4x16x1xf32> to vector<4x16x16xf32>
    %66 = arith.subf %62, %65 : vector<4x16x16xf32>
    %67 = math.exp %66 : vector<4x16x16xf32>
    %cst_29 = arith.constant dense<0.000000e+00> : vector<4x16xf32>
    %68 = vector.multi_reduction <add>, %67, %cst_29 [2] : vector<4x16x16xf32> to vector<4x16xf32>
    %69 = vector.shape_cast %68 : vector<4x16xf32> to vector<4x16x1xf32>
    %70 = tpu.reciprocal %69 {approx = true} : vector<4x16x1xf32> -> vector<4x16x1xf32>
    %71 = arith.truncf %67 : vector<4x16x16xf32> to vector<4x16x16xbf16>
    "tpu.trace_start"() <{level = 10 : i32, message = "blm,bmd->bld"}> : () -> ()
    %cst_30 = arith.constant dense<0.000000e+00> : vector<4x16x8xf32>
    %72 = tpu.matmul %71, %61, %cst_30 {dimension_numbers = #tpu.dot_dimension_numbers<[2], [1], [1], [2], [0, 0, 0, 1, 1, 2], [0], [0]>} : vector<4x16x16xbf16>, vector<4x16x8xbf16>, vector<4x16x8xf32> -> vector<4x16x8xf32>
    "tpu.trace_stop"() : () -> ()
    %73 = vector.broadcast %70 : vector<4x16x1xf32> to vector<4x16x8xf32>
    %74 = arith.mulf %72, %73 : vector<4x16x8xf32>
    %75 = vector.extract_strided_slice %26 {offsets = [0, 0, 24], sizes = [4, 16, 8], strides = [1, 1, 1]} : vector<4x16x128xbf16> to vector<4x16x8xbf16>
    %76 = vector.extract_strided_slice %26 {offsets = [0, 0, 56], sizes = [4, 16, 8], strides = [1, 1, 1]} : vector<4x16x128xbf16> to vector<4x16x8xbf16>
    %77 = vector.extract_strided_slice %26 {offsets = [0, 0, 88], sizes = [4, 16, 8], strides = [1, 1, 1]} : vector<4x16x128xbf16> to vector<4x16x8xbf16>
    "tpu.trace_start"() <{level = 10 : i32, message = "bld,bmd->blm"}> : () -> ()
    %cst_31 = arith.constant dense<0.000000e+00> : vector<4x16x16xf32>
    %78 = tpu.matmul %75, %76, %cst_31 {dimension_numbers = #tpu.dot_dimension_numbers<[2], [2], [1], [1], [0, 0, 0, 1, 1, 1], [0], [0]>} : vector<4x16x8xbf16>, vector<4x16x8xbf16>, vector<4x16x16xf32> -> vector<4x16x16xf32>
    "tpu.trace_stop"() : () -> ()
    %cst_32 = arith.constant dense<0xFF800000> : vector<4x16xf32>
    %79 = vector.multi_reduction <maximumf>, %78, %cst_32 [2] : vector<4x16x16xf32> to vector<4x16xf32>
    %80 = vector.shape_cast %79 : vector<4x16xf32> to vector<4x16x1xf32>
    %81 = vector.broadcast %80 : vector<4x16x1xf32> to vector<4x16x16xf32>
    %82 = arith.subf %78, %81 : vector<4x16x16xf32>
    %83 = math.exp %82 : vector<4x16x16xf32>
    %cst_33 = arith.constant dense<0.000000e+00> : vector<4x16xf32>
    %84 = vector.multi_reduction <add>, %83, %cst_33 [2] : vector<4x16x16xf32> to vector<4x16xf32>
    %85 = vector.shape_cast %84 : vector<4x16xf32> to vector<4x16x1xf32>
    %86 = tpu.reciprocal %85 {approx = true} : vector<4x16x1xf32> -> vector<4x16x1xf32>
    %87 = arith.truncf %83 : vector<4x16x16xf32> to vector<4x16x16xbf16>
    "tpu.trace_start"() <{level = 10 : i32, message = "blm,bmd->bld"}> : () -> ()
    %cst_34 = arith.constant dense<0.000000e+00> : vector<4x16x8xf32>
    %88 = tpu.matmul %87, %77, %cst_34 {dimension_numbers = #tpu.dot_dimension_numbers<[2], [1], [1], [2], [0, 0, 0, 1, 1, 2], [0], [0]>} : vector<4x16x16xbf16>, vector<4x16x8xbf16>, vector<4x16x8xf32> -> vector<4x16x8xf32>
    "tpu.trace_stop"() : () -> ()
    %89 = vector.broadcast %86 : vector<4x16x1xf32> to vector<4x16x8xf32>
    %90 = arith.mulf %88, %89 : vector<4x16x8xf32>
    %91 = tpu.concatenate %42, %58, %74, %90 in 2 : vector<4x16x8xf32>, vector<4x16x8xf32>, vector<4x16x8xf32>, vector<4x16x8xf32> -> vector<4x16x32xf32>
    %92 = vector.shape_cast %91 : vector<4x16x32xf32> to vector<64x32xf32>
    %93 = arith.truncf %92 : vector<64x32xf32> to vector<64x32xbf16>
    %c0_35 = arith.constant 0 : index
    %c0_36 = arith.constant 0 : index
    %c0_37 = arith.constant 0 : index
    %94 = vector.load %arg7[%c0_35, %c0_36, %c0_37] : memref<2x32x32xbf16, #tpu.memory_space<vmem>>, vector<1x32x32xbf16>
    %95 = vector.shape_cast %94 : vector<1x32x32xbf16> to vector<32x32xbf16>
    %cst_38 = arith.constant dense<0.000000e+00> : vector<64x32xf32>
    %96 = tpu.matmul %93, %95, %cst_38 {dimension_numbers = #tpu.dot_dimension_numbers<[1], [0], [0], [1], [0, 0, 1, 1], [], []>} : vector<64x32xbf16>, vector<32x32xbf16>, vector<64x32xf32> -> vector<64x32xf32>
    %c0_39 = arith.constant 0 : index
    %c0_40 = arith.constant 0 : index
    %c0_41 = arith.constant 0 : index
    %97 = vector.load %arg8[%c0_39, %c0_40, %c0_41] : memref<2x1x32xf32, #tpu.memory_space<vmem>>, vector<1x1x32xf32>
    %98 = vector.shape_cast %97 : vector<1x1x32xf32> to vector<1x32xf32>
    %99 = vector.broadcast %98 : vector<1x32xf32> to vector<64x32xf32>
    %100 = arith.addf %96, %99 : vector<64x32xf32>
    %101 = arith.addf %14, %100 : vector<64x32xf32>
    %102 = vector.extract_strided_slice %16 {offsets = [0, 0], sizes = [1, 32], strides = [1, 1]} : vector<4x32xf32> to vector<1x32xf32>
    %103 = vector.extract_strided_slice %16 {offsets = [1, 0], sizes = [1, 32], strides = [1, 1]} : vector<4x32xf32> to vector<1x32xf32>
    %cst_42 = arith.constant dense<0.000000e+00> : vector<64xf32>
    %104 = vector.multi_reduction <add>, %101, %cst_42 [1] : vector<64x32xf32> to vector<64xf32>
    %105 = vector.shape_cast %104 : vector<64xf32> to vector<64x1xf32>
    %cst_43 = arith.constant 3.200000e+01 : f32
    %106 = vector.broadcast %cst_43 : f32 to vector<64x1xf32>
    %107 = arith.divf %105, %106 : vector<64x1xf32>
    %108 = arith.mulf %101, %101 : vector<64x32xf32>
    %cst_44 = arith.constant dense<0.000000e+00> : vector<64xf32>
    %109 = vector.multi_reduction <add>, %108, %cst_44 [1] : vector<64x32xf32> to vector<64xf32>
    %110 = vector.shape_cast %109 : vector<64xf32> to vector<64x1xf32>
    %cst_45 = arith.constant 3.200000e+01 : f32
    %111 = vector.broadcast %cst_45 : f32 to vector<64x1xf32>
    %112 = arith.divf %110, %111 : vector<64x1xf32>
    %113 = arith.mulf %107, %107 : vector<64x1xf32>
    %114 = arith.subf %112, %113 : vector<64x1xf32>
    %115 = vector.broadcast %107 : vector<64x1xf32> to vector<64x32xf32>
    %116 = arith.subf %101, %115 : vector<64x32xf32>
    %cst_46 = arith.constant 9.99999974E-6 : f32
    %117 = vector.broadcast %cst_46 : f32 to vector<64x1xf32>
    %118 = arith.addf %114, %117 : vector<64x1xf32>
    %119 = math.rsqrt %118 : vector<64x1xf32>
    %120 = vector.broadcast %119 : vector<64x1xf32> to vector<64x32xf32>
    %121 = arith.mulf %116, %120 : vector<64x32xf32>
    %122 = vector.broadcast %102 : vector<1x32xf32> to vector<64x32xf32>
    %123 = arith.mulf %121, %122 : vector<64x32xf32>
    %124 = vector.broadcast %103 : vector<1x32xf32> to vector<64x32xf32>
    %125 = arith.addf %123, %124 : vector<64x32xf32>
    %126 = arith.truncf %125 : vector<64x32xf32> to vector<64x32xbf16>
    %c0_47 = arith.constant 0 : index
    %c0_48 = arith.constant 0 : index
    %c0_49 = arith.constant 0 : index
    %127 = vector.load %arg9[%c0_47, %c0_48, %c0_49] : memref<2x32x64xbf16, #tpu.memory_space<vmem>>, vector<1x32x64xbf16>
    %128 = vector.shape_cast %127 : vector<1x32x64xbf16> to vector<32x64xbf16>
    %cst_50 = arith.constant dense<0.000000e+00> : vector<64x64xf32>
    %129 = tpu.matmul %126, %128, %cst_50 {dimension_numbers = #tpu.dot_dimension_numbers<[1], [0], [0], [1], [0, 0, 1, 1], [], []>} : vector<64x32xbf16>, vector<32x64xbf16>, vector<64x64xf32> -> vector<64x64xf32>
    %c0_51 = arith.constant 0 : index
    %c0_52 = arith.constant 0 : index
    %c0_53 = arith.constant 0 : index
    %130 = vector.load %arg10[%c0_51, %c0_52, %c0_53] : memref<2x1x64xf32, #tpu.memory_space<vmem>>, vector<1x1x64xf32>
    %131 = vector.shape_cast %130 : vector<1x1x64xf32> to vector<1x64xf32>
    %132 = vector.broadcast %131 : vector<1x64xf32> to vector<64x64xf32>
    %133 = arith.addf %129, %132 : vector<64x64xf32>
    %cst_54 = arith.constant 0.000000e+00 : f32
    %134 = vector.broadcast %cst_54 : f32 to vector<64x64xf32>
    %135 = arith.maximumf %133, %134 : vector<64x64xf32>
    %136 = arith.truncf %135 : vector<64x64xf32> to vector<64x64xbf16>
    %c0_55 = arith.constant 0 : index
    %c0_56 = arith.constant 0 : index
    %c0_57 = arith.constant 0 : index
    %137 = vector.load %arg11[%c0_55, %c0_56, %c0_57] : memref<2x64x32xbf16, #tpu.memory_space<vmem>>, vector<1x64x32xbf16>
    %138 = vector.shape_cast %137 : vector<1x64x32xbf16> to vector<64x32xbf16>
    %cst_58 = arith.constant dense<0.000000e+00> : vector<64x32xf32>
    %139 = tpu.matmul %136, %138, %cst_58 {dimension_numbers = #tpu.dot_dimension_numbers<[1], [0], [0], [1], [0, 0, 1, 1], [], []>} : vector<64x64xbf16>, vector<64x32xbf16>, vector<64x32xf32> -> vector<64x32xf32>
    %c0_59 = arith.constant 0 : index
    %c0_60 = arith.constant 0 : index
    %c0_61 = arith.constant 0 : index
    %140 = vector.load %arg12[%c0_59, %c0_60, %c0_61] : memref<2x1x32xf32, #tpu.memory_space<vmem>>, vector<1x1x32xf32>
    %141 = vector.shape_cast %140 : vector<1x1x32xf32> to vector<1x32xf32>
    %142 = vector.broadcast %141 : vector<1x32xf32> to vector<64x32xf32>
    %143 = arith.addf %139, %142 : vector<64x32xf32>
    %144 = arith.addf %125, %143 : vector<64x32xf32>
    %145 = vector.extract_strided_slice %16 {offsets = [2, 0], sizes = [1, 32], strides = [1, 1]} : vector<4x32xf32> to vector<1x32xf32>
    %146 = vector.extract_strided_slice %16 {offsets = [3, 0], sizes = [1, 32], strides = [1, 1]} : vector<4x32xf32> to vector<1x32xf32>
    %cst_62 = arith.constant dense<0.000000e+00> : vector<64xf32>
    %147 = vector.multi_reduction <add>, %144, %cst_62 [1] : vector<64x32xf32> to vector<64xf32>
    %148 = vector.shape_cast %147 : vector<64xf32> to vector<64x1xf32>
    %cst_63 = arith.constant 3.200000e+01 : f32
    %149 = vector.broadcast %cst_63 : f32 to vector<64x1xf32>
    %150 = arith.divf %148, %149 : vector<64x1xf32>
    %151 = arith.mulf %144, %144 : vector<64x32xf32>
    %cst_64 = arith.constant dense<0.000000e+00> : vector<64xf32>
    %152 = vector.multi_reduction <add>, %151, %cst_64 [1] : vector<64x32xf32> to vector<64xf32>
    %153 = vector.shape_cast %152 : vector<64xf32> to vector<64x1xf32>
    %cst_65 = arith.constant 3.200000e+01 : f32
    %154 = vector.broadcast %cst_65 : f32 to vector<64x1xf32>
    %155 = arith.divf %153, %154 : vector<64x1xf32>
    %156 = arith.mulf %150, %150 : vector<64x1xf32>
    %157 = arith.subf %155, %156 : vector<64x1xf32>
    %158 = vector.broadcast %150 : vector<64x1xf32> to vector<64x32xf32>
    %159 = arith.subf %144, %158 : vector<64x32xf32>
    %cst_66 = arith.constant 9.99999974E-6 : f32
    %160 = vector.broadcast %cst_66 : f32 to vector<64x1xf32>
    %161 = arith.addf %157, %160 : vector<64x1xf32>
    %162 = math.rsqrt %161 : vector<64x1xf32>
    %163 = vector.broadcast %162 : vector<64x1xf32> to vector<64x32xf32>
    %164 = arith.mulf %159, %163 : vector<64x32xf32>
    %165 = vector.broadcast %145 : vector<1x32xf32> to vector<64x32xf32>
    %166 = arith.mulf %164, %165 : vector<64x32xf32>
    %167 = vector.broadcast %146 : vector<1x32xf32> to vector<64x32xf32>
    %168 = arith.addf %166, %167 : vector<64x32xf32>
    %c1 = arith.constant 1 : index
    %c0_67 = arith.constant 0 : index
    %c0_68 = arith.constant 0 : index
    %169 = vector.load %arg13[%c1, %c0_67, %c0_68] : memref<2x4x32xf32, #tpu.memory_space<vmem>>, vector<1x4x32xf32>
    %170 = vector.shape_cast %169 : vector<1x4x32xf32> to vector<4x32xf32>
    %171 = arith.truncf %168 : vector<64x32xf32> to vector<64x32xbf16>
    %c1_69 = arith.constant 1 : index
    %c0_70 = arith.constant 0 : index
    %c0_71 = arith.constant 0 : index
    %172 = vector.load %arg5[%c1_69, %c0_70, %c0_71] : memref<2x32x128xbf16, #tpu.memory_space<vmem>>, vector<1x32x128xbf16>
    %173 = vector.shape_cast %172 : vector<1x32x128xbf16> to vector<32x128xbf16>
    %cst_72 = arith.constant dense<0.000000e+00> : vector<64x128xf32>
    %174 = tpu.matmul %171, %173, %cst_72 {dimension_numbers = #tpu.dot_dimension_numbers<[1], [0], [0], [1], [0, 0, 1, 1], [], []>} : vector<64x32xbf16>, vector<32x128xbf16>, vector<64x128xf32> -> vector<64x128xf32>
    %c1_73 = arith.constant 1 : index
    %c0_74 = arith.constant 0 : index
    %c0_75 = arith.constant 0 : index
    %175 = vector.load %arg6[%c1_73, %c0_74, %c0_75] : memref<2x1x128xf32, #tpu.memory_space<vmem>>, vector<1x1x128xf32>
    %176 = vector.shape_cast %175 : vector<1x1x128xf32> to vector<1x128xf32>
    %177 = vector.broadcast %176 : vector<1x128xf32> to vector<64x128xf32>
    %178 = arith.addf %174, %177 : vector<64x128xf32>
    %179 = arith.truncf %178 : vector<64x128xf32> to vector<64x128xbf16>
    %180 = vector.shape_cast %179 : vector<64x128xbf16> to vector<4x16x128xbf16>
    %181 = vector.extract_strided_slice %180 {offsets = [0, 0, 0], sizes = [4, 16, 8], strides = [1, 1, 1]} : vector<4x16x128xbf16> to vector<4x16x8xbf16>
    %182 = vector.extract_strided_slice %180 {offsets = [0, 0, 32], sizes = [4, 16, 8], strides = [1, 1, 1]} : vector<4x16x128xbf16> to vector<4x16x8xbf16>
    %183 = vector.extract_strided_slice %180 {offsets = [0, 0, 64], sizes = [4, 16, 8], strides = [1, 1, 1]} : vector<4x16x128xbf16> to vector<4x16x8xbf16>
    "tpu.trace_start"() <{level = 10 : i32, message = "bld,bmd->blm"}> : () -> ()
    %cst_76 = arith.constant dense<0.000000e+00> : vector<4x16x16xf32>
    %184 = tpu.matmul %181, %182, %cst_76 {dimension_numbers = #tpu.dot_dimension_numbers<[2], [2], [1], [1], [0, 0, 0, 1, 1, 1], [0], [0]>} : vector<4x16x8xbf16>, vector<4x16x8xbf16>, vector<4x16x16xf32> -> vector<4x16x16xf32>
    "tpu.trace_stop"() : () -> ()
    %cst_77 = arith.constant dense<0xFF800000> : vector<4x16xf32>
    %185 = vector.multi_reduction <maximumf>, %184, %cst_77 [2] : vector<4x16x16xf32> to vector<4x16xf32>
    %186 = vector.shape_cast %185 : vector<4x16xf32> to vector<4x16x1xf32>
    %187 = vector.broadcast %186 : vector<4x16x1xf32> to vector<4x16x16xf32>
    %188 = arith.subf %184, %187 : vector<4x16x16xf32>
    %189 = math.exp %188 : vector<4x16x16xf32>
    %cst_78 = arith.constant dense<0.000000e+00> : vector<4x16xf32>
    %190 = vector.multi_reduction <add>, %189, %cst_78 [2] : vector<4x16x16xf32> to vector<4x16xf32>
    %191 = vector.shape_cast %190 : vector<4x16xf32> to vector<4x16x1xf32>
    %192 = tpu.reciprocal %191 {approx = true} : vector<4x16x1xf32> -> vector<4x16x1xf32>
    %193 = arith.truncf %189 : vector<4x16x16xf32> to vector<4x16x16xbf16>
    "tpu.trace_start"() <{level = 10 : i32, message = "blm,bmd->bld"}> : () -> ()
    %cst_79 = arith.constant dense<0.000000e+00> : vector<4x16x8xf32>
    %194 = tpu.matmul %193, %183, %cst_79 {dimension_numbers = #tpu.dot_dimension_numbers<[2], [1], [1], [2], [0, 0, 0, 1, 1, 2], [0], [0]>} : vector<4x16x16xbf16>, vector<4x16x8xbf16>, vector<4x16x8xf32> -> vector<4x16x8xf32>
    "tpu.trace_stop"() : () -> ()
    %195 = vector.broadcast %192 : vector<4x16x1xf32> to vector<4x16x8xf32>
    %196 = arith.mulf %194, %195 : vector<4x16x8xf32>
    %197 = vector.extract_strided_slice %180 {offsets = [0, 0, 8], sizes = [4, 16, 8], strides = [1, 1, 1]} : vector<4x16x128xbf16> to vector<4x16x8xbf16>
    %198 = vector.extract_strided_slice %180 {offsets = [0, 0, 40], sizes = [4, 16, 8], strides = [1, 1, 1]} : vector<4x16x128xbf16> to vector<4x16x8xbf16>
    %199 = vector.extract_strided_slice %180 {offsets = [0, 0, 72], sizes = [4, 16, 8], strides = [1, 1, 1]} : vector<4x16x128xbf16> to vector<4x16x8xbf16>
    "tpu.trace_start"() <{level = 10 : i32, message = "bld,bmd->blm"}> : () -> ()
    %cst_80 = arith.constant dense<0.000000e+00> : vector<4x16x16xf32>
    %200 = tpu.matmul %197, %198, %cst_80 {dimension_numbers = #tpu.dot_dimension_numbers<[2], [2], [1], [1], [0, 0, 0, 1, 1, 1], [0], [0]>} : vector<4x16x8xbf16>, vector<4x16x8xbf16>, vector<4x16x16xf32> -> vector<4x16x16xf32>
    "tpu.trace_stop"() : () -> ()
    %cst_81 = arith.constant dense<0xFF800000> : vector<4x16xf32>
    %201 = vector.multi_reduction <maximumf>, %200, %cst_81 [2] : vector<4x16x16xf32> to vector<4x16xf32>
    %202 = vector.shape_cast %201 : vector<4x16xf32> to vector<4x16x1xf32>
    %203 = vector.broadcast %202 : vector<4x16x1xf32> to vector<4x16x16xf32>
    %204 = arith.subf %200, %203 : vector<4x16x16xf32>
    %205 = math.exp %204 : vector<4x16x16xf32>
    %cst_82 = arith.constant dense<0.000000e+00> : vector<4x16xf32>
    %206 = vector.multi_reduction <add>, %205, %cst_82 [2] : vector<4x16x16xf32> to vector<4x16xf32>
    %207 = vector.shape_cast %206 : vector<4x16xf32> to vector<4x16x1xf32>
    %208 = tpu.reciprocal %207 {approx = true} : vector<4x16x1xf32> -> vector<4x16x1xf32>
    %209 = arith.truncf %205 : vector<4x16x16xf32> to vector<4x16x16xbf16>
    "tpu.trace_start"() <{level = 10 : i32, message = "blm,bmd->bld"}> : () -> ()
    %cst_83 = arith.constant dense<0.000000e+00> : vector<4x16x8xf32>
    %210 = tpu.matmul %209, %199, %cst_83 {dimension_numbers = #tpu.dot_dimension_numbers<[2], [1], [1], [2], [0, 0, 0, 1, 1, 2], [0], [0]>} : vector<4x16x16xbf16>, vector<4x16x8xbf16>, vector<4x16x8xf32> -> vector<4x16x8xf32>
    "tpu.trace_stop"() : () -> ()
    %211 = vector.broadcast %208 : vector<4x16x1xf32> to vector<4x16x8xf32>
    %212 = arith.mulf %210, %211 : vector<4x16x8xf32>
    %213 = vector.extract_strided_slice %180 {offsets = [0, 0, 16], sizes = [4, 16, 8], strides = [1, 1, 1]} : vector<4x16x128xbf16> to vector<4x16x8xbf16>
    %214 = vector.extract_strided_slice %180 {offsets = [0, 0, 48], sizes = [4, 16, 8], strides = [1, 1, 1]} : vector<4x16x128xbf16> to vector<4x16x8xbf16>
    %215 = vector.extract_strided_slice %180 {offsets = [0, 0, 80], sizes = [4, 16, 8], strides = [1, 1, 1]} : vector<4x16x128xbf16> to vector<4x16x8xbf16>
    "tpu.trace_start"() <{level = 10 : i32, message = "bld,bmd->blm"}> : () -> ()
    %cst_84 = arith.constant dense<0.000000e+00> : vector<4x16x16xf32>
    %216 = tpu.matmul %213, %214, %cst_84 {dimension_numbers = #tpu.dot_dimension_numbers<[2], [2], [1], [1], [0, 0, 0, 1, 1, 1], [0], [0]>} : vector<4x16x8xbf16>, vector<4x16x8xbf16>, vector<4x16x16xf32> -> vector<4x16x16xf32>
    "tpu.trace_stop"() : () -> ()
    %cst_85 = arith.constant dense<0xFF800000> : vector<4x16xf32>
    %217 = vector.multi_reduction <maximumf>, %216, %cst_85 [2] : vector<4x16x16xf32> to vector<4x16xf32>
    %218 = vector.shape_cast %217 : vector<4x16xf32> to vector<4x16x1xf32>
    %219 = vector.broadcast %218 : vector<4x16x1xf32> to vector<4x16x16xf32>
    %220 = arith.subf %216, %219 : vector<4x16x16xf32>
    %221 = math.exp %220 : vector<4x16x16xf32>
    %cst_86 = arith.constant dense<0.000000e+00> : vector<4x16xf32>
    %222 = vector.multi_reduction <add>, %221, %cst_86 [2] : vector<4x16x16xf32> to vector<4x16xf32>
    %223 = vector.shape_cast %222 : vector<4x16xf32> to vector<4x16x1xf32>
    %224 = tpu.reciprocal %223 {approx = true} : vector<4x16x1xf32> -> vector<4x16x1xf32>
    %225 = arith.truncf %221 : vector<4x16x16xf32> to vector<4x16x16xbf16>
    "tpu.trace_start"() <{level = 10 : i32, message = "blm,bmd->bld"}> : () -> ()
    %cst_87 = arith.constant dense<0.000000e+00> : vector<4x16x8xf32>
    %226 = tpu.matmul %225, %215, %cst_87 {dimension_numbers = #tpu.dot_dimension_numbers<[2], [1], [1], [2], [0, 0, 0, 1, 1, 2], [0], [0]>} : vector<4x16x16xbf16>, vector<4x16x8xbf16>, vector<4x16x8xf32> -> vector<4x16x8xf32>
    "tpu.trace_stop"() : () -> ()
    %227 = vector.broadcast %224 : vector<4x16x1xf32> to vector<4x16x8xf32>
    %228 = arith.mulf %226, %227 : vector<4x16x8xf32>
    %229 = vector.extract_strided_slice %180 {offsets = [0, 0, 24], sizes = [4, 16, 8], strides = [1, 1, 1]} : vector<4x16x128xbf16> to vector<4x16x8xbf16>
    %230 = vector.extract_strided_slice %180 {offsets = [0, 0, 56], sizes = [4, 16, 8], strides = [1, 1, 1]} : vector<4x16x128xbf16> to vector<4x16x8xbf16>
    %231 = vector.extract_strided_slice %180 {offsets = [0, 0, 88], sizes = [4, 16, 8], strides = [1, 1, 1]} : vector<4x16x128xbf16> to vector<4x16x8xbf16>
    "tpu.trace_start"() <{level = 10 : i32, message = "bld,bmd->blm"}> : () -> ()
    %cst_88 = arith.constant dense<0.000000e+00> : vector<4x16x16xf32>
    %232 = tpu.matmul %229, %230, %cst_88 {dimension_numbers = #tpu.dot_dimension_numbers<[2], [2], [1], [1], [0, 0, 0, 1, 1, 1], [0], [0]>} : vector<4x16x8xbf16>, vector<4x16x8xbf16>, vector<4x16x16xf32> -> vector<4x16x16xf32>
    "tpu.trace_stop"() : () -> ()
    %cst_89 = arith.constant dense<0xFF800000> : vector<4x16xf32>
    %233 = vector.multi_reduction <maximumf>, %232, %cst_89 [2] : vector<4x16x16xf32> to vector<4x16xf32>
    %234 = vector.shape_cast %233 : vector<4x16xf32> to vector<4x16x1xf32>
    %235 = vector.broadcast %234 : vector<4x16x1xf32> to vector<4x16x16xf32>
    %236 = arith.subf %232, %235 : vector<4x16x16xf32>
    %237 = math.exp %236 : vector<4x16x16xf32>
    %cst_90 = arith.constant dense<0.000000e+00> : vector<4x16xf32>
    %238 = vector.multi_reduction <add>, %237, %cst_90 [2] : vector<4x16x16xf32> to vector<4x16xf32>
    %239 = vector.shape_cast %238 : vector<4x16xf32> to vector<4x16x1xf32>
    %240 = tpu.reciprocal %239 {approx = true} : vector<4x16x1xf32> -> vector<4x16x1xf32>
    %241 = arith.truncf %237 : vector<4x16x16xf32> to vector<4x16x16xbf16>
    "tpu.trace_start"() <{level = 10 : i32, message = "blm,bmd->bld"}> : () -> ()
    %cst_91 = arith.constant dense<0.000000e+00> : vector<4x16x8xf32>
    %242 = tpu.matmul %241, %231, %cst_91 {dimension_numbers = #tpu.dot_dimension_numbers<[2], [1], [1], [2], [0, 0, 0, 1, 1, 2], [0], [0]>} : vector<4x16x16xbf16>, vector<4x16x8xbf16>, vector<4x16x8xf32> -> vector<4x16x8xf32>
    "tpu.trace_stop"() : () -> ()
    %243 = vector.broadcast %240 : vector<4x16x1xf32> to vector<4x16x8xf32>
    %244 = arith.mulf %242, %243 : vector<4x16x8xf32>
    %245 = tpu.concatenate %196, %212, %228, %244 in 2 : vector<4x16x8xf32>, vector<4x16x8xf32>, vector<4x16x8xf32>, vector<4x16x8xf32> -> vector<4x16x32xf32>
    %246 = vector.shape_cast %245 : vector<4x16x32xf32> to vector<64x32xf32>
    %247 = arith.truncf %246 : vector<64x32xf32> to vector<64x32xbf16>
    %c1_92 = arith.constant 1 : index
    %c0_93 = arith.constant 0 : index
    %c0_94 = arith.constant 0 : index
    %248 = vector.load %arg7[%c1_92, %c0_93, %c0_94] : memref<2x32x32xbf16, #tpu.memory_space<vmem>>, vector<1x32x32xbf16>
    %249 = vector.shape_cast %248 : vector<1x32x32xbf16> to vector<32x32xbf16>
    %cst_95 = arith.constant dense<0.000000e+00> : vector<64x32xf32>
    %250 = tpu.matmul %247, %249, %cst_95 {dimension_numbers = #tpu.dot_dimension_numbers<[1], [0], [0], [1], [0, 0, 1, 1], [], []>} : vector<64x32xbf16>, vector<32x32xbf16>, vector<64x32xf32> -> vector<64x32xf32>
    %c1_96 = arith.constant 1 : index
    %c0_97 = arith.constant 0 : index
    %c0_98 = arith.constant 0 : index
    %251 = vector.load %arg8[%c1_96, %c0_97, %c0_98] : memref<2x1x32xf32, #tpu.memory_space<vmem>>, vector<1x1x32xf32>
    %252 = vector.shape_cast %251 : vector<1x1x32xf32> to vector<1x32xf32>
    %253 = vector.broadcast %252 : vector<1x32xf32> to vector<64x32xf32>
    %254 = arith.addf %250, %253 : vector<64x32xf32>
    %255 = arith.addf %168, %254 : vector<64x32xf32>
    %256 = vector.extract_strided_slice %170 {offsets = [0, 0], sizes = [1, 32], strides = [1, 1]} : vector<4x32xf32> to vector<1x32xf32>
    %257 = vector.extract_strided_slice %170 {offsets = [1, 0], sizes = [1, 32], strides = [1, 1]} : vector<4x32xf32> to vector<1x32xf32>
    %cst_99 = arith.constant dense<0.000000e+00> : vector<64xf32>
    %258 = vector.multi_reduction <add>, %255, %cst_99 [1] : vector<64x32xf32> to vector<64xf32>
    %259 = vector.shape_cast %258 : vector<64xf32> to vector<64x1xf32>
    %cst_100 = arith.constant 3.200000e+01 : f32
    %260 = vector.broadcast %cst_100 : f32 to vector<64x1xf32>
    %261 = arith.divf %259, %260 : vector<64x1xf32>
    %262 = arith.mulf %255, %255 : vector<64x32xf32>
    %cst_101 = arith.constant dense<0.000000e+00> : vector<64xf32>
    %263 = vector.multi_reduction <add>, %262, %cst_101 [1] : vector<64x32xf32> to vector<64xf32>
    %264 = vector.shape_cast %263 : vector<64xf32> to vector<64x1xf32>
    %cst_102 = arith.constant 3.200000e+01 : f32
    %265 = vector.broadcast %cst_102 : f32 to vector<64x1xf32>
    %266 = arith.divf %264, %265 : vector<64x1xf32>
    %267 = arith.mulf %261, %261 : vector<64x1xf32>
    %268 = arith.subf %266, %267 : vector<64x1xf32>
    %269 = vector.broadcast %261 : vector<64x1xf32> to vector<64x32xf32>
    %270 = arith.subf %255, %269 : vector<64x32xf32>
    %cst_103 = arith.constant 9.99999974E-6 : f32
    %271 = vector.broadcast %cst_103 : f32 to vector<64x1xf32>
    %272 = arith.addf %268, %271 : vector<64x1xf32>
    %273 = math.rsqrt %272 : vector<64x1xf32>
    %274 = vector.broadcast %273 : vector<64x1xf32> to vector<64x32xf32>
    %275 = arith.mulf %270, %274 : vector<64x32xf32>
    %276 = vector.broadcast %256 : vector<1x32xf32> to vector<64x32xf32>
    %277 = arith.mulf %275, %276 : vector<64x32xf32>
    %278 = vector.broadcast %257 : vector<1x32xf32> to vector<64x32xf32>
    %279 = arith.addf %277, %278 : vector<64x32xf32>
    %280 = arith.truncf %279 : vector<64x32xf32> to vector<64x32xbf16>
    %c1_104 = arith.constant 1 : index
    %c0_105 = arith.constant 0 : index
    %c0_106 = arith.constant 0 : index
    %281 = vector.load %arg9[%c1_104, %c0_105, %c0_106] : memref<2x32x64xbf16, #tpu.memory_space<vmem>>, vector<1x32x64xbf16>
    %282 = vector.shape_cast %281 : vector<1x32x64xbf16> to vector<32x64xbf16>
    %cst_107 = arith.constant dense<0.000000e+00> : vector<64x64xf32>
    %283 = tpu.matmul %280, %282, %cst_107 {dimension_numbers = #tpu.dot_dimension_numbers<[1], [0], [0], [1], [0, 0, 1, 1], [], []>} : vector<64x32xbf16>, vector<32x64xbf16>, vector<64x64xf32> -> vector<64x64xf32>
    %c1_108 = arith.constant 1 : index
    %c0_109 = arith.constant 0 : index
    %c0_110 = arith.constant 0 : index
    %284 = vector.load %arg10[%c1_108, %c0_109, %c0_110] : memref<2x1x64xf32, #tpu.memory_space<vmem>>, vector<1x1x64xf32>
    %285 = vector.shape_cast %284 : vector<1x1x64xf32> to vector<1x64xf32>
    %286 = vector.broadcast %285 : vector<1x64xf32> to vector<64x64xf32>
    %287 = arith.addf %283, %286 : vector<64x64xf32>
    %cst_111 = arith.constant 0.000000e+00 : f32
    %288 = vector.broadcast %cst_111 : f32 to vector<64x64xf32>
    %289 = arith.maximumf %287, %288 : vector<64x64xf32>
    %290 = arith.truncf %289 : vector<64x64xf32> to vector<64x64xbf16>
    %c1_112 = arith.constant 1 : index
    %c0_113 = arith.constant 0 : index
    %c0_114 = arith.constant 0 : index
    %291 = vector.load %arg11[%c1_112, %c0_113, %c0_114] : memref<2x64x32xbf16, #tpu.memory_space<vmem>>, vector<1x64x32xbf16>
    %292 = vector.shape_cast %291 : vector<1x64x32xbf16> to vector<64x32xbf16>
    %cst_115 = arith.constant dense<0.000000e+00> : vector<64x32xf32>
    %293 = tpu.matmul %290, %292, %cst_115 {dimension_numbers = #tpu.dot_dimension_numbers<[1], [0], [0], [1], [0, 0, 1, 1], [], []>} : vector<64x64xbf16>, vector<64x32xbf16>, vector<64x32xf32> -> vector<64x32xf32>
    %c1_116 = arith.constant 1 : index
    %c0_117 = arith.constant 0 : index
    %c0_118 = arith.constant 0 : index
    %294 = vector.load %arg12[%c1_116, %c0_117, %c0_118] : memref<2x1x32xf32, #tpu.memory_space<vmem>>, vector<1x1x32xf32>
    %295 = vector.shape_cast %294 : vector<1x1x32xf32> to vector<1x32xf32>
    %296 = vector.broadcast %295 : vector<1x32xf32> to vector<64x32xf32>
    %297 = arith.addf %293, %296 : vector<64x32xf32>
    %298 = arith.addf %279, %297 : vector<64x32xf32>
    %299 = vector.extract_strided_slice %170 {offsets = [2, 0], sizes = [1, 32], strides = [1, 1]} : vector<4x32xf32> to vector<1x32xf32>
    %300 = vector.extract_strided_slice %170 {offsets = [3, 0], sizes = [1, 32], strides = [1, 1]} : vector<4x32xf32> to vector<1x32xf32>
    %cst_119 = arith.constant dense<0.000000e+00> : vector<64xf32>
    %301 = vector.multi_reduction <add>, %298, %cst_119 [1] : vector<64x32xf32> to vector<64xf32>
    %302 = vector.shape_cast %301 : vector<64xf32> to vector<64x1xf32>
    %cst_120 = arith.constant 3.200000e+01 : f32
    %303 = vector.broadcast %cst_120 : f32 to vector<64x1xf32>
    %304 = arith.divf %302, %303 : vector<64x1xf32>
    %305 = arith.mulf %298, %298 : vector<64x32xf32>
    %cst_121 = arith.constant dense<0.000000e+00> : vector<64xf32>
    %306 = vector.multi_reduction <add>, %305, %cst_121 [1] : vector<64x32xf32> to vector<64xf32>
    %307 = vector.shape_cast %306 : vector<64xf32> to vector<64x1xf32>
    %cst_122 = arith.constant 3.200000e+01 : f32
    %308 = vector.broadcast %cst_122 : f32 to vector<64x1xf32>
    %309 = arith.divf %307, %308 : vector<64x1xf32>
    %310 = arith.mulf %304, %304 : vector<64x1xf32>
    %311 = arith.subf %309, %310 : vector<64x1xf32>
    %312 = vector.broadcast %304 : vector<64x1xf32> to vector<64x32xf32>
    %313 = arith.subf %298, %312 : vector<64x32xf32>
    %cst_123 = arith.constant 9.99999974E-6 : f32
    %314 = vector.broadcast %cst_123 : f32 to vector<64x1xf32>
    %315 = arith.addf %311, %314 : vector<64x1xf32>
    %316 = math.rsqrt %315 : vector<64x1xf32>
    %317 = vector.broadcast %316 : vector<64x1xf32> to vector<64x32xf32>
    %318 = arith.mulf %313, %317 : vector<64x32xf32>
    %319 = vector.broadcast %299 : vector<1x32xf32> to vector<64x32xf32>
    %320 = arith.mulf %318, %319 : vector<64x32xf32>
    %321 = vector.broadcast %300 : vector<1x32xf32> to vector<64x32xf32>
    %322 = arith.addf %320, %321 : vector<64x32xf32>
    %323 = vector.shape_cast %322 : vector<64x32xf32> to vector<4x16x32xf32>
    %cst_124 = arith.constant dense<0.000000e+00> : vector<4x32xf32>
    %324 = vector.multi_reduction <add>, %323, %cst_124 [1] : vector<4x16x32xf32> to vector<4x32xf32>
    %cst_125 = arith.constant 1.600000e+01 : f32
    %325 = vector.broadcast %cst_125 : f32 to vector<4x32xf32>
    %326 = arith.divf %324, %325 : vector<4x32xf32>
    %327 = arith.truncf %326 : vector<4x32xf32> to vector<4x32xbf16>
    %c0_126 = arith.constant 0 : index
    %c0_127 = arith.constant 0 : index
    %328 = vector.load %arg14[%c0_126, %c0_127] : memref<32x2xbf16, #tpu.memory_space<vmem>>, vector<32x2xbf16>
    %cst_128 = arith.constant dense<0.000000e+00> : vector<4x2xf32>
    %329 = tpu.matmul %327, %328, %cst_128 {dimension_numbers = #tpu.dot_dimension_numbers<[1], [0], [0], [1], [0, 0, 1, 1], [], []>} : vector<4x32xbf16>, vector<32x2xbf16>, vector<4x2xf32> -> vector<4x2xf32>
    %c0_129 = arith.constant 0 : index
    %c0_130 = arith.constant 0 : index
    %330 = vector.load %arg15[%c0_129, %c0_130] : memref<1x2xf32, #tpu.memory_space<vmem>>, vector<1x2xf32>
    %331 = vector.broadcast %330 : vector<1x2xf32> to vector<4x2xf32>
    %332 = arith.addf %329, %331 : vector<4x2xf32>
    %c0_131 = arith.constant 0 : index
    %c0_132 = arith.constant 0 : index
    %c0_133 = arith.constant 0 : index
    %333 = vector.load %arg16[%c0_131, %c0_132, %c0_133] : memref<1x4x2xf32, #tpu.memory_space<vmem>>, vector<1x4x2xf32>
    %334 = vector.shape_cast %333 : vector<1x4x2xf32> to vector<4x2xf32>
    %335 = vector.shape_cast %332 : vector<4x2xf32> to vector<1x4x2xf32>
    tpu.vector_store %arg16[%c0_131, %c0_132, %c0_133], %335 {strides = array<i32>} : memref<1x4x2xf32, #tpu.memory_space<vmem>>, vector<1x4x2xf32>,
    return
  }
  func.func @transform_0(%arg0: i32) -> (i32, i32, i32) {
    %c0_i32 = arith.constant 0 : i32
    %c0_i32_0 = arith.constant 0 : i32
    %c0_i32_1 = arith.constant 0 : i32
    return %arg0, %c0_i32, %c0_i32_0 : i32, i32, i32
  }
  func.func @transform_1(%arg0: i32) -> (i32, i32) {
    %c0_i32 = arith.constant 0 : i32
    %c0_i32_0 = arith.constant 0 : i32
    %c0_i32_1 = arith.constant 0 : i32
    return %c0_i32, %c0_i32_0 : i32, i32
  }
  func.func @transform_2(%arg0: i32) -> (i32, i32) {
    %c0_i32 = arith.constant 0 : i32
    %c0_i32_0 = arith.constant 0 : i32
    %c0_i32_1 = arith.constant 0 : i32
    return %c0_i32, %c0_i32_0 : i32, i32
  }
  func.func @transform_3(%arg0: i32) -> (i32, i32) {
    %c0_i32 = arith.constant 0 : i32
    %c0_i32_0 = arith.constant 0 : i32
    %c0_i32_1 = arith.constant 0 : i32
    return %c0_i32, %c0_i32_0 : i32, i32
  }
  func.func @transform_4(%arg0: i32) -> (i32, i32, i32) {
    %c0_i32 = arith.constant 0 : i32
    %c0_i32_0 = arith.constant 0 : i32
    %c0_i32_1 = arith.constant 0 : i32
    %c0_i32_2 = arith.constant 0 : i32
    return %c0_i32, %c0_i32_0, %c0_i32_1 : i32, i32, i32
  }
  func.func @transform_5(%arg0: i32) -> (i32, i32, i32) {
    %c0_i32 = arith.constant 0 : i32
    %c0_i32_0 = arith.constant 0 : i32
    %c0_i32_1 = arith.constant 0 : i32
    %c0_i32_2 = arith.constant 0 : i32
    return %c0_i32, %c0_i32_0, %c0_i32_1 : i32, i32, i32
  }
  func.func @transform_6(%arg0: i32) -> (i32, i32, i32) {
    %c0_i32 = arith.constant 0 : i32
    %c0_i32_0 = arith.constant 0 : i32
    %c0_i32_1 = arith.constant 0 : i32
    %c0_i32_2 = arith.constant 0 : i32
    return %c0_i32, %c0_i32_0, %c0_i32_1 : i32, i32, i32
  }
  func.func @transform_7(%arg0: i32) -> (i32, i32, i32) {
    %c0_i32 = arith.constant 0 : i32
    %c0_i32_0 = arith.constant 0 : i32
    %c0_i32_1 = arith.constant 0 : i32
    %c0_i32_2 = arith.constant 0 : i32
    return %c0_i32, %c0_i32_0, %c0_i32_1 : i32, i32, i32
  }
  func.func @transform_8(%arg0: i32) -> (i32, i32, i32) {
    %c0_i32 = arith.constant 0 : i32
    %c0_i32_0 = arith.constant 0 : i32
    %c0_i32_1 = arith.constant 0 : i32
    %c0_i32_2 = arith.constant 0 : i32
    return %c0_i32, %c0_i32_0, %c0_i32_1 : i32, i32, i32
  }
  func.func @transform_9(%arg0: i32) -> (i32, i32, i32) {
    %c0_i32 = arith.constant 0 : i32
    %c0_i32_0 = arith.constant 0 : i32
    %c0_i32_1 = arith.constant 0 : i32
    %c0_i32_2 = arith.constant 0 : i32
    return %c0_i32, %c0_i32_0, %c0_i32_1 : i32, i32, i32
  }
  func.func @transform_10(%arg0: i32) -> (i32, i32, i32) {
    %c0_i32 = arith.constant 0 : i32
    %c0_i32_0 = arith.constant 0 : i32
    %c0_i32_1 = arith.constant 0 : i32
    %c0_i32_2 = arith.constant 0 : i32
    return %c0_i32, %c0_i32_0, %c0_i32_1 : i32, i32, i32
  }
  func.func @transform_11(%arg0: i32) -> (i32, i32, i32) {
    %c0_i32 = arith.constant 0 : i32
    %c0_i32_0 = arith.constant 0 : i32
    %c0_i32_1 = arith.constant 0 : i32
    %c0_i32_2 = arith.constant 0 : i32
    return %c0_i32, %c0_i32_0, %c0_i32_1 : i32, i32, i32
  }
  func.func @transform_12(%arg0: i32) -> (i32, i32, i32) {
    %c0_i32 = arith.constant 0 : i32
    %c0_i32_0 = arith.constant 0 : i32
    %c0_i32_1 = arith.constant 0 : i32
    %c0_i32_2 = arith.constant 0 : i32
    return %c0_i32, %c0_i32_0, %c0_i32_1 : i32, i32, i32
  }
  func.func @transform_13(%arg0: i32) -> (i32, i32) {
    %c0_i32 = arith.constant 0 : i32
    %c0_i32_0 = arith.constant 0 : i32
    %c0_i32_1 = arith.constant 0 : i32
    return %c0_i32, %c0_i32_0 : i32, i32
  }
  func.func @transform_14(%arg0: i32) -> (i32, i32) {
    %c0_i32 = arith.constant 0 : i32
    %c0_i32_0 = arith.constant 0 : i32
    %c0_i32_1 = arith.constant 0 : i32
    return %c0_i32, %c0_i32_0 : i32, i32
  }
  func.func @transform_15(%arg0: i32) -> (i32, i32, i32) {
    %c0_i32 = arith.constant 0 : i32
    %c0_i32_0 = arith.constant 0 : i32
    %c0_i32_1 = arith.constant 0 : i32
    return %arg0, %c0_i32, %c0_i32_0 : i32, i32, i32
  }
}

</mosaic_0001>

<bundles_post_ra>
// kernel: tpu_custom_call.1
= control target key start
LH: loop header
LB: loop body
LE: loop exit
PB: predicated region body
PF: predicated region fallthrough
CT: control target
= control target key end

     0   :  { %s8070_s18 = smov 0   ;;  %s9866_s0 = inlined_call_operand.vmem [shape: f32[8,16,4], index: 0, kind: input, shape index: {}]   ;;  %s9867_s1 = inlined_call_operand.vmem [shape: bf16[4,32], index: 1, kind: input, shape index: {}]   ;;  %s9868_s2 = inlined_call_operand.vmem [shape: f32[1,32], index: 2, kind: input, shape index: {}]   ;;  %s9869_s3 = inlined_call_operand.vmem [shape: bf16[16,16], index: 3, kind: input, shape index: {}]   ;;  %s9870_s4 = inlined_call_operand.vmem [shape: bf16[2,32,128], index: 4, kind: input, shape index: {}]   ;;  %s9871_s5 = inlined_call_operand.vmem [shape: f32[2,1,128], index: 5, kind: input, shape index: {}]   ;;  %s9872_s6 = inlined_call_operand.vmem [shape: bf16[2,32,32], index: 6, kind: input, shape index: {}]   ;;  %s9873_s7 = inlined_call_operand.vmem [shape: f32[2,1,32], index: 7, kind: input, shape index: {}]   ;;  %s9874_s8 = inlined_call_operand.vmem [shape: bf16[2,32,64], index: 8, kind: input, shape index: {}]   ;;  %s9875_s9 = inlined_call_operand.vmem [shape: f32[2,1,64], index: 9, kind: input, shape index: {}]   ;;  %s9876_s10 = inlined_call_operand.vmem [shape: bf16[2,64,32], index: 10, kind: input, shape index: {}]   ;;  %s9877_s11 = inlined_call_operand.vmem [shape: f32[2,1,32], index: 11, kind: input, shape index: {}]   ;;  %s9878_s12 = inlined_call_operand.vmem [shape: f32[2,4,32], index: 12, kind: input, shape index: {}]   ;;  %s9879_s13 = inlined_call_operand.vmem [shape: bf16[32,2], index: 13, kind: input, shape index: {}]   ;;  %s9880_s14 = inlined_call_operand.vmem [shape: f32[1,2], index: 14, kind: input, shape index: {}]   ;;  %s9881_s15 = inlined_call_operand.vmem [shape: f32[2,4,2], index: 15, kind: output, shape index: {}]  }
   0x1 LB: > { %s8076_s19 = sadd.s32 4294967295, %s7972_s18   ;;  %p6581_p0 = scmp.ge.s32.totalorder %s7972_s18, 1  ;;  %s7972_s18 = sphi %s8070_s18, %s25_s18  }
   0x2   : > { %p439_p1 = scmp.lt.s32.totalorder %s7972_s18, 3 }
   0x4   : > { %p440_p2 = pnand %p6581_p0, %p439_p1 }
   0x6   : > { %443 = sbr.rel (%p440_p2) target bundleno = 7263 (0x1c5f), region = 80 }
   0xd   : > { %v511_v0 = vld [vmem:[%s9867_s1] sm:$0x3]  ;;  %vm532_vm0 = vcmask 1041408   ;;  %s6582_s22 = sshll.u32 %s8076_s19, 2  ;;  %vm519_vm1 = vcmask 31744   ;;  %v9882_v14 = vmov 0.0  }
   0xe   : > { %7478 = vmatprep.subr.msk.bf16.mxu0 %vm532_vm0, %v511_v0  ;;  %v534_v1 = vsel %vm532_vm0, %v511_v0, 0  ;;  %p488_p3 = scmp.lt.s32.totalorder %s6582_s22, 7  ;;  %6958 = vmatprep.subr.bf16.mxu1 %v9882_v14  ;;  %vm7975_vm2 = vmmov 0   ;;  %v6586_v16 = vld [vmem:[%s9868_s2] ss:$0 sm:$0xff]  ;;  %vm612_vm3 = vcmask 130048  }
   0xf   : > { %6949 = vmatpush3.bf16.msra.mxu0 %v534_v1  ;;  %6960 = vmatprep.mubr.msk.bf16.mxu1 %vm7975_vm2, %v9882_v14  ;;  %v7623_v26 = vld [vmem:[%s9869_s3] sm:$0xff]   ;;  %v7625_v38 = vld [vmem:[%s9870_s4 + $0x8] sm:$0xff]   ;;  %vm808_vm4 = vcmask 261120   ;;  %s7976_s24 = smov 96   ;;  %s7977_s25 = smov 64   ;;  %vm893_vm5 = vcmask 64512  }
  0x10   : > { %s9985_s22 = smov (!%p488_p3, %s6582_s22), 7  ;;  %6970 = vmatprep.subr.bf16.mxu0 %v9882_v14  ;;  %v7624_v37 = vld [vmem:[%s9870_s4] sm:$0xff]   ;;  %s7979_s27 = smov 120   ;;  %vm2935_vm6 = vcmask 195584   ;;  %vm3356_vm7 = vcmask 523264   ;;  %vm6460_vm8 = vcmask 1041409  }
  0x11   : > { %s6751_s23 = sshll.u32 %s9985_s22, 4  ;;  %v6596_v60 = vld [vmem:[%s9871_s5] ss:$0 sm:$0xff]  ;;  %s7980_s28 = smov 56   ;;  %vm6462_vm9 = vcmask 1042434   ;;  %vm6464_vm10 = vcmask 1043459  }
  0x12   : > { %s492_s26 = scalar_lea.vmem %s9866_s0, %s6751_s23  ;;  %s9908_s29 = smov 80   ;;  %vm6522_vm11 = vcmask 11264  }
  0x13   : > { %v499_v2 = vld [vmem:[%s492_s26] sm:$0xff]  ;;  %v500_v3 = vld [vmem:[%s492_s26 + $0x8] sm:$0xff]  ;;  %v501_v4 = vld [vmem:[%s492_s26 + $0x10] sm:$0xff]  ;;  %s9906_s30 = smov 112   ;;  %s9904_s16 = smov 48  }
  0x14   : > { %v507_v5 = vpack.c.bf16 %v500_v3, %v499_v2  ;;  %v502_v6 = vld [vmem:[%s492_s26 + $0x18] sm:$0xff]  ;;  %v503_v7 = vld [vmem:[%s492_s26 + $0x20] sm:$0xff]  ;;  %v504_v8 = vld [vmem:[%s492_s26 + $0x28] sm:$0xff]  ;;  %s9898_s17 = smov 72   ;;  %s9894_s20 = smov 104  }
  0x15   : > { %v508_v9 = vpack.c.bf16 %v502_v6, %v501_v4  ;;  %v509_v10 = vpack.c.bf16 %v504_v8, %v503_v7  ;;  %v505_v11 = vld [vmem:[%s492_s26 + $0x30] sm:$0xff]  ;;  %v506_v12 = vld [vmem:[%s492_s26 + $0x38] sm:$0xff]  ;;  %s7978_s26 = smov 88   ;;  %s9892_s21 = smov 40  }
  0x16   : > { %6950 = vmatprep.mubr.msk.bf16.mxu0 %vm519_vm1, %v507_v5  ;;  %v510_v13 = vpack.c.bf16 %v506_v12, %v505_v11  ;;  %s9896_s22 = smov 8   ;;  %s9902_s23 = smov 16  }
  0x17   : > { %6951 = vmatmul.mubr.msk.bf16.vlgmr.msra.gmra.mrb[0].mxu0 %vm519_vm1, %v508_v9  ;;  %p494_p4 = scmp.lt.s32.totalorder %s8076_s19, 1 }
  0x18   : > { %6954 = vmatprep.mubr.msk.bf16.mxu0 %vm519_vm1, %v509_v10 }
  0x19   : > { %s9987_s19 = smov (!%p494_p4, %s8076_s19), 1 }
  0x1f   : > { %6955 = vmatmul.mubr.msk.bf16.gmra.mrb[4].mxu0 %vm519_vm1, %v510_v13 }
  0x20   : > { %6972 = vmatprep.mubr.msk.bf16.mxu0 %vm7975_vm2, %v9882_v14 }
  0xea   : > { %v6952_v15 = vpop.f32.mrb[0].mxu0 }
  0xeb   : > { %v570_v17 = vpop.f32.mrb[1].mxu0  ;;  %v579_v19 = vadd.f32 %v6952_v15, %v6586_v16 }
  0xec   : > { %v6953_v18 = vpop.f32.mrb[2].mxu0  ;;  %v571_v22 = vadd.f32 %v6586_v16, %v570_v17 }
  0xed   : > { %v582_v20 = vadd.f32 %v6953_v18, %v6586_v16  ;;  %v573_v21 = vpop.f32.mrb[3].mxu0 }
  0xee   : > { %v574_v23 = vadd.f32 %v6586_v16, %v573_v21 }
  0xef   : > { %v602_v24 = vpack.c.bf16 %v582_v20, %v579_v19 }
  0xf0   : > { %v601_v25 = vpack.c.bf16 %v574_v23, %v571_v22 }
  0xf2   : > { %v6956_v27 = vpop.f32.mrb[4].mxu0  ;;  %6959 = vmatpush3.bf16.msra.mxu1 %v601_v25 }
  0xf3   : > { %v595_v28 = vadd.f32 %v6956_v27, %v6586_v16  ;;  %v586_v29 = vpop.f32.mrb[5].mxu0  ;;  %6964 = vmatprep.subr.bf16.mxu1 %v9882_v14 }
  0xf4   : > { %v587_v30 = vadd.f32 %v6586_v16, %v586_v29  ;;  %v6957_v31 = vpop.f32.mrb[6].mxu0 }
  0xf5   : > { %v598_v32 = vadd.f32 %v6957_v31, %v6586_v16  ;;  %v589_v33 = vpop.f32.mrb[7].mxu0  ;;  %6961 = vmatmul.mubr.msk.bf16.vlgmr.msra.gmra.mrb[0].mxu1 %vm612_vm3, %v7623_v26 }
  0xf6   : > { %v590_v34 = vadd.f32 %v6586_v16, %v589_v33  ;;  %6965 = vmatpush3.bf16.msra.mxu1 %v602_v24  ;;  %6966 = vmatprep.mubr.msk.bf16.mxu1 %vm7975_vm2, %v9882_v14 }
  0xf7   : > { %v604_v35 = vpack.c.bf16 %v598_v32, %v595_v28  ;;  %6976 = vmatprep.subr.bf16.mxu1 %v9882_v14 }
  0xf8   : > { %v603_v36 = vpack.c.bf16 %v590_v34, %v587_v30 }
  0xfa   : > { %6971 = vmatpush3.bf16.msra.mxu0 %v603_v36 }
  0xfb   : > { %6982 = vmatprep.subr.bf16.mxu0 %v7624_v37 }
  0xfd   : > { %6967 = vmatmul.mubr.msk.bf16.vlgmr.msra.gmra.mrb[4].mxu1 %vm612_vm3, %v7623_v26  ;;  %6973 = vmatmul.mubr.msk.bf16.vlgmr.msra.gmra.mrb[8].mxu0 %vm612_vm3, %v7623_v26 }
  0xfe   : > { %6977 = vmatpush3.bf16.msra.mxu1 %v604_v35  ;;  %6978 = vmatprep.mubr.msk.bf16.mxu1 %vm7975_vm2, %v9882_v14 }
  0xff   : > { %6994 = vmatprep.subr.bf16.mxu1 %v9882_v14  ;;  %6983 = vmatpush3.bf16.msra.mxu0 %v7624_v37 }
 0x100   : > { %6984 = vmatprep.subr.bf16.mxu0 %v7625_v38 }
 0x103   : > { %6985 = vmatpush3.bf16.msra.mxu0 %v7625_v38 }
 0x104   : > { %7006 = vmatprep.subr.bf16.mxu0 %v9882_v14 }
 0x105   : > { %6979 = vmatmul.mubr.msk.bf16.vlgmr.msra.gmra.mrb[8].mxu1 %vm612_vm3, %v7623_v26 }
 0x106   : > { %6996 = vmatprep.mubr.msk.bf16.mxu1 %vm7975_vm2, %v9882_v14 }
 0x1c8   : > { %v8119_v39 = vpop.f32.mrb[0].mxu1 }
 0x1c9   : > { %9924 = vst [vmem:[#allocation2_spill] sm:$0xff] %v8119_v39  ;;  %v6962_v40 = vpop.f32.mrb[1].mxu1 }
 0x1ca   : > { %v8121_v41 = vpop.f32.mrb[2].mxu1 }
 0x1cb   : > { %9925 = vst [vmem:[#allocation3_spill] sm:$0xff] %v8121_v41  ;;  %v781_v42 = vpack.c.bf16 %v8121_v41, %v8119_v39  ;;  %v6963_v43 = vpop.f32.mrb[3].mxu1 }
 0x1cd   : > { %6986 = vmatprep.mubr.msk.bf16.mxu0 %vm808_vm4, %v781_v42 }
 0x1d0   : > { %v8126_v44 = vpop.f32.mrb[4].mxu1  ;;  %v8128_v45 = vpop.f32.mrb[8].mxu0 }
 0x1d1   : > { %9926 = vst [vmem:[#allocation4_spill] sm:$0xff] %v8126_v44  ;;  %9927 = vst [vmem:[#allocation5_spill] sm:$0xff] %v8128_v45  ;;  %v6968_v46 = vpop.f32.mrb[5].mxu1  ;;  %v6974_v47 = vpop.f32.mrb[9].mxu0 }
 0x1d2   : > { %v8130_v48 = vpop.f32.mrb[6].mxu1  ;;  %v8132_v49 = vpop.f32.mrb[10].mxu0 }
 0x1d3   : > { %9928 = vst [vmem:[#allocation6_spill] sm:$0xff] %v8130_v48  ;;  %9929 = vst [vmem:[#allocation7_spill] sm:$0xff] %v8132_v49  ;;  %v782_v50 = vpack.c.bf16 %v8130_v48, %v8126_v44  ;;  %v6969_v51 = vpop.f32.mrb[7].mxu1  ;;  %v783_v52 = vpack.c.bf16 %v8132_v49, %v8128_v45  ;;  %v6975_v53 = vpop.f32.mrb[11].mxu0 }
 0x1d5   : > { %6987 = vmatmul.mubr.msk.bf16.vlgmr.msra.gmra.mrb[12].mxu0 %vm808_vm4, %v782_v50 }
 0x1d6   : > { %6990 = vmatprep.mubr.msk.bf16.mxu0 %vm808_vm4, %v783_v52 }
 0x1d8   : > { %v8140_v54 = vpop.f32.mrb[8].mxu1 }
 0x1d9   : > { %9930 = vst [vmem:[#allocation8_spill] sm:$0xff] %v8140_v54  ;;  %v6980_v55 = vpop.f32.mrb[9].mxu1 }
 0x1da   : > { %v8142_v56 = vpop.f32.mrb[10].mxu1 }
 0x1db   : > { %9931 = vst [vmem:[#allocation9_spill] sm:$0xff] %v8142_v56  ;;  %v784_v57 = vpack.c.bf16 %v8142_v56, %v8140_v54  ;;  %v6981_v58 = vpop.f32.mrb[11].mxu1 }
 0x1dd   : > { %6991 = vmatmul.mubr.msk.bf16.gmra.mrb[16].mxu0 %vm808_vm4, %v784_v57 }
 0x1de   : > { %7008 = vmatprep.mubr.msk.bf16.mxu0 %vm7975_vm2, %v9882_v14 }
 0x2a8   : > { %v6988_v59 = vpop.f32.mrb[12].mxu0 }
 0x2a9   : > { %v855_v61 = vpop.f32.mrb[13].mxu0  ;;  %v864_v63 = vadd.f32 %v6988_v59, %v6596_v60 }
 0x2aa   : > { %v6989_v62 = vpop.f32.mrb[14].mxu0  ;;  %v856_v2 = vadd.f32 %v6596_v60, %v855_v61 }
 0x2ab   : > { %v867_v0 = vadd.f32 %v6989_v62, %v6596_v60  ;;  %v858_v1 = vpop.f32.mrb[15].mxu0 }
 0x2ac   : > { %v859_v3 = vadd.f32 %v6596_v60, %v858_v1 }
 0x2ad   : > { %v8152_v4 = vpack.c.bf16 %v867_v0, %v864_v63 }
 0x2ae   : > { %v8154_v5 = vpack.c.bf16 %v859_v3, %v856_v2 }
 0x2b0   : > { %891 = vrot.lane.b32.xlu0 %v8154_v5, %s7976_s24  ;;  %v6992_v6 = vpop.f32.mrb[16].mxu0 }
 0x2b1   : > { %v880_v7 = vadd.f32 %v6992_v6, %v6596_v60  ;;  %v871_v8 = vpop.f32.mrb[17].mxu0 }
 0x2b2   : > { %v872_v9 = vadd.f32 %v6596_v60, %v871_v8  ;;  %v6993_v10 = vpop.f32.mrb[18].mxu0 }
 0x2b3   : > { %v883_v11 = vadd.f32 %v6993_v10, %v6596_v60  ;;  %v874_v12 = vpop.f32.mrb[19].mxu0 }
 0x2b4   : > { %v875_v13 = vadd.f32 %v6596_v60, %v874_v12  ;;  %942 = vrot.lane.b32.xlu0 %v8152_v4, %s7976_s24 }
 0x2b5   : > { %v8160_v15 = vpack.c.bf16 %v883_v11, %v880_v7 }
 0x2b6   : > { %v8162_v16 = vpack.c.bf16 %v875_v13, %v872_v9 }
 0x2b8   : > { %1222 = vrot.lane.b32.xlu0 %v8152_v4, %s7977_s25  ;;  %992 = vrot.lane.b32.xlu1 %v8162_v16, %s7976_s24 }
 0x2bc   : > { %1042 = vrot.lane.b32.xlu1 %v8160_v15, %s7976_s24 }
 0x2c0   : > { %1175 = vrot.lane.b32.xlu1 %v8154_v5, %s7977_s25 }
 0x2c4   : > { %1316 = vrot.lane.b32.xlu1 %v8160_v15, %s7977_s25 }
 0x2c8   : > { %1269 = vrot.lane.b32.xlu1 %v8162_v16, %s7977_s25 }
 0x322   : > { %v892_v17 = vpop.permute.xlu0 %891 }
 0x323   : > { %v898_v18 = vsel %vm893_vm5, %v892_v17, 0 }
 0x324   : > { %6995 = vmatpush3.bf16.xpose.msra.mxu1 %v898_v18 }
 0x325   : > { %7000 = vmatprep.subr.bf16.mxu1 %v9882_v14 }
 0x326   : > { %v943_v19 = vpop.permute.xlu0 %942 }
 0x327   : > { %v948_v21 = vsel %vm893_vm5, %v943_v19, 0 }
 0x32a   : > { %v993_v20 = vpop.permute.xlu1 %992  ;;  %v1223_v26 = vpop.permute.xlu0 %1222 }
 0x32b   : > { %v998_v22 = vsel %vm893_vm5, %v993_v20, 0  ;;  %6997 = vmatmul.mubr.msk.bf16.vlgmr.msra.gmra.mrb[12].mxu1 %vm893_vm5, %v8154_v5 }
 0x32c   : > { %7001 = vmatpush3.bf16.xpose.msra.mxu1 %v948_v21  ;;  %7007 = vmatpush3.bf16.xpose.msra.mxu0 %v998_v22 }
 0x32d   : > { %7002 = vmatprep.mubr.msk.bf16.mxu1 %vm7975_vm2, %v9882_v14  ;;  %7012 = vmatprep.subr.bf16.mxu1 %v9882_v14 }
 0x32e   : > { %v1043_v23 = vpop.permute.xlu1 %1042  ;;  %7018 = vmatprep.subr.bf16.mxu0 %v9882_v14 }
 0x32f   : > { %v1048_v25 = vsel %vm893_vm5, %v1043_v23, 0 }
 0x332   : > { %v1176_v24 = vpop.permute.xlu1 %1175 }
 0x333   : > { %7003 = vmatmul.mubr.msk.bf16.vlgmr.msra.gmra.mrb[16].mxu1 %vm893_vm5, %v8152_v4  ;;  %7009 = vmatmul.mubr.msk.bf16.vlgmr.msra.gmra.mrb[20].mxu0 %vm893_vm5, %v8162_v16 }
 0x334   : > { %7013 = vmatpush3.bf16.xpose.msra.mxu1 %v1048_v25  ;;  %7019 = vmatpush3.bf16.msra.mxu0 %v1176_v24 }
 0x335   : > { %7014 = vmatprep.mubr.msk.bf16.mxu1 %vm7975_vm2, %v9882_v14  ;;  %7024 = vmatprep.subr.bf16.mxu1 %v9882_v14 }
 0x336   : > { %7020 = vmatprep.mubr.msk.bf16.mxu0 %vm7975_vm2, %v9882_v14  ;;  %7030 = vmatprep.subr.bf16.mxu0 %v9882_v14  ;;  %v1317_v59 = vpop.permute.xlu1 %1316 }
 0x33a   : > { %v1270_v60 = vpop.permute.xlu1 %1269 }
 0x33b   : > { %7015 = vmatmul.mubr.msk.bf16.vlgmr.msra.gmra.mrb[20].mxu1 %vm893_vm5, %v8160_v15 }
 0x33c   : > { %7025 = vmatpush3.bf16.msra.mxu1 %v1223_v26  ;;  %7026 = vmatprep.mubr.msk.bf16.mxu1 %vm7975_vm2, %v9882_v14 }
 0x33d   : > { %7036 = vmatprep.subr.bf16.mxu1 %v9882_v14 }
 0x3fe   : > { %v934_v27 = vpop.f32.mrb[12].mxu1 }
 0x3ff   : > { %v6998_v28 = vpop.f32.mrb[13].mxu1  ;;  %v1091_v29 = vsel %vm612_vm3, %v934_v27, -inf }
 0x400   : > { %1092 = vmax.xlane.f32.xlu0 %v1091_v29  ;;  %v937_v30 = vpop.f32.mrb[14].mxu1 }
 0x401   : > { %v6999_v31 = vpop.f32.mrb[15].mxu1  ;;  %v1094_v32 = vsel %vm612_vm3, %v937_v30, -inf }
 0x402   : > { %1095 = vmax.xlane.f32.xlu1 %v1094_v32 }
 0x406   : > { %v984_v33 = vpop.f32.mrb[16].mxu1  ;;  %v1034_v34 = vpop.f32.mrb[20].mxu0 }
 0x407   : > { %v7004_v35 = vpop.f32.mrb[17].mxu1  ;;  %v7010_v36 = vpop.f32.mrb[21].mxu0  ;;  %v1103_v37 = vsel %vm612_vm3, %v1034_v34, -inf  ;;  %v1097_v38 = vsel %vm612_vm3, %v984_v33, -inf }
 0x408   : > { %v1037_v40 = vpop.f32.mrb[22].mxu0  ;;  %1104 = vmax.xlane.f32.xlu1 %v1103_v37  ;;  %1098 = vmax.xlane.f32.xlu0 %v1097_v38  ;;  %v987_v42 = vpop.f32.mrb[18].mxu1 }
 0x409   : > { %v7005_v43 = vpop.f32.mrb[19].mxu1  ;;  %v7011_v46 = vpop.f32.mrb[23].mxu0  ;;  %v1100_v47 = vsel %vm612_vm3, %v987_v42, -inf  ;;  %v1106_v52 = vsel %vm612_vm3, %v1037_v40, -inf }
 0x40c   : > { %1101 = vmax.xlane.f32.xlu0 %v1100_v47 }
 0x40e   : > { %v1084_v50 = vpop.f32.mrb[20].mxu1 }
 0x40f   : > { %v7016_v51 = vpop.f32.mrb[21].mxu1  ;;  %v1109_v53 = vsel %vm612_vm3, %v1084_v50, -inf }
 0x410   : > { %1107 = vmax.xlane.f32.xlu0 %v1106_v52  ;;  %1110 = vmax.xlane.f32.xlu1 %v1109_v53  ;;  %v1087_v55 = vpop.f32.mrb[22].mxu1 }
 0x411   : > { %v7017_v57 = vpop.f32.mrb[23].mxu1  ;;  %v1112_v58 = vsel %vm612_vm3, %v1087_v55, -inf }
 0x414   : > { %1113 = vmax.xlane.f32.xlu0 %v1112_v58 }
 0x421   : > { %1424 = vrot.lane.b32.xlu1 %v8152_v4, %s7978_s26 }
 0x425   : > { %1475 = vrot.lane.b32.xlu1 %v8162_v16, %s7978_s26 }
 0x429   : > { %1526 = vrot.lane.b32.xlu1 %v8160_v15, %s7978_s26 }
 0x42a   : > { %1373 = vrot.lane.b32.xlu0 %v8154_v5, %s7978_s26 }
 0x42d   : > { %1524 = vrot.lane.b32.xlu1 %v8160_v15, %s7979_s27 }
 0x42e   : > { %1371 = vrot.lane.b32.xlu0 %v8154_v5, %s7979_s27 }
 0x431   : > { %1659 = vrot.lane.b32.xlu1 %v8154_v5, %s7980_s28 }
 0x432   : > { %1422 = vrot.lane.b32.xlu0 %v8152_v4, %s7979_s27 }
 0x435   : > { %1753 = vrot.lane.b32.xlu1 %v8162_v16, %s7980_s28 }
 0x436   : > { %1473 = vrot.lane.b32.xlu0 %v8162_v16, %s7979_s27 }
 0x439   : > { %1800 = vrot.lane.b32.xlu1 %v8160_v15, %s7980_s28 }
 0x43a   : > { %1706 = vrot.lane.b32.xlu0 %v8152_v4, %s7980_s28 }
 0x48d   : > { %v1093_v61 = vpop.xlane.xlu0 %1092 }
 0x48e   : > { %v1115_v62 = vsub.f32 %v934_v27, %v1093_v61 }
 0x48f   : > { %v1096_v63 = vpop.xlane.xlu1 %1095 }
 0x490   : > { %v1123_v0 = vmul.f32 1.442695, %v1115_v62  ;;  %v1116_v1 = vsub.f32 %v937_v30, %v1096_v63 }
 0x492   : > { %v1125_v2 = vmul.f32 1.442695, %v1116_v1  ;;  %7646 = vpow2.f32 %v1123_v0 }
 0x494   : > { %7648 = vpow2.f32 %v1125_v2 }
 0x495   : > { %v1099_v3 = vpop.xlane.xlu0 %1098  ;;  %v1105_v6 = vpop.xlane.xlu1 %1104 }
 0x496   : > { %v1117_v7 = vsub.f32 %v984_v33, %v1099_v3  ;;  %v1119_v8 = vsub.f32 %v1034_v34, %v1105_v6 }
 0x498   : > { %v1127_v9 = vmul.f32 1.442695, %v1117_v7  ;;  %v1131_v17 = vmul.f32 1.442695, %v1119_v8 }
 0x499   : > { %v1102_v10 = vpop.xlane.xlu0 %1101 }
 0x49a   : > { %v1118_v11 = vsub.f32 %v987_v42, %v1102_v10  ;;  %7650 = vpow2.f32 %v1127_v9 }
 0x49c   : > { %v1129_v12 = vmul.f32 1.442695, %v1118_v11  ;;  %v8234_v13 = vpop.eup %7646 }
 0x49d   : > { %v1108_v18 = vpop.xlane.xlu0 %1107  ;;  %v1111_v19 = vpop.xlane.xlu1 %1110 }
 0x49e   : > { %v8236_v20 = vpop.eup %7648  ;;  %7652 = vpow2.f32 %v1129_v12  ;;  %v1120_v21 = vsub.f32 %v1037_v40, %v1108_v18  ;;  %v1121_v22 = vsub.f32 %v1084_v50, %v1111_v19 }
 0x49f   : > { %v1171_v23 = vpack.c.bf16 %v8236_v20, %v8234_v13  ;;  %7654 = vpow2.f32 %v1131_v17 }
 0x4a0   : > { %v1133_v24 = vmul.f32 1.442695, %v1120_v21  ;;  %v1135_v25 = vmul.f32 1.442695, %v1121_v22 }
 0x4a1   : > { %7021 = vmatmul.mubr.msk.bf16.vlgmr.msra.gmra.mrb[24].mxu0 %vm612_vm3, %v1171_v23  ;;  %v1114_v26 = vpop.xlane.xlu0 %1113  ;;  %v1425_v30 = vpop.permute.xlu1 %1424 }
 0x4a2   : > { %7656 = vpow2.f32 %v1133_v24  ;;  %7031 = vmatpush3.bf16.msra.mxu0 %v1270_v60  ;;  %v1122_v27 = vsub.f32 %v1087_v55, %v1114_v26  ;;  %7032 = vmatprep.mubr.msk.bf16.mxu0 %vm7975_vm2, %v9882_v14  ;;  %v1430_v50 = vsel %vm893_vm5, %v1425_v30, 0 }
 0x4a3   : > { %7042 = vmatprep.subr.bf16.mxu0 %v9882_v14  ;;  %7658 = vpow2.f32 %v1135_v25 }
 0x4a4   : > { %v1137_v28 = vmul.f32 1.442695, %v1122_v27  ;;  %v8244_v29 = vpop.eup %7650 }
 0x4a5   : > { %v1374_v35 = vpop.permute.xlu0 %1373  ;;  %v1476_v36 = vpop.permute.xlu1 %1475 }
 0x4a6   : > { %7660 = vpow2.f32 %v1137_v28  ;;  %v1379_v40 = vsel %vm893_vm5, %v1374_v35, 0  ;;  %v1481_v51 = vsel %vm893_vm5, %v1476_v36, 0 }
 0x4a8   : > { %v8246_v31 = vpop.eup %7652 }
 0x4a9   : > { %v1172_v32 = vpack.c.bf16 %v8246_v31, %v8244_v29  ;;  %v8250_v33 = vpop.eup %7654  ;;  %v1372_v46 = vpop.permute.xlu0 %1371 }
 0x4aa   : > { %v1527_v47 = vpop.permute.xlu1 %1526 }
 0x4ab   : > { %7027 = vmatmul.mubr.msk.bf16.vlgmr.msra.gmra.mrb[24].mxu1 %vm612_vm3, %v1172_v32  ;;  %v1532_v55 = vsel %vm893_vm5, %v1527_v47, 0 }
 0x4ac   : > { %v8253_v34 = vpop.eup %7656  ;;  %7037 = vmatpush3.bf16.msra.mxu1 %v1317_v59  ;;  %7038 = vmatprep.mubr.msk.bf16.mxu1 %vm7975_vm2, %v9882_v14 }
 0x4ad   : > { %v1173_v37 = vpack.c.bf16 %v8253_v34, %v8250_v33  ;;  %7048 = vmatprep.subr.bf16.mxu1 %v9882_v14  ;;  %v8260_v38 = vpop.eup %7658  ;;  %v1423_v52 = vpop.permute.xlu0 %1422 }
 0x4ae   : > { %v1525_v53 = vpop.permute.xlu1 %1524 }
 0x4af   : > { %7033 = vmatmul.mubr.msk.bf16.vlgmr.msra.gmra.mrb[28].mxu0 %vm612_vm3, %v1173_v37 }
 0x4b0   : > { %v8264_v42 = vpop.eup %7660  ;;  %7043 = vmatpush3.bf16.xpose.msra.mxu0 %v1379_v40  ;;  %7044 = vmatprep.mubr.msk.bf16.mxu0 %vm7975_vm2, %v9882_v14 }
 0x4b1   : > { %v1174_v43 = vpack.c.bf16 %v8264_v42, %v8260_v38  ;;  %7054 = vmatprep.subr.bf16.mxu0 %v9882_v14  ;;  %v1474_v57 = vpop.permute.xlu0 %1473 }
 0x4b2   : > { %v1660_v58 = vpop.permute.xlu1 %1659 }
 0x4b3   : > { %7039 = vmatmul.mubr.msk.bf16.vlgmr.msra.gmra.mrb[28].mxu1 %vm612_vm3, %v1174_v43 }
 0x4b4   : > { %7050 = vmatprep.mubr.msk.bf16.mxu1 %vm7975_vm2, %v9882_v14 }
 0x4b5   : > { %7049 = vmatpush3.bf16.xpose.msra.mxu1 %v1430_v50  ;;  %v1707_v59 = vpop.permute.xlu0 %1706 }
 0x4b6   : > { %7060 = vmatprep.subr.bf16.mxu1 %v9882_v14 }
 0x4b7   : > { %7045 = vmatmul.mubr.msk.bf16.vlgmr.msra.gmra.mrb[32].mxu0 %vm893_vm5, %v1372_v46 }
 0x4b8   : > { %7055 = vmatpush3.bf16.xpose.msra.mxu0 %v1481_v51  ;;  %7056 = vmatprep.mubr.msk.bf16.mxu0 %vm7975_vm2, %v9882_v14 }
 0x4b9   : > { %7066 = vmatprep.subr.bf16.mxu0 %v9882_v14 }
 0x4bc   : > { %7051 = vmatmul.mubr.msk.bf16.vlgmr.msra.gmra.mrb[32].mxu1 %vm893_vm5, %v1423_v52 }
 0x4bd   : > { %7061 = vmatpush3.bf16.xpose.msra.mxu1 %v1532_v55  ;;  %7062 = vmatprep.mubr.msk.bf16.mxu1 %vm7975_vm2, %v9882_v14 }
 0x4be   : > { %7072 = vmatprep.subr.bf16.mxu1 %v9882_v14 }
 0x4bf   : > { %7057 = vmatmul.mubr.msk.bf16.vlgmr.msra.gmra.mrb[36].mxu0 %vm893_vm5, %v1474_v57  ;;  %v1754_v57 = vpop.permute.xlu1 %1753 }
 0x4c0   : > { %7067 = vmatpush3.bf16.msra.mxu0 %v1660_v58  ;;  %7068 = vmatprep.mubr.msk.bf16.mxu0 %vm7975_vm2, %v9882_v14 }
 0x4c1   : > { %7078 = vmatprep.subr.bf16.mxu0 %v9882_v14 }
 0x4c3   : > { %v1801_v58 = vpop.permute.xlu1 %1800 }
 0x4c4   : > { %7063 = vmatmul.mubr.msk.bf16.vlgmr.msra.gmra.mrb[36].mxu1 %vm893_vm5, %v1525_v53 }
 0x4c5   : > { %7073 = vmatpush3.bf16.msra.mxu1 %v1707_v59  ;;  %7074 = vmatprep.mubr.msk.bf16.mxu1 %vm7975_vm2, %v9882_v14 }
 0x4c6   : > { %7084 = vmatprep.subr.bf16.mxu1 %v9882_v14 }
 0x574   : > { %v8294_v60 = vpop.f32.mrb[24].mxu0 }
 0x575   : > { %v7022_v61 = vpop.f32.mrb[25].mxu0 }
 0x576   : > { %v8296_v62 = vpop.f32.mrb[26].mxu0 }
 0x577   : > { %v7023_v63 = vpop.f32.mrb[27].mxu0 }
 0x57e   : > { %v8298_v0 = vpop.f32.mrb[24].mxu1 }
 0x57f   : > { %v7028_v1 = vpop.f32.mrb[25].mxu1 }
 0x580   : > { %v8300_v2 = vpop.f32.mrb[26].mxu1 }
 0x581   : > { %v7029_v3 = vpop.f32.mrb[27].mxu1 }
 0x582   : > { %v8302_v6 = vpop.f32.mrb[28].mxu0 }
 0x583   : > { %v7034_v7 = vpop.f32.mrb[29].mxu0 }
 0x584   : > { %v8304_v8 = vpop.f32.mrb[30].mxu0 }
 0x585   : > { %9932 = vst [vmem:[#allocation10_spill] sm:$0xff] %v8304_v8  ;;  %v7035_v9 = vpop.f32.mrb[31].mxu0 }
 0x586   : > { %v8306_v10 = vpop.f32.mrb[28].mxu1 }
 0x587   : > { %9933 = vst [vmem:[#allocation11_spill] sm:$0xff] %v8306_v10  ;;  %v7040_v11 = vpop.f32.mrb[29].mxu1 }
 0x588   : > { %v8308_v12 = vpop.f32.mrb[30].mxu1 }
 0x589   : > { %9934 = vst [vmem:[#allocation12_spill] sm:$0xff] %v8308_v12  ;;  %v7041_v17 = vpop.f32.mrb[31].mxu1 }
 0x58a   : > { %v1415_v18 = vpop.f32.mrb[32].mxu0 }
 0x58b   : > { %v7046_v19 = vpop.f32.mrb[33].mxu0  ;;  %v1575_v21 = vsel %vm612_vm3, %v1415_v18, -inf }
 0x58c   : > { %1576 = vmax.xlane.f32.xlu0 %v1575_v21  ;;  %v1418_v22 = vpop.f32.mrb[34].mxu0 }
 0x58d   : > { %v7047_v23 = vpop.f32.mrb[35].mxu0  ;;  %v1578_v24 = vsel %vm612_vm3, %v1418_v22, -inf }
 0x58e   : > { %1579 = vmax.xlane.f32.xlu1 %v1578_v24 }
 0x58f   : > { %v1466_v25 = vpop.f32.mrb[32].mxu1 }
 0x590   : > { %v7052_v26 = vpop.f32.mrb[33].mxu1  ;;  %v1581_v27 = vsel %vm612_vm3, %v1466_v25, -inf }
 0x591   : > { %1582 = vmax.xlane.f32.xlu0 %v1581_v27  ;;  %v1469_v28 = vpop.f32.mrb[34].mxu1 }
 0x592   : > { %v7053_v30 = vpop.f32.mrb[35].mxu1  ;;  %v1517_v32 = vpop.f32.mrb[36].mxu0  ;;  %v1584_v40 = vsel %vm612_vm3, %v1469_v28, -inf }
 0x593   : > { %v7058_v35 = vpop.f32.mrb[37].mxu0  ;;  %v1587_v36 = vsel %vm612_vm3, %v1517_v32, -inf }
 0x594   : > { %1588 = vmax.xlane.f32.xlu1 %v1587_v36  ;;  %v1520_v37 = vpop.f32.mrb[38].mxu0 }
 0x595   : > { %1585 = vmax.xlane.f32.xlu0 %v1584_v40  ;;  %v7059_v43 = vpop.f32.mrb[39].mxu0  ;;  %v1590_v50 = vsel %vm612_vm3, %v1520_v37, -inf }
 0x597   : > { %v1568_v46 = vpop.f32.mrb[36].mxu1 }
 0x598   : > { %v7064_v47 = vpop.f32.mrb[37].mxu1  ;;  %v1593_v51 = vsel %vm612_vm3, %v1568_v46, -inf }
 0x599   : > { %1591 = vmax.xlane.f32.xlu0 %v1590_v50  ;;  %1594 = vmax.xlane.f32.xlu1 %v1593_v51  ;;  %v1571_v52 = vpop.f32.mrb[38].mxu1 }
 0x59a   : > { %v7065_v53 = vpop.f32.mrb[39].mxu1  ;;  %v1596_v55 = vsel %vm612_vm3, %v1571_v52, -inf }
 0x59d   : > { %1597 = vmax.xlane.f32.xlu0 %v1596_v55 }
 0x5aa   : > { %1908 = vrot.lane.b32.xlu1 %v8152_v4, %s9908_s29 }
 0x5ae   : > { %1959 = vrot.lane.b32.xlu1 %v8162_v16, %s9908_s29 }
 0x5b2   : > { %2010 = vrot.lane.b32.xlu1 %v8160_v15, %s9908_s29 }
 0x5b3   : > { %1857 = vrot.lane.b32.xlu0 %v8154_v5, %s9908_s29  ;;  %s9964_s29 = smov 40  }
 0x5b6   : > { %2008 = vrot.lane.b32.xlu1 %v8160_v15, %s9906_s30 }
 0x5b7   : > { %1855 = vrot.lane.b32.xlu0 %v8154_v5, %s9906_s30 }
 0x5ba   : > { %2143 = vrot.lane.b32.xlu1 %v8154_v5, %s9904_s16 }
 0x5bb   : > { %1906 = vrot.lane.b32.xlu0 %v8152_v4, %s9906_s30 }
 0x5be   : > { %2237 = vrot.lane.b32.xlu1 %v8162_v16, %s9904_s16 }
 0x5bf   : > { %1957 = vrot.lane.b32.xlu0 %v8162_v16, %s9906_s30  ;;  %s9965_s30 = smov 8  }
 0x5c2   : > { %2284 = vrot.lane.b32.xlu1 %v8160_v15, %s9904_s16 }
 0x5c3   : > { %2190 = vrot.lane.b32.xlu0 %v8152_v4, %s9904_s16  ;;  %s9966_s16 = smov 16  }
 0x619   : > { %v1577_v59 = vpop.xlane.xlu0 %1576 }
 0x61a   : > { %v1599_v61 = vsub.f32 %v1415_v18, %v1577_v59 }
 0x61b   : > { %v1580_v63 = vpop.xlane.xlu1 %1579 }
 0x61c   : > { %v1607_v1 = vmul.f32 1.442695, %v1599_v61  ;;  %v1600_v3 = vsub.f32 %v1418_v22, %v1580_v63 }
 0x61e   : > { %v1609_v7 = vmul.f32 1.442695, %v1600_v3  ;;  %v1583_v9 = vpop.xlane.xlu0 %1582  ;;  %7662 = vpow2.f32 %v1607_v1 }
 0x61f   : > { %v1601_v11 = vsub.f32 %v1466_v25, %v1583_v9 }
 0x620   : > { %7664 = vpow2.f32 %v1609_v7 }
 0x621   : > { %v1589_v17 = vpop.xlane.xlu1 %1588  ;;  %v1611_v19 = vmul.f32 1.442695, %v1601_v11 }
 0x622   : > { %v1603_v21 = vsub.f32 %v1517_v32, %v1589_v17  ;;  %v1586_v23 = vpop.xlane.xlu0 %1585 }
 0x623   : > { %v1602_v24 = vsub.f32 %v1469_v28, %v1586_v23  ;;  %7666 = vpow2.f32 %v1611_v19 }
 0x624   : > { %v1615_v27 = vmul.f32 1.442695, %v1603_v21 }
 0x625   : > { %v1613_v26 = vmul.f32 1.442695, %v1602_v24 }
 0x626   : > { %v1592_v30 = vpop.xlane.xlu0 %1591  ;;  %v1595_v35 = vpop.xlane.xlu1 %1594 }
 0x627   : > { %7668 = vpow2.f32 %v1613_v26  ;;  %v1604_v18 = vsub.f32 %v1520_v37, %v1592_v30  ;;  %v1605_v36 = vsub.f32 %v1568_v46, %v1595_v35 }
 0x628   : > { %v8342_v40 = vpop.eup %7662  ;;  %7670 = vpow2.f32 %v1615_v27 }
 0x629   : > { %v1617_v22 = vmul.f32 1.442695, %v1604_v18  ;;  %v1619_v25 = vmul.f32 1.442695, %v1605_v36 }
 0x62a   : > { %v8344_v43 = vpop.eup %7664  ;;  %v1598_v47 = vpop.xlane.xlu0 %1597 }
 0x62b   : > { %7672 = vpow2.f32 %v1617_v22  ;;  %v1606_v32 = vsub.f32 %v1571_v52, %v1598_v47  ;;  %v1655_v28 = vpack.c.bf16 %v8344_v43, %v8342_v40  ;;  %v1909_v46 = vpop.permute.xlu1 %1908 }
 0x62c   : > { %7674 = vpow2.f32 %v1619_v25  ;;  %v1914_v11 = vsel %vm893_vm5, %v1909_v46, 0 }
 0x62d   : > { %v1621_v50 = vmul.f32 1.442695, %v1606_v32  ;;  %7069 = vmatmul.mubr.msk.bf16.vlgmr.msra.gmra.mrb[40].mxu0 %vm612_vm3, %v1655_v28  ;;  %v8352_v37 = vpop.eup %7666 }
 0x62e   : > { %7079 = vmatpush3.bf16.msra.mxu0 %v1754_v57  ;;  %7080 = vmatprep.mubr.msk.bf16.mxu0 %vm7975_vm2, %v9882_v14  ;;  %v1858_v57 = vpop.permute.xlu0 %1857 }
 0x62f   : > { %7676 = vpow2.f32 %v1621_v50  ;;  %7090 = vmatprep.subr.bf16.mxu0 %v9882_v14  ;;  %v1960_v59 = vpop.permute.xlu1 %1959  ;;  %v1863_v1 = vsel %vm893_vm5, %v1858_v57, 0 }
 0x630   : > { %v1965_v17 = vsel %vm893_vm5, %v1960_v59, 0 }
 0x631   : > { %v8354_v51 = vpop.eup %7668 }
 0x632   : > { %v1656_v52 = vpack.c.bf16 %v8354_v51, %v8352_v37  ;;  %v8358_v53 = vpop.eup %7670  ;;  %v1856_v7 = vpop.permute.xlu0 %1855 }
 0x633   : > { %v2011_v9 = vpop.permute.xlu1 %2010 }
 0x634   : > { %7075 = vmatmul.mubr.msk.bf16.vlgmr.msra.gmra.mrb[40].mxu1 %vm612_vm3, %v1656_v52  ;;  %v2016_v23 = vsel %vm893_vm5, %v2011_v9, 0 }
 0x635   : > { %v8361_v55 = vpop.eup %7672  ;;  %7085 = vmatpush3.bf16.msra.mxu1 %v1801_v58  ;;  %7086 = vmatprep.mubr.msk.bf16.mxu1 %vm7975_vm2, %v9882_v14 }
 0x636   : > { %v1657_v61 = vpack.c.bf16 %v8361_v55, %v8358_v53  ;;  %7096 = vmatprep.subr.bf16.mxu1 %v9882_v14  ;;  %v8368_v63 = vpop.eup %7674  ;;  %v1907_v19 = vpop.permute.xlu0 %1906 }
 0x637   : > { %v2009_v21 = vpop.permute.xlu1 %2008 }
 0x638   : > { %7081 = vmatmul.mubr.msk.bf16.vlgmr.msra.gmra.mrb[44].mxu0 %vm612_vm3, %v1657_v61 }
 0x639   : > { %v8372_v3 = vpop.eup %7676  ;;  %7091 = vmatpush3.bf16.xpose.msra.mxu0 %v1863_v1  ;;  %7092 = vmatprep.mubr.msk.bf16.mxu0 %vm7975_vm2, %v9882_v14 }
 0x63a   : > { %v1658_v58 = vpack.c.bf16 %v8372_v3, %v8368_v63  ;;  %7102 = vmatprep.subr.bf16.mxu0 %v9882_v14  ;;  %v1958_v24 = vpop.permute.xlu0 %1957 }
 0x63b   : > { %v2144_v26 = vpop.permute.xlu1 %2143 }
 0x63c   : > { %7087 = vmatmul.mubr.msk.bf16.vlgmr.msra.gmra.mrb[44].mxu1 %vm612_vm3, %v1658_v58 }
 0x63d   : > { %7098 = vmatprep.mubr.msk.bf16.mxu1 %vm7975_vm2, %v9882_v14 }
 0x63e   : > { %7097 = vmatpush3.bf16.xpose.msra.mxu1 %v1914_v11  ;;  %v2191_v27 = vpop.permute.xlu0 %2190 }
 0x63f   : > { %7108 = vmatprep.subr.bf16.mxu1 %v9882_v14 }
 0x640   : > { %7093 = vmatmul.mubr.msk.bf16.vlgmr.msra.gmra.mrb[48].mxu0 %vm893_vm5, %v1856_v7 }
 0x641   : > { %7103 = vmatpush3.bf16.xpose.msra.mxu0 %v1965_v17  ;;  %7104 = vmatprep.mubr.msk.bf16.mxu0 %vm7975_vm2, %v9882_v14 }
 0x642   : > { %7114 = vmatprep.subr.bf16.mxu0 %v9882_v14 }
 0x645   : > { %7099 = vmatmul.mubr.msk.bf16.vlgmr.msra.gmra.mrb[48].mxu1 %vm893_vm5, %v1907_v19 }
 0x646   : > { %7109 = vmatpush3.bf16.xpose.msra.mxu1 %v2016_v23  ;;  %7110 = vmatprep.mubr.msk.bf16.mxu1 %vm7975_vm2, %v9882_v14 }
 0x647   : > { %7120 = vmatprep.subr.bf16.mxu1 %v9882_v14 }
 0x648   : > { %7105 = vmatmul.mubr.msk.bf16.vlgmr.msra.gmra.mrb[52].mxu0 %vm893_vm5, %v1958_v24 }
 0x649   : > { %7115 = vmatpush3.bf16.msra.mxu0 %v2144_v26  ;;  %7116 = vmatprep.mubr.msk.bf16.mxu0 %vm7975_vm2, %v9882_v14 }
 0x64a   : > { %7126 = vmatprep.subr.bf16.mxu0 %v9882_v14 }
 0x64d   : > { %7111 = vmatmul.mubr.msk.bf16.vlgmr.msra.gmra.mrb[52].mxu1 %vm893_vm5, %v2009_v21 }
 0x64e   : > { %7121 = vmatpush3.bf16.msra.mxu1 %v2191_v27  ;;  %7122 = vmatprep.mubr.msk.bf16.mxu1 %vm7975_vm2, %v9882_v14 }
 0x64f   : > { %7132 = vmatprep.subr.bf16.mxu1 %v9882_v14 }
 0x700   : > { %v8402_v30 = vpop.f32.mrb[40].mxu0 }
 0x701   : > { %v7070_v35 = vpop.f32.mrb[41].mxu0 }
 0x702   : > { %v8404_v18 = vpop.f32.mrb[42].mxu0 }
 0x703   : > { %v7071_v36 = vpop.f32.mrb[43].mxu0 }
 0x707   : > { %v8406_v22 = vpop.f32.mrb[40].mxu1 }
 0x708   : > { %v7076_v25 = vpop.f32.mrb[41].mxu1 }
 0x709   : > { %v8408_v47 = vpop.f32.mrb[42].mxu1 }
 0x70a   : > { %v7077_v32 = vpop.f32.mrb[43].mxu1 }
 0x70b   : > { %v8410_v28 = vpop.f32.mrb[44].mxu0 }
 0x70c   : > { %v7082_v50 = vpop.f32.mrb[45].mxu0 }
 0x70d   : > { %v8412_v46 = vpop.f32.mrb[46].mxu0 }
 0x70e   : > { %v7083_v52 = vpop.f32.mrb[47].mxu0 }
 0x70f   : > { %v8414_v57 = vpop.f32.mrb[44].mxu1 }
 0x710   : > { %v7088_v59 = vpop.f32.mrb[45].mxu1 }
 0x711   : > { %v8416_v61 = vpop.f32.mrb[46].mxu1 }
 0x712   : > { %v7089_v1 = vpop.f32.mrb[47].mxu1 }
 0x713   : > { %v1899_v58 = vpop.f32.mrb[48].mxu0 }
 0x714   : > { %v7094_v7 = vpop.f32.mrb[49].mxu0  ;;  %v2059_v9 = vsel %vm612_vm3, %v1899_v58, -inf }
 0x715   : > { %2060 = vmax.xlane.f32.xlu0 %v2059_v9  ;;  %v1902_v11 = vpop.f32.mrb[50].mxu0 }
 0x716   : > { %v7095_v17 = vpop.f32.mrb[51].mxu0  ;;  %v2062_v19 = vsel %vm612_vm3, %v1902_v11, -inf }
 0x717   : > { %2063 = vmax.xlane.f32.xlu1 %v2062_v19 }
 0x718   : > { %v1950_v21 = vpop.f32.mrb[48].mxu1 }
 0x719   : > { %v7100_v23 = vpop.f32.mrb[49].mxu1  ;;  %v2065_v24 = vsel %vm612_vm3, %v1950_v21, -inf }
 0x71a   : > { %2066 = vmax.xlane.f32.xlu0 %v2065_v24  ;;  %v1953_v26 = vpop.f32.mrb[50].mxu1  ;;  %v2238_v24 = vpop.permute.xlu1 %2237 }
 0x71b   : > { %v7101_v27 = vpop.f32.mrb[51].mxu1  ;;  %v2001_v35 = vpop.f32.mrb[52].mxu0  ;;  %v2068_v50 = vsel %vm612_vm3, %v1953_v26, -inf }
 0x71c   : > { %v7106_v36 = vpop.f32.mrb[53].mxu0  ;;  %v2071_v25 = vsel %vm612_vm3, %v2001_v35, -inf }
 0x71d   : > { %2072 = vmax.xlane.f32.xlu1 %v2071_v25  ;;  %v2004_v32 = vpop.f32.mrb[54].mxu0 }
 0x71e   : > { %2069 = vmax.xlane.f32.xlu0 %v2068_v50  ;;  %v7107_v52 = vpop.f32.mrb[55].mxu0  ;;  %v2074_v7 = vsel %vm612_vm3, %v2004_v32, -inf  ;;  %v2285_v27 = vpop.permute.xlu1 %2284 }
 0x720   : > { %v2052_v59 = vpop.f32.mrb[52].mxu1 }
 0x721   : > { %v7112_v1 = vpop.f32.mrb[53].mxu1  ;;  %v2077_v9 = vsel %vm612_vm3, %v2052_v59, -inf }
 0x722   : > { %2075 = vmax.xlane.f32.xlu0 %v2074_v7  ;;  %2078 = vmax.xlane.f32.xlu1 %v2077_v9  ;;  %v2055_v17 = vpop.f32.mrb[54].mxu1 }
 0x723   : > { %v7113_v19 = vpop.f32.mrb[55].mxu1  ;;  %v2080_v23 = vsel %vm612_vm3, %v2055_v17, -inf }
 0x726   : > { %2081 = vmax.xlane.f32.xlu0 %v2080_v23 }
 0x733   : > { %2392 = vrot.lane.b32.xlu1 %v8152_v4, %s9898_s17 }
 0x737   : > { %2443 = vrot.lane.b32.xlu1 %v8162_v16, %s9898_s17 }
 0x73b   : > { %2494 = vrot.lane.b32.xlu1 %v8160_v15, %s9898_s17 }
 0x73c   : > { %2341 = vrot.lane.b32.xlu0 %v8154_v5, %s9898_s17  ;;  %s6585_s17 = sshll.u32 %s9987_s19, 2 }
 0x73f   : > { %2492 = vrot.lane.b32.xlu1 %v8160_v15, %s9894_s20 }
 0x740   : > { %2339 = vrot.lane.b32.xlu0 %v8154_v5, %s9894_s20 }
 0x743   : > { %2627 = vrot.lane.b32.xlu1 %v8154_v5, %s9892_s21 }
 0x744   : > { %2390 = vrot.lane.b32.xlu0 %v8152_v4, %s9894_s20 }
 0x748   : > { %2441 = vrot.lane.b32.xlu0 %v8162_v16, %s9894_s20  ;;  %s9900_s20 = smov 24  }
 0x7a2   : > { %v2061_v36 = vpop.xlane.xlu0 %2060 }
 0x7a3   : > { %v2083_v25 = vsub.f32 %v1899_v58, %v2061_v36 }
 0x7a4   : > { %v2064_v50 = vpop.xlane.xlu1 %2063 }
 0x7a5   : > { %v2091_v52 = vmul.f32 1.442695, %v2083_v25  ;;  %v2084_v1 = vsub.f32 %v1902_v11, %v2064_v50 }
 0x7a7   : > { %v2093_v7 = vmul.f32 1.442695, %v2084_v1  ;;  %v2067_v9 = vpop.xlane.xlu0 %2066  ;;  %7678 = vpow2.f32 %v2091_v52 }
 0x7a8   : > { %v2085_v19 = vsub.f32 %v1950_v21, %v2067_v9 }
 0x7a9   : > { %7680 = vpow2.f32 %v2093_v7 }
 0x7aa   : > { %v2073_v23 = vpop.xlane.xlu1 %2072  ;;  %v2095_v5 = vmul.f32 1.442695, %v2085_v19 }
 0x7ab   : > { %v2087_v14 = vsub.f32 %v2001_v35, %v2073_v23  ;;  %v2070_v49 = vpop.xlane.xlu0 %2069 }
 0x7ac   : > { %v2086_v56 = vsub.f32 %v1953_v26, %v2070_v49  ;;  %7682 = vpow2.f32 %v2095_v5 }
 0x7ad   : > { %v2099_v54 = vmul.f32 1.442695, %v2087_v14  ;;  %v9935_v14 = vmov 0.0  }
 0x7ae   : > { %v2097_v45 = vmul.f32 1.442695, %v2086_v56 }
 0x7af   : > { %v2076_v41 = vpop.xlane.xlu0 %2075  ;;  %v2079_v48 = vpop.xlane.xlu1 %2078 }
 0x7b0   : > { %7684 = vpow2.f32 %v2097_v45  ;;  %v2088_v58 = vsub.f32 %v2004_v32, %v2076_v41  ;;  %v2089_v36 = vsub.f32 %v2052_v59, %v2079_v48 }
 0x7b1   : > { %v8444_v25 = vpop.eup %7678  ;;  %7686 = vpow2.f32 %v2099_v54 }
 0x7b2   : > { %v2101_v11 = vmul.f32 1.442695, %v2088_v58  ;;  %v2103_v21 = vmul.f32 1.442695, %v2089_v36 }
 0x7b3   : > { %v8446_v50 = vpop.eup %7680  ;;  %v2082_v52 = vpop.xlane.xlu0 %2081 }
 0x7b4   : > { %7688 = vpow2.f32 %v2101_v11  ;;  %v2090_v35 = vsub.f32 %v2055_v17, %v2082_v52  ;;  %v2139_v49 = vpack.c.bf16 %v8446_v50, %v8444_v25  ;;  %v2393_v45 = vpop.permute.xlu1 %2392 }
 0x7b5   : > { %7690 = vpow2.f32 %v2103_v21  ;;  %v2398_v5 = vsel %vm893_vm5, %v2393_v45, 0 }
 0x7b6   : > { %v2105_v56 = vmul.f32 1.442695, %v2090_v35  ;;  %7117 = vmatmul.mubr.msk.bf16.vlgmr.msra.gmra.mrb[56].mxu0 %vm612_vm3, %v2139_v49  ;;  %v8454_v41 = vpop.eup %7682 }
 0x7b7   : > { %7127 = vmatpush3.bf16.msra.mxu0 %v2238_v24  ;;  %7128 = vmatprep.mubr.msk.bf16.mxu0 %vm7975_vm2, %v9935_v14  ;;  %v2342_v59 = vpop.permute.xlu0 %2341 }
 0x7b8   : > { %7692 = vpow2.f32 %v2105_v56  ;;  %7138 = vmatprep.subr.bf16.mxu0 %v9935_v14  ;;  %v2444_v17 = vpop.permute.xlu1 %2443  ;;  %v2347_v7 = vsel %vm893_vm5, %v2342_v59, 0 }
 0x7b9   : > { %v2449_v58 = vsel %vm893_vm5, %v2444_v17, 0 }
 0x7ba   : > { %v8456_v48 = vpop.eup %7684 }
 0x7bb   : > { %v2140_v54 = vpack.c.bf16 %v8456_v48, %v8454_v41  ;;  %v8460_v26 = vpop.eup %7686  ;;  %v2340_v19 = vpop.permute.xlu0 %2339 }
 0x7bc   : > { %v2495_v23 = vpop.permute.xlu1 %2494 }
 0x7bd   : > { %7123 = vmatmul.mubr.msk.bf16.vlgmr.msra.gmra.mrb[56].mxu1 %vm612_vm3, %v2140_v54  ;;  %v2500_v21 = vsel %vm893_vm5, %v2495_v23, 0 }
 0x7be   : > { %v8463_v32 = vpop.eup %7688  ;;  %7133 = vmatpush3.bf16.msra.mxu1 %v2285_v27  ;;  %7134 = vmatprep.mubr.msk.bf16.mxu1 %vm7975_vm2, %v9935_v14 }
 0x7bf   : > { %v2141_v24 = vpack.c.bf16 %v8463_v32, %v8460_v26  ;;  %7144 = vmatprep.subr.bf16.mxu1 %v9935_v14  ;;  %v8470_v1 = vpop.eup %7690  ;;  %v2391_v36 = vpop.permute.xlu0 %2390 }
 0x7c0   : > { %v2493_v11 = vpop.permute.xlu1 %2492 }
 0x7c1   : > { %7129 = vmatmul.mubr.msk.bf16.vlgmr.msra.gmra.mrb[60].mxu0 %vm612_vm3, %v2141_v24 }
 0x7c2   : > { %v8474_v9 = vpop.eup %7692  ;;  %7139 = vmatpush3.bf16.xpose.msra.mxu0 %v2347_v7  ;;  %7140 = vmatprep.mubr.msk.bf16.mxu0 %vm7975_vm2, %v9935_v14 }
 0x7c3   : > { %v2142_v27 = vpack.c.bf16 %v8474_v9, %v8470_v1  ;;  %7150 = vmatprep.subr.bf16.mxu0 %v9935_v14  ;;  %v2442_v52 = vpop.permute.xlu0 %2441 }
 0x7c4   : > { %v2628_v35 = vpop.permute.xlu1 %2627 }
 0x7c5   : > { %7135 = vmatmul.mubr.msk.bf16.vlgmr.msra.gmra.mrb[60].mxu1 %vm612_vm3, %v2142_v27 }
 0x7c6   : > { %7146 = vmatprep.mubr.msk.bf16.mxu1 %vm7975_vm2, %v9935_v14 }
 0x7c7   : > { %7145 = vmatpush3.bf16.xpose.msra.mxu1 %v2398_v5 }
 0x7c8   : > { %7156 = vmatprep.subr.bf16.mxu1 %v9935_v14 }
 0x7c9   : > { %7141 = vmatmul.mubr.msk.bf16.vlgmr.msra.gmra.mrb[64].mxu0 %vm893_vm5, %v2340_v19 }
 0x7ca   : > { %7151 = vmatpush3.bf16.xpose.msra.mxu0 %v2449_v58  ;;  %7152 = vmatprep.mubr.msk.bf16.mxu0 %vm7975_vm2, %v9935_v14 }
 0x7cb   : > { %7162 = vmatprep.subr.bf16.mxu0 %v9935_v14 }
 0x7ce   : > { %7147 = vmatmul.mubr.msk.bf16.vlgmr.msra.gmra.mrb[64].mxu1 %vm893_vm5, %v2391_v36 }
 0x7cf   : > { %7157 = vmatpush3.bf16.xpose.msra.mxu1 %v2500_v21  ;;  %7158 = vmatprep.mubr.msk.bf16.mxu1 %vm7975_vm2, %v9935_v14 }
 0x7d0   : > { %7168 = vmatprep.subr.bf16.mxu1 %v9935_v14 }
 0x7d1   : > { %7153 = vmatmul.mubr.msk.bf16.vlgmr.msra.gmra.mrb[68].mxu0 %vm893_vm5, %v2442_v52 }
 0x7d2   : > { %7163 = vmatpush3.bf16.msra.mxu0 %v2628_v35  ;;  %7164 = vmatprep.mubr.msk.bf16.mxu0 %vm7975_vm2, %v9935_v14 }
 0x7d3   : > { %7174 = vmatprep.subr.bf16.mxu0 %v9935_v14 }
 0x7d6   : > { %7159 = vmatmul.mubr.msk.bf16.vlgmr.msra.gmra.mrb[68].mxu1 %vm893_vm5, %v2493_v11 }
 0x7d7   : > { %7170 = vmatprep.mubr.msk.bf16.mxu1 %vm7975_vm2, %v9935_v14 }
 0x889   : > { %v8503_v49 = vpop.f32.mrb[56].mxu0 }
 0x88a   : > { %v7118_v56 = vpop.f32.mrb[57].mxu0 }
 0x88b   : > { %v8505_v45 = vpop.f32.mrb[58].mxu0 }
 0x88c   : > { %v7119_v54 = vpop.f32.mrb[59].mxu0 }
 0x890   : > { %v8507_v59 = vpop.f32.mrb[56].mxu1 }
 0x891   : > { %v7124_v17 = vpop.f32.mrb[57].mxu1 }
 0x892   : > { %v8509_v24 = vpop.f32.mrb[58].mxu1 }
 0x893   : > { %v7125_v7 = vpop.f32.mrb[59].mxu1 }
 0x894   : > { %v8511_v27 = vpop.f32.mrb[60].mxu0 }
 0x895   : > { %v7130_v19 = vpop.f32.mrb[61].mxu0 }
 0x896   : > { %v8513_v23 = vpop.f32.mrb[62].mxu0 }
 0x897   : > { %v7131_v5 = vpop.f32.mrb[63].mxu0 }
 0x898   : > { %v8515_v58 = vpop.f32.mrb[60].mxu1 }
 0x899   : > { %v7136_v36 = vpop.f32.mrb[61].mxu1 }
 0x89a   : > { %v8517_v11 = vpop.f32.mrb[62].mxu1 }
 0x89b   : > { %v7137_v21 = vpop.f32.mrb[63].mxu1 }
 0x89c   : > { %v8519_v52 = vpop.f32.mrb[64].mxu0 }
 0x89d   : > { %v7142_v35 = vpop.f32.mrb[65].mxu0  ;;  %v2543_v56 = vsel %vm612_vm3, %v8519_v52, -inf }
 0x89e   : > { %2544 = vmax.xlane.f32.xlu0 %v2543_v56  ;;  %v8523_v54 = vpop.f32.mrb[66].mxu0 }
 0x89f   : > { %v7143_v17 = vpop.f32.mrb[67].mxu0  ;;  %v2546_v7 = vsel %vm612_vm3, %v8523_v54, -inf }
 0x8a0   : > { %2547 = vmax.xlane.f32.xlu1 %v2546_v7 }
 0x8a1   : > { %v8527_v19 = vpop.f32.mrb[64].mxu1 }
 0x8a2   : > { %v7148_v5 = vpop.f32.mrb[65].mxu1  ;;  %v2549_v36 = vsel %vm612_vm3, %v8527_v19, -inf }
 0x8a3   : > { %2550 = vmax.xlane.f32.xlu0 %v2549_v36  ;;  %v8531_v21 = vpop.f32.mrb[66].mxu1 }
 0x8a4   : > { %v7149_v35 = vpop.f32.mrb[67].mxu1  ;;  %v8533_v39 = vpop.f32.mrb[68].mxu0  ;;  %v2552_v7 = vsel %vm612_vm3, %v8531_v21, -inf }
 0x8a5   : > { %v7154_v56 = vpop.f32.mrb[69].mxu0  ;;  %v2555_v17 = vsel %vm612_vm3, %v8533_v39, -inf }
 0x8a6   : > { %2556 = vmax.xlane.f32.xlu1 %v2555_v17  ;;  %v8537_v44 = vpop.f32.mrb[70].mxu0 }
 0x8a7   : > { %2553 = vmax.xlane.f32.xlu0 %v2552_v7  ;;  %v7155_v5 = vpop.f32.mrb[71].mxu0  ;;  %v2558_v35 = vsel %vm612_vm3, %v8537_v44, -inf  ;;  %v1626_v7 = vsel %vm612_vm3, %v8344_v43, 0.0  ;;  %v2110_v43 = vsel %vm612_vm3, %v8446_v50, 0.0  ;;  %v1644_v50 = vsel %vm612_vm3, %v8372_v3, 0.0 }
 0x8a8   : > { %v1623_v5 = vsel %vm612_vm3, %v8342_v40, 0.0  ;;  %v1635_v40 = vsel %vm612_vm3, %v8358_v53, 0.0  ;;  %v2125_v53 = vsel %vm612_vm3, %v8470_v1, 0.0 }
 0x8a9   : > { %v8541_v12 = vpop.f32.mrb[68].mxu1 }
 0x8aa   : > { %v7160_v36 = vpop.f32.mrb[69].mxu1  ;;  %v2561_v56 = vsel %vm612_vm3, %v8541_v12, -inf }
 0x8ab   : > { %2559 = vmax.xlane.f32.xlu0 %v2558_v35  ;;  %2562 = vmax.xlane.f32.xlu1 %v2561_v56  ;;  %v8547_v10 = vpop.f32.mrb[70].mxu1 }
 0x8ac   : > { %v7161_v17 = vpop.f32.mrb[71].mxu1  ;;  %v2564_v8 = vsel %vm612_vm3, %v8547_v10, -inf }
 0x8af   : > { %2565 = vmax.xlane.f32.xlu0 %v2564_v8  ;;  %v2107_v8 = vsel %vm612_vm3, %v8444_v25, 0.0  ;;  %v2116_v25 = vsel %vm612_vm3, %v8456_v48, 0.0  ;;  %v2128_v48 = vsel %vm612_vm3, %v8474_v9, 0.0 }
 0x8bc   : > { %2721 = vrot.lane.b32.xlu1 %v8162_v16, %s9892_s21  ;;  %v1629_v16 = vsel %vm612_vm3, %v8352_v37, 0.0  ;;  %v1641_v37 = vsel %vm612_vm3, %v8368_v63, 0.0  ;;  %v2122_v63 = vsel %vm612_vm3, %v8463_v32, 0.0 }
 0x8c0   : > { %2768 = vrot.lane.b32.xlu1 %v8160_v15, %s9892_s21  ;;  %v2113_v15 = vsel %vm612_vm3, %v8454_v41, 0.0  ;;  %v1638_v41 = vsel %vm612_vm3, %v8361_v55, 0.0 }
 0x8c5   : > { %2674 = vrot.lane.b32.xlu0 %v8152_v4, %s9892_s21  ;;  %v1632_v4 = vsel %vm612_vm3, %v8354_v51, 0.0  ;;  %v2119_v51 = vsel %vm612_vm3, %v8460_v26, 0.0  ;;  %s9967_s21 = smov 24  }
 0x8e4   : > { %1627 = vadd.xlane.f32.xlu1 %v1626_v7  ;;  %1624 = vadd.xlane.f32.xlu0 %v1623_v5 }
 0x8e8   : > { %2108 = vadd.xlane.f32.xlu1 %v2107_v8  ;;  %1630 = vadd.xlane.f32.xlu0 %v1629_v16 }
 0x8ec   : > { %2114 = vadd.xlane.f32.xlu1 %v2113_v15  ;;  %1633 = vadd.xlane.f32.xlu0 %v1632_v4 }
 0x8f0   : > { %1636 = vadd.xlane.f32.xlu1 %v1635_v40  ;;  %2111 = vadd.xlane.f32.xlu0 %v2110_v43 }
 0x8f4   : > { %1642 = vadd.xlane.f32.xlu1 %v1641_v37  ;;  %2117 = vadd.xlane.f32.xlu0 %v2116_v25 }
 0x8f8   : > { %2120 = vadd.xlane.f32.xlu1 %v2119_v51  ;;  %1639 = vadd.xlane.f32.xlu0 %v1638_v41 }
 0x8fc   : > { %2126 = vadd.xlane.f32.xlu1 %v2125_v53  ;;  %1645 = vadd.xlane.f32.xlu0 %v1644_v50 }
 0x900   : > { %2123 = vadd.xlane.f32.xlu0 %v2122_v63 }
 0x904   : > { %2129 = vadd.xlane.f32.xlu0 %v2128_v48 }
 0x92b   : > { %v2545_v26 = vpop.xlane.xlu0 %2544 }
 0x92c   : > { %v2567_v55 = vsub.f32 %v8519_v52, %v2545_v26 }
 0x92d   : > { %v2548_v36 = vpop.xlane.xlu1 %2547 }
 0x92e   : > { %v2575_v35 = vmul.f32 1.442695, %v2567_v55  ;;  %v2568_v1 = vsub.f32 %v8523_v54, %v2548_v36 }
 0x930   : > { %7694 = vpow2.f32 %v2575_v35  ;;  %v2577_v56 = vmul.f32 1.442695, %v2568_v1  ;;  %v2551_v3 = vpop.xlane.xlu0 %2550 }
 0x931   : > { %v2569_v17 = vsub.f32 %v8527_v19, %v2551_v3 }
 0x932   : > { %7696 = vpow2.f32 %v2577_v56 }
 0x933   : > { %v2579_v7 = vmul.f32 1.442695, %v2569_v17  ;;  %v2557_v32 = vpop.xlane.xlu1 %2556 }
 0x934   : > { %v2571_v5 = vsub.f32 %v8533_v39, %v2557_v32  ;;  %v2554_v8 = vpop.xlane.xlu0 %2553 }
 0x935   : > { %7698 = vpow2.f32 %v2579_v7  ;;  %v2570_v9 = vsub.f32 %v8531_v21, %v2554_v8 }
 0x936   : > { %v2583_v16 = vmul.f32 1.442695, %v2571_v5 }
 0x937   : > { %v2581_v52 = vmul.f32 1.442695, %v2570_v9 }
 0x938   : > { %7700 = vpow2.f32 %v2583_v16  ;;  %v2560_v15 = vpop.xlane.xlu0 %2559  ;;  %v2563_v4 = vpop.xlane.xlu1 %2562  ;;  %v1139_v16 = vsel %vm612_vm3, %v8234_v13, 0.0  ;;  %v1154_v13 = vsel %vm612_vm3, %v8253_v34, 0.0 }
 0x939   : > { %7702 = vpow2.f32 %v2581_v52  ;;  %v2572_v54 = vsub.f32 %v8537_v44, %v2560_v15  ;;  %v2573_v40 = vsub.f32 %v8541_v12, %v2563_v4  ;;  %v1142_v52 = vsel %vm612_vm3, %v8236_v20, 0.0 }
 0x93a   : > { %v7695_v19 = vpop.eup %7694  ;;  %v1145_v15 = vsel %vm612_vm3, %v8244_v29, 0.0  ;;  %v1148_v4 = vsel %vm612_vm3, %v8246_v31, 0.0  ;;  %v1160_v20 = vsel %vm612_vm3, %v8264_v42, 0.0 }
 0x93b   : > { %v2585_v43 = vmul.f32 1.442695, %v2572_v54  ;;  %v2587_v37 = vmul.f32 1.442695, %v2573_v40  ;;  %v2591_v25 = vsel %vm612_vm3, %v7695_v19, 0.0  ;;  %v1151_v54 = vsel %vm612_vm3, %v8250_v33, 0.0 }
 0x93c   : > { %v7697_v39 = vpop.eup %7696  ;;  %v2566_v51 = vpop.xlane.xlu0 %2565  ;;  %2592 = vadd.xlane.f32.xlu1 %v2591_v25  ;;  %v1157_v40 = vsel %vm612_vm3, %v8260_v38, 0.0 }
 0x93d   : > { %7704 = vpow2.f32 %v2585_v43  ;;  %v2574_v21 = vsub.f32 %v8547_v10, %v2566_v51  ;;  %v2594_v41 = vsel %vm612_vm3, %v7697_v39, 0.0  ;;  %v2623_v53 = vpack.c.bf16 %v7697_v39, %v7695_v19  ;;  %v2722_v44 = vpop.permute.xlu1 %2721 }
 0x93e   : > { %7706 = vpow2.f32 %v2587_v37  ;;  %2595 = vadd.xlane.f32.xlu0 %v2594_v41 }
 0x93f   : > { %v7699_v50 = vpop.eup %7698  ;;  %v2589_v63 = vmul.f32 1.442695, %v2574_v21  ;;  %7165 = vmatmul.mubr.msk.bf16.vlgmr.msra.gmra.mrb[72].mxu0 %vm612_vm3, %v2623_v53 }
 0x940   : > { %7175 = vmatpush3.bf16.msra.mxu0 %v2722_v44  ;;  %v2675_v12 = vpop.permute.xlu0 %2674  ;;  %v2597_v48 = vsel %vm612_vm3, %v7699_v50, 0.0  ;;  %7176 = vmatprep.mubr.msk.bf16.mxu0 %vm7975_vm2, %v9935_v14 }
 0x941   : > { %7708 = vpow2.f32 %v2589_v63  ;;  %2598 = vadd.xlane.f32.xlu1 %v2597_v48  ;;  %7169 = vmatpush3.bf16.msra.mxu1 %v2675_v12  ;;  %v2769_v1 = vpop.permute.xlu1 %2768 }
 0x942   : > { %v7701_v10 = vpop.eup %7700  ;;  %7180 = vmatprep.subr.bf16.mxu1 %v9935_v14 }
 0x943   : > { %v7703_v26 = vpop.eup %7702  ;;  %v2603_v55 = vsel %vm612_vm3, %v7701_v10, 0.0 }
 0x944   : > { %v2600_v36 = vsel %vm612_vm3, %v7703_v26, 0.0  ;;  %v2624_v35 = vpack.c.bf16 %v7703_v26, %v7699_v50 }
 0x945   : > { %2604 = vadd.xlane.f32.xlu1 %v2603_v55  ;;  %2601 = vadd.xlane.f32.xlu0 %v2600_v36 }
 0x946   : > { %7171 = vmatmul.mubr.msk.bf16.vlgmr.msra.gmra.mrb[72].mxu1 %vm612_vm3, %v2624_v35 }
 0x947   : > { %v7705_v56 = vpop.eup %7704  ;;  %7181 = vmatpush3.bf16.msra.mxu1 %v2769_v1  ;;  %7182 = vmatprep.mubr.msk.bf16.mxu1 %vm7975_vm2, %v9935_v14 }
 0x948   : > { %v7707_v3 = vpop.eup %7706  ;;  %v2606_v17 = vsel %vm612_vm3, %v7705_v56, 0.0  ;;  %v2625_v7 = vpack.c.bf16 %v7705_v56, %v7701_v10 }
 0x949   : > { %v2609_v32 = vsel %vm612_vm3, %v7707_v3, 0.0  ;;  %2607 = vadd.xlane.f32.xlu0 %v2606_v17 }
 0x94a   : > { %2610 = vadd.xlane.f32.xlu1 %v2609_v32  ;;  %7177 = vmatmul.mubr.msk.bf16.vlgmr.msra.gmra.mrb[76].mxu0 %vm612_vm3, %v2625_v7 }
 0x94b   : > { %v7709_v5 = vpop.eup %7708 }
 0x94c   : > { %v2612_v8 = vsel %vm612_vm3, %v7709_v5, 0.0  ;;  %v2626_v9 = vpack.c.bf16 %v7709_v5, %v7707_v3 }
 0x94d   : > { %2613 = vadd.xlane.f32.xlu0 %v2612_v8 }
 0x94e   : > { %1140 = vadd.xlane.f32.xlu1 %v1139_v16  ;;  %7183 = vmatmul.mubr.msk.bf16.vlgmr.msra.gmra.mrb[76].mxu1 %vm612_vm3, %v2626_v9 }
 0x951   : > { %1143 = vadd.xlane.f32.xlu0 %v1142_v52 }
 0x952   : > { %1146 = vadd.xlane.f32.xlu1 %v1145_v15 }
 0x955   : > { %1149 = vadd.xlane.f32.xlu0 %v1148_v4 }
 0x956   : > { %1152 = vadd.xlane.f32.xlu1 %v1151_v54 }
 0x959   : > { %1155 = vadd.xlane.f32.xlu0 %v1154_v13 }
 0x95a   : > { %1158 = vadd.xlane.f32.xlu1 %v1157_v40 }
 0x95d   : > { %1161 = vadd.xlane.f32.xlu0 %v1160_v20 }
 0x971   : > { %v1628_v29 = vpop.xlane.xlu1 %1627  ;;  %v1625_v19 = vpop.xlane.xlu0 %1624 }
 0x972   : > { %7710 = vrcp.f32 %v1628_v29 }
 0x973   : > { %7712 = vrcp.f32 %v1625_v19 }
 0x975   : > { %v2109_v31 = vpop.xlane.xlu1 %2108  ;;  %v1631_v33 = vpop.xlane.xlu0 %1630 }
 0x976   : > { %7714 = vrcp.f32 %v1631_v33 }
 0x979   : > { %v2115_v43 = vpop.xlane.xlu1 %2114  ;;  %v1634_v37 = vpop.xlane.xlu0 %1633 }
 0x97a   : > { %7716 = vrcp.f32 %v1634_v37 }
 0x97b   : > { %7718 = vrcp.f32 %v2109_v31 }
 0x97c   : > { %v7711_v34 = vpop.eup %7710 }
 0x97d   : > { %v7713_v25 = vpop.eup %7712  ;;  %v1637_v38 = vpop.xlane.xlu1 %1636  ;;  %v1848_v51 = vmul.f32 %v7711_v34, %v8404_v18 }
 0x97e   : > { %v2112_v39 = vpop.xlane.xlu0 %2111  ;;  %v1847_v42 = vmul.f32 %v7713_v25, %v8402_v30 }
 0x97f   : > { %7720 = vrcp.f32 %v2112_v39 }
 0x980   : > { %v7503_v21 = vpack.i.bf16 %v1848_v51, %v1847_v42  ;;  %7722 = vrcp.f32 %v2115_v43  ;;  %v7715_v50 = vpop.eup %7714  ;;  %v7626_v43 = vld [vmem:[%s9872_s6] sm:$0xff]  }
 0x981   : > { %v1643_v41 = vpop.xlane.xlu1 %1642  ;;  %v1849_v12 = vmul.f32 %v7715_v50, %v8406_v22  ;;  %7186 = vmatprep.subr.bf16.mxu0 %v7626_v43 }
 0x982   : > { %v2118_v53 = vpop.xlane.xlu0 %2117  ;;  %7504 = vrot.lane.b32.xlu1 %v7503_v21, %s9896_s22  ;;  %7187 = vmatpush3.bf16.msra.mxu0 %v7626_v43 }
 0x983   : > { %7724 = vrcp.f32 %v2118_v53 }
 0x984   : > { %v7717_v44 = vpop.eup %7716  ;;  %7726 = vrcp.f32 %v1637_v38  ;;  %v7627_v38 = vld [vmem:[%s9872_s6 + $0x8] sm:$0xff]  }
 0x985   : > { %v1850_v48 = vmul.f32 %v7717_v44, %v8408_v47  ;;  %v7719_v18 = vpop.eup %7718  ;;  %v2121_v10 = vpop.xlane.xlu1 %2120  ;;  %7188 = vmatprep.subr.bf16.mxu0 %v7627_v38 }
 0x986   : > { %v1640_v63 = vpop.xlane.xlu0 %1639  ;;  %v2331_v36 = vmul.f32 %v7719_v18, %v8503_v49  ;;  %7189 = vmatpush3.bf16.msra.mxu0 %v7627_v38 }
 0x987   : > { %7728 = vrcp.f32 %v1640_v63  ;;  %v7508_v30 = vpack.i.bf16 %v1850_v48, %v1849_v12 }
 0x988   : > { %7730 = vrcp.f32 %v1643_v41 }
 0x989   : > { %v7721_v26 = vpop.eup %7720  ;;  %7509 = vrot.lane.b32.xlu0 %v7508_v30, %s9896_s22  ;;  %v2127_v3 = vpop.xlane.xlu1 %2126 }
 0x98a   : > { %v1646_v55 = vpop.xlane.xlu0 %1645  ;;  %v2332_v35 = vmul.f32 %v7721_v26, %v8505_v45  ;;  %v7723_v1 = vpop.eup %7722 }
 0x98b   : > { %7732 = vrcp.f32 %v1646_v55  ;;  %v2333_v17 = vmul.f32 %v7723_v1, %v8507_v59 }
 0x98c   : > { %7734 = vrcp.f32 %v2121_v10  ;;  %v7513_v56 = vpack.i.bf16 %v2332_v35, %v2331_v36 }
 0x98d   : > { %v7725_v22 = vpop.eup %7724 }
 0x98e   : > { %v2124_v47 = vpop.xlane.xlu0 %2123  ;;  %7514 = vrot.lane.b32.xlu1 %v7513_v56, %s9902_s23  ;;  %v2334_v7 = vmul.f32 %v7725_v22, %v8509_v24  ;;  %v7727_v32 = vpop.eup %7726 }
 0x98f   : > { %7736 = vrcp.f32 %v2124_v47  ;;  %v1851_v8 = vmul.f32 %v7727_v32, %v8410_v28 }
 0x990   : > { %7738 = vrcp.f32 %v2127_v3  ;;  %v7518_v49 = vpack.i.bf16 %v2334_v7, %v2333_v17 }
 0x991   : > { %v7729_v5 = vpop.eup %7728 }
 0x992   : > { %v2130_v45 = vpop.xlane.xlu0 %2129  ;;  %7519 = vrot.lane.b32.xlu1 %v7518_v49, %s9902_s23  ;;  %v1852_v9 = vmul.f32 %v7729_v5, %v8412_v46  ;;  %v7731_v16 = vpop.eup %7730 }
 0x993   : > { %7740 = vrcp.f32 %v2130_v45  ;;  %v1853_v59 = vmul.f32 %v7731_v16, %v8414_v57 }
 0x994   : > { %v7523_v52 = vpack.i.bf16 %v1852_v9, %v1851_v8 }
 0x995   : > { %v7733_v15 = vpop.eup %7732 }
 0x996   : > { %v7735_v4 = vpop.eup %7734  ;;  %7524 = vrot.lane.b32.xlu0 %v7523_v52, %s9896_s22  ;;  %v1854_v24 = vmul.f32 %v7733_v15, %v8416_v61 }
 0x997   : > { %v2335_v40 = vmul.f32 %v7735_v4, %v8511_v27 }
 0x998   : > { %v7528_v13 = vpack.i.bf16 %v1854_v24, %v1853_v59 }
 0x999   : > { %v7737_v54 = vpop.eup %7736 }
 0x99a   : > { %v2336_v20 = vmul.f32 %v7737_v54, %v8513_v23  ;;  %v7739_v29 = vpop.eup %7738  ;;  %7529 = vrot.lane.b32.xlu1 %v7528_v13, %s9896_s22 }
 0x99b   : > { %v8651_v19 = vmul.f32 %v7739_v29, %v8515_v58 }
 0x99c   : > { %v7538_v28 = vpack.i.bf16 %v2336_v20, %v2335_v40 }
 0x99d   : > { %v7741_v46 = vpop.eup %7740 }
 0x99e   : > { %v8654_v31 = vmul.f32 %v7741_v46, %v8517_v11 }
 0x9a0   : > { %v7548_v57 = vpack.i.bf16 %v8654_v31, %v8651_v19 }
 0x9c9   : > { %v2593_v61 = vpop.xlane.xlu1 %2592 }
 0x9ca   : > { %7742 = vrcp.f32 %v2593_v61 }
 0x9cb   : > { %v2596_v33 = vpop.xlane.xlu0 %2595 }
 0x9cc   : > { %7744 = vrcp.f32 %v2596_v33 }
 0x9ce   : > { %v2599_v27 = vpop.xlane.xlu1 %2598 }
 0x9cf   : > { %7746 = vrcp.f32 %v2599_v27 }
 0x9d2   : > { %v2602_v23 = vpop.xlane.xlu0 %2601  ;;  %v2605_v37 = vpop.xlane.xlu1 %2604 }
 0x9d3   : > { %7748 = vrcp.f32 %v2602_v23 }
 0x9d4   : > { %v7743_v34 = vpop.eup %7742  ;;  %7750 = vrcp.f32 %v2605_v37 }
 0x9d6   : > { %v2608_v58 = vpop.xlane.xlu0 %2607  ;;  %v7745_v39 = vpop.eup %7744 }
 0x9d7   : > { %v2611_v42 = vpop.xlane.xlu1 %2610  ;;  %7752 = vrcp.f32 %v2608_v58 }
 0x9d8   : > { %7754 = vrcp.f32 %v2611_v42 }
 0x9d9   : > { %v7747_v12 = vpop.eup %7746 }
 0x9da   : > { %v2614_v50 = vpop.xlane.xlu0 %2613 }
 0x9db   : > { %7756 = vrcp.f32 %v2614_v50  ;;  %v1141_v59 = vpop.xlane.xlu1 %1140 }
 0x9dc   : > { %7758 = vrcp.f32 %v1141_v59 }
 0x9dd   : > { %v7749_v18 = vpop.eup %7748 }
 0x9de   : > { %v7751_v35 = vpop.eup %7750  ;;  %v1144_v24 = vpop.xlane.xlu0 %1143 }
 0x9df   : > { %v1147_v54 = vpop.xlane.xlu1 %1146  ;;  %7760 = vrcp.f32 %v1144_v24 }
 0x9e0   : > { %7762 = vrcp.f32 %v1147_v54 }
 0x9e1   : > { %v7753_v22 = vpop.eup %7752 }
 0x9e2   : > { %v7755_v49 = vpop.eup %7754  ;;  %v1150_v13 = vpop.xlane.xlu0 %1149 }
 0x9e3   : > { %v1153_v40 = vpop.xlane.xlu1 %1152  ;;  %7764 = vrcp.f32 %v1150_v13 }
 0x9e4   : > { %7766 = vrcp.f32 %v1153_v40 }
 0x9e5   : > { %v7757_v8 = vpop.eup %7756 }
 0x9e6   : > { %v1156_v20 = vpop.xlane.xlu0 %1155 }
 0x9e7   : > { %v1159_v29 = vpop.xlane.xlu1 %1158  ;;  %7768 = vrcp.f32 %v1156_v20 }
 0x9e8   : > { %7770 = vrcp.f32 %v1159_v29 }
 0x9f4   : > { %v7505_v46 = vpop.permute.xlu1 %7504 }
 0x9f5   : > { %v7507_v27 = vunpack.i.h.bf16 %v7505_v46  ;;  %v7506_v23 = vunpack.i.l.bf16 %v7505_v46 }
 0xa00   : > { %v7515_v31 = vpop.permute.xlu1 %7514 }
 0xa01   : > { %v7517_v43 = vunpack.i.h.bf16 %v7515_v31  ;;  %v7516_v37 = vunpack.i.l.bf16 %v7515_v31 }
 0xa12   : > { %v2667_v11 = vpop.f32.mrb[72].mxu0 }
 0xa13   : > { %v7166_v25 = vpop.f32.mrb[73].mxu0  ;;  %v2815_v21 = vmul.f32 %v7743_v34, %v2667_v11  ;;  %v7520_v34 = vpop.permute.xlu1 %7519 }
 0xa14   : > { %v2670_v51 = vpop.f32.mrb[74].mxu0 }
 0xa15   : > { %v2816_v41 = vmul.f32 %v7745_v39, %v2670_v51  ;;  %v7167_v53 = vpop.f32.mrb[75].mxu0 }
 0xa17   : > { %v7533_v44 = vpack.i.bf16 %v2816_v41, %v2815_v21 }
 0xa19   : > { %v2714_v63 = vpop.f32.mrb[72].mxu1  ;;  %7534 = vrot.lane.b32.xlu0 %v7533_v44, %s9900_s20 }
 0xa1a   : > { %v7172_v48 = vpop.f32.mrb[73].mxu1  ;;  %v2817_v30 = vmul.f32 %v7747_v12, %v2714_v63 }
 0xa1b   : > { %v2717_v10 = vpop.f32.mrb[74].mxu1 }
 0xa1c   : > { %v2818_v26 = vmul.f32 %v7749_v18, %v2717_v10  ;;  %v7173_v55 = vpop.f32.mrb[75].mxu1 }
 0xa1d   : > { %v2761_v36 = vpop.f32.mrb[76].mxu0  ;;  %7539 = vrot.lane.b32.xlu0 %v7538_v28, %s9902_s23  ;;  %v1162_v28 = vpop.xlane.xlu0 %1161 }
 0xa1e   : > { %v7543_v1 = vpack.i.bf16 %v2818_v26, %v2817_v30  ;;  %v7178_v56 = vpop.f32.mrb[77].mxu0  ;;  %v2819_v47 = vmul.f32 %v7751_v35, %v2761_v36  ;;  %7772 = vrcp.f32 %v1162_v28  ;;  %v7522_v30 = vunpack.i.h.bf16 %v7520_v34 }
 0xa1f   : > { %v2764_v3 = vpop.f32.mrb[78].mxu0  ;;  %v7521_v26 = vunpack.i.l.bf16 %v7520_v34  ;;  %v9936_v56 = vld [vmem:[#allocation10_spill] sm:$0xff] }
 0xa20   : > { %v2820_v17 = vmul.f32 %v7753_v22, %v2764_v3  ;;  %v7179_v7 = vpop.f32.mrb[79].mxu0  ;;  %7544 = vrot.lane.b32.xlu1 %v7543_v1, %s9900_s20 }
 0xa21   : > { %v2808_v32 = vpop.f32.mrb[76].mxu1  ;;  %v7510_v19 = vpop.permute.xlu0 %7509 }
 0xa22   : > { %v7553_v5 = vpack.i.bf16 %v2820_v17, %v2819_v47  ;;  %v7184_v45 = vpop.f32.mrb[77].mxu1  ;;  %v2821_v16 = vmul.f32 %v7755_v49, %v2808_v32  ;;  %v7512_v48 = vunpack.i.h.bf16 %v7510_v19  ;;  %v7511_v18 = vunpack.i.l.bf16 %v7510_v19 }
 0xa23   : > { %v2811_v9 = vpop.f32.mrb[78].mxu1 }
 0xa24   : > { %v2822_v52 = vmul.f32 %v7757_v8, %v2811_v9  ;;  %7554 = vrot.lane.b32.xlu0 %v7553_v5, %s9900_s20  ;;  %7549 = vrot.lane.b32.xlu1 %v7548_v57, %s9902_s23  ;;  %v7185_v15 = vpop.f32.mrb[79].mxu1  ;;  %v7759_v57 = vpop.eup %7758 }
 0xa25   : > { %v7761_v61 = vpop.eup %7760  ;;  %v7525_v33 = vpop.permute.xlu0 %7524  ;;  %v1363_v58 = vmul.f32 %v7759_v57, %v8294_v60  ;;  %v9937_v57 = vld [vmem:[#allocation11_spill] sm:$0xff] }
 0xa26   : > { %v7558_v4 = vpack.i.bf16 %v2822_v52, %v2821_v16  ;;  %v1364_v11 = vmul.f32 %v7761_v61, %v8296_v62  ;;  %v7763_v38 = vpop.eup %7762  ;;  %v7530_v60 = vpop.permute.xlu1 %7529  ;;  %v7527_v3 = vunpack.i.h.bf16 %v7525_v33  ;;  %v7526_v47 = vunpack.i.l.bf16 %v7525_v33  ;;  %v9938_v33 = vld [vmem:[#allocation12_spill] sm:$0xff] }
 0xa27   : > { %v2919_v39 = vsel %vm893_vm5, %v1363_v58, %v7506_v23  ;;  %v7765_v41 = vpop.eup %7764  ;;  %v1365_v55 = vmul.f32 %v7763_v38, %v8298_v0  ;;  %v7532_v13 = vunpack.i.h.bf16 %v7530_v60  ;;  %v7531_v40 = vunpack.i.l.bf16 %v7530_v60 }
 0xa28   : > { %7559 = vrot.lane.b32.xlu1 %v7558_v4, %s9900_s20  ;;  %v2920_v51 = vsel %vm893_vm5, %v1364_v11, %v7507_v27  ;;  %v2927_v53 = vsel %vm612_vm3, %v2919_v39, %v7516_v37  ;;  %v7767_v44 = vpop.eup %7766  ;;  %v1366_v36 = vmul.f32 %v7765_v41, %v8300_v2 }
 0xa29   : > { %v2928_v50 = vsel %vm612_vm3, %v2920_v51, %v7517_v43  ;;  %v7769_v12 = vpop.eup %7768  ;;  %v1367_v1 = vmul.f32 %v7767_v44, %v8302_v6  ;;  %v2921_v32 = vsel %vm893_vm5, %v1365_v55, %v7511_v18 }
 0xa2a   : > { %v1368_v22 = vmul.f32 %v7769_v12, %v9936_v56  ;;  %v2922_v7 = vsel %vm893_vm5, %v1366_v36, %v7512_v48  ;;  %v7771_v45 = vpop.eup %7770  ;;  %v2929_v0 = vsel %vm612_vm3, %v2921_v32, %v7521_v26  ;;  %v9939_v12 = vld [vmem:[#allocation4_spill] sm:$0xff]  ;;  %v9941_v36 = vld [vmem:[#allocation6_spill] sm:$0xff] }
 0xa2b   : > { %v2930_v2 = vsel %vm612_vm3, %v2922_v7, %v7522_v30  ;;  %v7773_v16 = vpop.eup %7772  ;;  %v2923_v4 = vsel %vm893_vm5, %v1367_v1, %v7526_v47  ;;  %v1369_v61 = vmul.f32 %v7771_v45, %v9937_v57  ;;  %v9940_v30 = vld [vmem:[#allocation2_spill] sm:$0xff] }
 0xa2c   : > { %v2924_v15 = vsel %vm893_vm5, %v1368_v22, %v7527_v3  ;;  %v1370_v27 = vmul.f32 %v7773_v16, %v9938_v33  ;;  %v9942_v22 = vld [vmem:[#allocation3_spill] sm:$0xff] }
 0xa2d   : > { %v2925_v11 = vsel %vm893_vm5, %v1369_v61, %v7531_v40  ;;  %v9946_v40 = vld [vmem:[#allocation7_spill] sm:$0xff] }
 0xa2e   : > { %v2926_v34 = vsel %vm893_vm5, %v1370_v27, %v7532_v13 }
 0xa8b   : > { %v7535_v25 = vpop.permute.xlu0 %7534 }
 0xa8c   : > { %v7537_v42 = vunpack.i.h.bf16 %v7535_v25  ;;  %v7536_v21 = vunpack.i.l.bf16 %v7535_v25 }
 0xa8e   : > { %v2937_v62 = vsel %vm2935_vm6, %v2928_v50, %v7537_v42  ;;  %v2936_v63 = vsel %vm2935_vm6, %v2927_v53, %v7536_v21  ;;  %v6635_v53 = vld [vmem:[%s9873_s7] ss:$0 sm:$0xff] }
 0xa8f   : > { %v2944_v10 = vpack.c.bf16 %v2937_v62, %v2936_v63  ;;  %v7540_v35 = vpop.permute.xlu0 %7539 }
 0xa90   : > { %v7542_v8 = vunpack.i.h.bf16 %v7540_v35  ;;  %v7541_v9 = vunpack.i.l.bf16 %v7540_v35 }
 0xa91   : > { %7190 = vmatprep.mubr.msk.bf16.mxu0 %vm808_vm4, %v2944_v10 }
 0xa92   : > { %v7545_v17 = vpop.permute.xlu1 %7544  ;;  %v2931_v28 = vsel %vm612_vm3, %v2923_v4, %v7541_v9  ;;  %v2932_v46 = vsel %vm612_vm3, %v2924_v15, %v7542_v8 }
 0xa93   : > { %v7547_v49 = vunpack.i.h.bf16 %v7545_v17  ;;  %v7546_v5 = vunpack.i.l.bf16 %v7545_v17 }
 0xa95   : > { %v2939_v6 = vsel %vm2935_vm6, %v2930_v2, %v7547_v49  ;;  %v2938_v52 = vsel %vm2935_vm6, %v2929_v0, %v7546_v5  ;;  %v9943_v0 = vld [vmem:[#allocation8_spill] sm:$0xff] }
 0xa96   : > { %v2945_v59 = vpack.c.bf16 %v2939_v6, %v2938_v52  ;;  %v7555_v24 = vpop.permute.xlu0 %7554  ;;  %v7550_v54 = vpop.permute.xlu1 %7549  ;;  %v9944_v52 = vld [vmem:[#allocation5_spill] sm:$0xff] }
 0xa97   : > { %v7557_v20 = vunpack.i.h.bf16 %v7555_v24  ;;  %v7556_v29 = vunpack.i.l.bf16 %v7555_v24  ;;  %v7552_v19 = vunpack.i.h.bf16 %v7550_v54  ;;  %v7551_v31 = vunpack.i.l.bf16 %v7550_v54 }
 0xa98   : > { %7191 = vmatmul.mubr.msk.bf16.vlgmr.msra.gmra.mrb[80].mxu0 %vm808_vm4, %v2945_v59  ;;  %v9945_v59 = vld [vmem:[#allocation9_spill] sm:$0xff] }
 0xa99   : > { %v2940_v23 = vsel %vm2935_vm6, %v2931_v28, %v7556_v29  ;;  %v2941_v43 = vsel %vm2935_vm6, %v2932_v46, %v7557_v20  ;;  %v2934_v39 = vsel %vm612_vm3, %v2926_v34, %v7552_v19  ;;  %v2933_v51 = vsel %vm612_vm3, %v2925_v11, %v7551_v31 }
 0xa9a   : > { %v7560_v37 = vpop.permute.xlu1 %7559  ;;  %v2946_v58 = vpack.c.bf16 %v2941_v43, %v2940_v23 }
 0xa9b   : > { %v7562_v25 = vunpack.i.h.bf16 %v7560_v37  ;;  %v7561_v38 = vunpack.i.l.bf16 %v7560_v37 }
 0xa9c   : > { %7194 = vmatprep.mubr.msk.bf16.mxu0 %vm808_vm4, %v2946_v58 }
 0xa9d   : > { %v2943_v42 = vsel %vm2935_vm6, %v2934_v39, %v7562_v25  ;;  %v2942_v21 = vsel %vm2935_vm6, %v2933_v51, %v7561_v38  ;;  %v7628_v38 = vld [vmem:[%s9874_s8] sm:$0xff]   ;;  %v7629_v39 = vld [vmem:[%s9874_s8 + $0x8] sm:$0xff]  }
 0xa9e   : > { %v2947_v41 = vpack.c.bf16 %v2943_v42, %v2942_v21  ;;  %7198 = vmatprep.subr.bf16.mxu1 %v7628_v38  ;;  %v7630_v51 = vld [vmem:[%s9876_s10] sm:$0xff]   ;;  %v7631_v42 = vld [vmem:[%s9876_s10 + $0x8] sm:$0xff]  }
 0xa9f   : > { %7199 = vmatpush3.bf16.msra.mxu1 %v7628_v38  ;;  %7210 = vmatprep.subr.bf16.mxu0 %v7630_v51 }
 0xaa0   : > { %7195 = vmatmul.mubr.msk.bf16.gmra.mrb[84].mxu0 %vm808_vm4, %v2947_v41  ;;  %7200 = vmatprep.subr.bf16.mxu1 %v7629_v39 }
 0xaa1   : > { %7211 = vmatpush3.bf16.msra.mxu0 %v7630_v51 }
 0xaa2   : > { %7212 = vmatprep.subr.bf16.mxu0 %v7631_v42 }
 0xaa3   : > { %7201 = vmatpush3.bf16.msra.mxu1 %v7629_v39 }
 0xaa5   : > { %7213 = vmatpush3.bf16.msra.mxu0 %v7631_v42 }
 0xb6b   : > { %v7192_v50 = vpop.f32.mrb[80].mxu0 }
 0xb6c   : > { %v3026_v44 = vadd.f32 %v7192_v50, %v6635_v53  ;;  %v3017_v60 = vpop.f32.mrb[81].mxu0 }
 0xb6d   : > { %v3018_v62 = vadd.f32 %v6635_v53, %v3017_v60  ;;  %v7193_v63 = vpop.f32.mrb[82].mxu0 }
 0xb6e   : > { %v8710_v48 = vadd.f32 %v3026_v44, %v9939_v12  ;;  %v3029_v18 = vadd.f32 %v7193_v63, %v6635_v53  ;;  %v3020_v10 = vpop.f32.mrb[83].mxu0 }
 0xb6f   : > { %v8713_v26 = vadd.f32 %v3018_v62, %v9940_v30  ;;  %v3021_v55 = vadd.f32 %v6635_v53, %v3020_v10 }
 0xb70   : > { %v8716_v35 = vadd.f32 %v3029_v18, %v9941_v36  ;;  %v3062_v1 = vsel %vm808_vm4, %v8710_v48, 0.0  ;;  %v3091_v56 = vmul.f32 %v8710_v48, %v8710_v48 }
 0xb71   : > { %v8723_v3 = vadd.f32 %v3021_v55, %v9942_v22  ;;  %3063 = vadd.xlane.f32.xlu0 %v3062_v1  ;;  %v3056_v49 = vsel %vm808_vm4, %v8713_v26, 0.0  ;;  %v3089_v6 = vmul.f32 %v8713_v26, %v8713_v26 }
 0xb72   : > { %v3103_v47 = vsel %vm808_vm4, %v3091_v56, 0.0  ;;  %v3065_v54 = vsel %vm808_vm4, %v8716_v35, 0.0  ;;  %v3092_v13 = vmul.f32 %v8716_v35, %v8716_v35 }
 0xb73   : > { %3104 = vadd.xlane.f32.xlu1 %v3103_v47  ;;  %v7196_v17 = vpop.f32.mrb[84].mxu0  ;;  %v3059_v16 = vsel %vm808_vm4, %v8723_v3, 0.0  ;;  %v3097_v29 = vsel %vm808_vm4, %v3089_v6, 0.0  ;;  %v3090_v46 = vmul.f32 %v8723_v3, %v8723_v3 }
 0xb74   : > { %v3042_v7 = vadd.f32 %v7196_v17, %v6635_v53  ;;  %v3033_v32 = vpop.f32.mrb[85].mxu0  ;;  %v3106_v28 = vsel %vm808_vm4, %v3092_v13, 0.0 }
 0xb75   : > { %v3034_v5 = vadd.f32 %v6635_v53, %v3033_v32  ;;  %3057 = vadd.xlane.f32.xlu0 %v3056_v49  ;;  %v7197_v45 = vpop.f32.mrb[86].mxu0  ;;  %v3100_v31 = vsel %vm808_vm4, %v3090_v46, 0.0 }
 0xb76   : > { %v8729_v2 = vadd.f32 %v3042_v7, %v9943_v0  ;;  %v3045_v8 = vadd.f32 %v7197_v45, %v6635_v53  ;;  %v3036_v9 = vpop.f32.mrb[87].mxu0 }
 0xb77   : > { %v8736_v15 = vadd.f32 %v3034_v5, %v9944_v52  ;;  %v3037_v4 = vadd.f32 %v6635_v53, %v3036_v9  ;;  %3060 = vadd.xlane.f32.xlu1 %v3059_v16 }
 0xb78   : > { %v8739_v24 = vadd.f32 %v3045_v8, %v9945_v59  ;;  %v3074_v19 = vsel %vm808_vm4, %v8729_v2, 0.0  ;;  %v3095_v23 = vmul.f32 %v8729_v2, %v8729_v2  ;;  %v3177_v59 = vlaneseq }
 0xb79   : > { %v8746_v20 = vadd.f32 %v3037_v4, %v9946_v40  ;;  %3066 = vadd.xlane.f32.xlu0 %v3065_v54  ;;  %v3068_v57 = vsel %vm808_vm4, %v8736_v15, 0.0  ;;  %v3093_v61 = vmul.f32 %v8736_v15, %v8736_v15 }
 0xb7a   : > { %v3077_v33 = vsel %vm808_vm4, %v8739_v24, 0.0  ;;  %v3115_v58 = vsel %vm808_vm4, %v3095_v23, 0.0  ;;  %v3096_v34 = vmul.f32 %v8739_v24, %v8739_v24 }
 0xb7b   : > { %3098 = vadd.xlane.f32.xlu1 %v3097_v29  ;;  %v3109_v27 = vsel %vm808_vm4, %v3093_v61, 0.0  ;;  %v3071_v43 = vsel %vm808_vm4, %v8746_v20, 0.0  ;;  %v3094_v37 = vmul.f32 %v8746_v20, %v8746_v20 }
 0xb7c   : > { %v3118_v25 = vsel %vm808_vm4, %v3096_v34, 0.0 }
 0xb7d   : > { %3107 = vadd.xlane.f32.xlu0 %v3106_v28  ;;  %v3112_v11 = vsel %vm808_vm4, %v3094_v37, 0.0 }
 0xb7f   : > { %3075 = vadd.xlane.f32.xlu1 %v3074_v19  ;;  %v8795_v19 = vshrl.u32 %v3177_v59, 7 }
 0xb81   : > { %3101 = vadd.xlane.f32.xlu0 %v3100_v31  ;;  %9947 = vst [vmem:[#allocation10_spill] sm:$0xff] %v8795_v19  ;;  %v9913_v38 = vsub.s32 0, %v8795_v19 }
 0xb83   : > { %3069 = vadd.xlane.f32.xlu1 %v3068_v57 }
 0xb85   : > { %3078 = vadd.xlane.f32.xlu0 %v3077_v33 }
 0xb87   : > { %3110 = vadd.xlane.f32.xlu1 %v3109_v27 }
 0xb89   : > { %3072 = vadd.xlane.f32.xlu0 %v3071_v43 }
 0xb8b   : > { %3116 = vadd.xlane.f32.xlu1 %v3115_v58 }
 0xb8d   : > { %3113 = vadd.xlane.f32.xlu0 %v3112_v11 }
 0xb91   : > { %3119 = vadd.xlane.f32.xlu0 %v3118_v25 }
 0xbfe   : > { %v3064_v21 = vpop.xlane.xlu0 %3063 }
 0xbff   : > { %v8785_v41 = vmul.f32 0.03125, %v3064_v21 }
 0xc00   : > { %v3105_v53 = vpop.xlane.xlu1 %3104 }
 0xc01   : > { %v3131_v44 = vmul.f32 %v8785_v41, %v8785_v41  ;;  %v3123_v60 = vmul.f32 0.03125, %v3105_v53  ;;  %v8805_v53 = vld [vmem:[%s9878_s12] sm:$0xf] }
 0xc02   : > { %v3058_v50 = vpop.xlane.xlu0 %3057 }
 0xc03   : > { %v3081_v63 = vmul.f32 0.03125, %v3058_v50  ;;  %v3139_v18 = vsub.f32 %v3123_v60, %v3131_v44  ;;  %v3147_v50 = vsub.f32 %v8710_v48, %v8785_v41 }
 0xc04   : > { %v3061_v62 = vpop.xlane.xlu1 %3060 }
 0xc05   : > { %v3129_v55 = vmul.f32 %v3081_v63, %v3081_v63  ;;  %v3155_v56 = vadd.f32 1e-05, %v3139_v18  ;;  %v3082_v7 = vmul.f32 0.03125, %v3061_v62  ;;  %v3145_v58 = vsub.f32 %v8713_v26, %v3081_v63 }
 0xc06   : > { %v3067_v12 = vpop.xlane.xlu0 %3066  ;;  %v3180_v18 = vrot.slane %v8805_v53, %v9913_v38 }
 0xc07   : > { %v3084_v10 = vmul.f32 0.03125, %v3067_v12  ;;  %7774 = vrsqrt.f32 %v3155_v56  ;;  %v3130_v8 = vmul.f32 %v3082_v7, %v3082_v7  ;;  %v3146_v63 = vsub.f32 %v8723_v3, %v3082_v7 }
 0xc08   : > { %v3099_v30 = vpop.xlane.xlu1 %3098 }
 0xc09   : > { %v3121_v36 = vmul.f32 0.03125, %v3099_v30  ;;  %v3132_v22 = vmul.f32 %v3084_v10, %v3084_v10  ;;  %v3148_v11 = vsub.f32 %v8716_v35, %v3084_v10  ;;  %v9912_v10 = vsub.s32 1, %v8795_v19 }
 0xc0a   : > { %v3108_v1 = vpop.xlane.xlu0 %3107 }
 0xc0b   : > { %v3137_v47 = vsub.f32 %v3121_v36, %v3129_v55  ;;  %v3124_v17 = vmul.f32 0.03125, %v3108_v1  ;;  %v3192_v3 = vrot.slane %v8805_v53, %v9912_v10 }
 0xc0c   : > { %v3076_v32 = vpop.xlane.xlu1 %3075 }
 0xc0d   : > { %v3153_v49 = vadd.f32 1e-05, %v3137_v47  ;;  %v3140_v5 = vsub.f32 %v3124_v17, %v3132_v22  ;;  %v8791_v40 = vmul.f32 0.03125, %v3076_v32 }
 0xc0e   : > { %v3102_v45 = vpop.xlane.xlu0 %3101 }
 0xc0f   : > { %v3156_v0 = vadd.f32 1e-05, %v3140_v5  ;;  %7776 = vrsqrt.f32 %v3153_v49  ;;  %v3122_v9 = vmul.f32 0.03125, %v3102_v45  ;;  %v3135_v27 = vmul.f32 %v8791_v40, %v8791_v40 }
 0xc10   : > { %v3070_v16 = vpop.xlane.xlu1 %3069  ;;  %v3151_v59 = vsub.f32 %v8729_v2, %v8791_v40 }
 0xc11   : > { %7778 = vrsqrt.f32 %v3156_v0  ;;  %v8789_v6 = vmul.f32 0.03125, %v3070_v16  ;;  %v3138_v52 = vsub.f32 %v3122_v9, %v3130_v8  ;;  %v7775_v33 = vpop.eup %7774 }
 0xc12   : > { %v3079_v4 = vpop.xlane.xlu0 %3078  ;;  %v3171_v62 = vmul.f32 %v7775_v33, %v3147_v50 }
 0xc13   : > { %v3154_v54 = vadd.f32 1e-05, %v3138_v52  ;;  %v3133_v29 = vmul.f32 %v8789_v6, %v8789_v6  ;;  %v3088_v34 = vmul.f32 0.03125, %v3079_v4  ;;  %v3149_v0 = vsub.f32 %v8736_v15, %v8789_v6 }
 0xc14   : > { %v3111_v13 = vpop.xlane.xlu1 %3110  ;;  %v3183_v47 = vmul.f32 %v3180_v18, %v3171_v62 }
 0xc15   : > { %v3125_v28 = vmul.f32 0.03125, %v3111_v13  ;;  %7780 = vrsqrt.f32 %v3154_v54  ;;  %v3136_v30 = vmul.f32 %v3088_v34, %v3088_v34 }
 0xc16   : > { %v3073_v46 = vpop.xlane.xlu0 %3072  ;;  %v8825_v8 = vadd.f32 %v3192_v3, %v3183_v47 }
 0xc17   : > { %v3141_v31 = vsub.f32 %v3125_v28, %v3133_v29  ;;  %v3086_v57 = vmul.f32 0.03125, %v3073_v46  ;;  %v3152_v28 = vsub.f32 %v8739_v24, %v3088_v34 }
 0xc18   : > { %v3117_v61 = vpop.xlane.xlu1 %3116 }
 0xc19   : > { %v3157_v23 = vadd.f32 1e-05, %v3141_v31  ;;  %v3127_v43 = vmul.f32 0.03125, %v3117_v61  ;;  %v7777_v37 = vpop.eup %7776  ;;  %v3134_v51 = vmul.f32 %v3086_v57, %v3086_v57  ;;  %v3150_v54 = vsub.f32 %v8746_v20, %v3086_v57 }
 0xc1a   : > { %v3114_v25 = vpop.xlane.xlu0 %3113  ;;  %v3169_v60 = vmul.f32 %v7777_v37, %v3145_v58  ;;  %v7633_v37 = vld [vmem:[%s9876_s10 + $0x18] sm:$0xff]   ;;  %v6642_v58 = vld [vmem:[%s9875_s9] ss:$0 sm:$0xff] }
 0xc1b   : > { %v7779_v39 = vpop.eup %7778  ;;  %7782 = vrsqrt.f32 %v3157_v23  ;;  %v3143_v42 = vsub.f32 %v3127_v43, %v3135_v27  ;;  %v3126_v21 = vmul.f32 0.03125, %v3114_v25  ;;  %v7632_v43 = vld [vmem:[%s9876_s10 + $0x10] sm:$0xff]  }
 0xc1c   : > { %v3172_v26 = vmul.f32 %v7779_v39, %v3148_v11  ;;  %v3181_v22 = vmul.f32 %v3180_v18, %v3169_v60  ;;  %7214 = vmatprep.subr.bf16.mxu0 %v7632_v43 }
 0xc1d   : > { %v3159_v44 = vadd.f32 1e-05, %v3143_v42  ;;  %v3142_v35 = vsub.f32 %v3126_v21, %v3134_v51  ;;  %7215 = vmatpush3.bf16.msra.mxu0 %v7632_v43 }
 0xc1e   : > { %v3120_v12 = vpop.xlane.xlu0 %3119  ;;  %v3184_v48 = vmul.f32 %v3180_v18, %v3172_v26  ;;  %v8819_v5 = vadd.f32 %v3192_v3, %v3181_v22  ;;  %7216 = vmatprep.subr.bf16.mxu0 %v7633_v37 }
 0xc1f   : > { %7784 = vrsqrt.f32 %v3159_v44  ;;  %v3158_v55 = vadd.f32 1e-05, %v3142_v35  ;;  %v3128_v36 = vmul.f32 0.03125, %v3120_v12  ;;  %v7781_v1 = vpop.eup %7780 }
 0xc20   : > { %v3170_v56 = vmul.f32 %v7781_v1, %v3146_v63  ;;  %v8817_v32 = vadd.f32 %v3192_v3, %v3184_v48 }
 0xc21   : > { %7786 = vrsqrt.f32 %v3158_v55  ;;  %v3144_v41 = vsub.f32 %v3128_v36, %v3136_v30  ;;  %7217 = vmatpush3.bf16.msra.mxu0 %v7633_v37 }
 0xc22   : > { %v3182_v7 = vmul.f32 %v3180_v18, %v3170_v56  ;;  %v3202_v16 = vpack.c.bf16 %v8817_v32, %v8825_v8  ;;  %7238 = vmatprep.subr.bf16.mxu0 %v9935_v14 }
 0xc23   : > { %v3160_v17 = vadd.f32 1e-05, %v3144_v41 }
 0xc24   : > { %v8821_v45 = vadd.f32 %v3192_v3, %v3182_v7 }
 0xc25   : > { %v7783_v49 = vpop.eup %7782  ;;  %7788 = vrsqrt.f32 %v3160_v17 }
 0xc26   : > { %v3201_v9 = vpack.c.bf16 %v8821_v45, %v8819_v5  ;;  %v3173_v52 = vmul.f32 %v7783_v49, %v3149_v0  ;;  %v6649_v49 = vld [vmem:[%s9877_s11] ss:$0 sm:$0xff] }
 0xc28   : > { %7202 = vmatprep.mubr.msk.bf16.mxu1 %vm808_vm4, %v3201_v9  ;;  %v3185_v13 = vmul.f32 %v3180_v18, %v3173_v52 }
 0xc29   : > { %v7785_v4 = vpop.eup %7784  ;;  %7203 = vmatmul.mubr.msk.bf16.vlgmr.msra.gmra.mrb[80].mxu1 %vm808_vm4, %v3202_v16 }
 0xc2a   : > { %v3175_v29 = vmul.f32 %v7785_v4, %v3151_v59  ;;  %v8837_v61 = vadd.f32 %v3192_v3, %v3185_v13 }
 0xc2b   : > { %v7787_v15 = vpop.eup %7786 }
 0xc2c   : > { %v3174_v6 = vmul.f32 %v7787_v15, %v3150_v54  ;;  %v3187_v23 = vmul.f32 %v3180_v18, %v3175_v29 }
 0xc2e   : > { %v3186_v46 = vmul.f32 %v3180_v18, %v3174_v6  ;;  %v8844_v40 = vadd.f32 %v3192_v3, %v3187_v23 }
 0xc2f   : > { %v7789_v31 = vpop.eup %7788 }
 0xc30   : > { %v8839_v33 = vadd.f32 %v3192_v3, %v3186_v46  ;;  %v3176_v27 = vmul.f32 %v7789_v31, %v3152_v28 }
 0xc32   : > { %v3203_v2 = vpack.c.bf16 %v8839_v33, %v8837_v61  ;;  %v3188_v20 = vmul.f32 %v3180_v18, %v3176_v27 }
 0xc34   : > { %7206 = vmatprep.mubr.msk.bf16.mxu1 %vm808_vm4, %v3203_v2  ;;  %v8846_v57 = vadd.f32 %v3192_v3, %v3188_v20 }
 0xc36   : > { %v3204_v24 = vpack.c.bf16 %v8846_v57, %v8844_v40 }
 0xc38   : > { %7207 = vmatmul.mubr.msk.bf16.gmra.mrb[84].mxu1 %vm808_vm4, %v3204_v24 }
 0xcfc   : > { %v7204_v11 = vpop.f32.mrb[80].mxu1 }
 0xcfd   : > { %v3283_v34 = vadd.f32 %v7204_v11, %v6642_v58  ;;  %v3274_v25 = vpop.f32.mrb[81].mxu1 }
 0xcfe   : > { %v3275_v39 = vadd.f32 %v6642_v58, %v3274_v25  ;;  %v7205_v51 = vpop.f32.mrb[82].mxu1 }
 0xcff   : > { %v3286_v42 = vadd.f32 %v7205_v51, %v6642_v58  ;;  %v3277_v21 = vpop.f32.mrb[83].mxu1  ;;  %v3307_v26 = vmax.f32 %v3283_v34, 0.0 }
 0xd00   : > { %v3278_v50 = vadd.f32 %v6642_v58, %v3277_v21  ;;  %v3305_v35 = vmax.f32 %v3275_v39, 0.0 }
 0xd01   : > { %v3308_v44 = vmax.f32 %v3286_v42, 0.0 }
 0xd02   : > { %v3306_v60 = vmax.f32 %v3278_v50, 0.0 }
 0xd03   : > { %v3314_v62 = vpack.c.bf16 %v3308_v44, %v3307_v26 }
 0xd04   : > { %v3313_v63 = vpack.c.bf16 %v3306_v60, %v3305_v35 }
 0xd06   : > { %7218 = vmatprep.mubr.msk.bf16.mxu0 %vm3356_vm7, %v3313_v63 }
 0xd07   : > { %7219 = vmatmul.mubr.msk.bf16.vlgmr.msra.gmra.mrb[88].mxu0 %vm3356_vm7, %v3314_v62 }
 0xd0b   : > { %v7208_v12 = vpop.f32.mrb[84].mxu1 }
 0xd0c   : > { %v3299_v18 = vadd.f32 %v7208_v12, %v6642_v58  ;;  %v3290_v30 = vpop.f32.mrb[85].mxu1 }
 0xd0d   : > { %v3291_v55 = vadd.f32 %v6642_v58, %v3290_v30  ;;  %v7209_v36 = vpop.f32.mrb[86].mxu1 }
 0xd0e   : > { %v3302_v1 = vadd.f32 %v7209_v36, %v6642_v58  ;;  %v3293_v48 = vpop.f32.mrb[87].mxu1  ;;  %v3311_v56 = vmax.f32 %v3299_v18, 0.0  ;;  %v7634_v36 = vld [vmem:[%s9870_s4 + $0x10] sm:$0xff]  }
 0xd0f   : > { %v3294_v41 = vadd.f32 %v6642_v58, %v3293_v48  ;;  %v3309_v3 = vmax.f32 %v3291_v55, 0.0  ;;  %7226 = vmatprep.subr.bf16.mxu1 %v7634_v36 }
 0xd10   : > { %v3312_v22 = vmax.f32 %v3302_v1, 0.0  ;;  %7227 = vmatpush3.bf16.msra.mxu1 %v7634_v36  ;;  %v7635_v1 = vld [vmem:[%s9870_s4 + $0x18] sm:$0xff]  }
 0xd11   : > { %v3310_v47 = vmax.f32 %v3294_v41, 0.0  ;;  %7228 = vmatprep.subr.bf16.mxu1 %v7635_v1 }
 0xd12   : > { %v3316_v17 = vpack.c.bf16 %v3312_v22, %v3311_v56 }
 0xd13   : > { %v3315_v7 = vpack.c.bf16 %v3310_v47, %v3309_v3 }
 0xd14   : > { %7229 = vmatpush3.bf16.msra.mxu1 %v7635_v1 }
 0xd15   : > { %7222 = vmatprep.mubr.msk.bf16.mxu0 %vm3356_vm7, %v3315_v7  ;;  %7244 = vmatprep.subr.bf16.mxu1 %v9935_v14 }
 0xd16   : > { %7223 = vmatmul.mubr.msk.bf16.gmra.mrb[92].mxu0 %vm3356_vm7, %v3316_v17 }
 0xd17   : > { %7240 = vmatprep.mubr.msk.bf16.mxu0 %vm7975_vm2, %v9935_v14 }
 0xdda   : > { %v7220_v0 = vpop.f32.mrb[88].mxu0 }
 0xddb   : > { %v3412_v9 = vadd.f32 %v7220_v0, %v6649_v49  ;;  %v3403_v16 = vpop.f32.mrb[89].mxu0 }
 0xddc   : > { %v3404_v52 = vadd.f32 %v6649_v49, %v3403_v16  ;;  %v7221_v4 = vpop.f32.mrb[90].mxu0 }
 0xddd   : > { %v8871_v59 = vadd.f32 %v3412_v9, %v8825_v8  ;;  %v3415_v54 = vadd.f32 %v7221_v4, %v6649_v49  ;;  %v3406_v15 = vpop.f32.mrb[91].mxu0 }
 0xdde   : > { %v3407_v6 = vadd.f32 %v6649_v49, %v3406_v15  ;;  %v8874_v13 = vadd.f32 %v3404_v52, %v8819_v5 }
 0xddf   : > { %v8877_v29 = vadd.f32 %v3415_v54, %v8817_v32  ;;  %v3448_v28 = vsel %vm808_vm4, %v8871_v59, 0.0  ;;  %v3476_v5 = vmul.f32 %v8871_v59, %v8871_v59 }
 0xde0   : > { %3449 = vadd.xlane.f32.xlu1 %v3448_v28  ;;  %v8882_v46 = vadd.f32 %v3407_v6, %v8821_v45  ;;  %v3442_v31 = vsel %vm808_vm4, %v8874_v13, 0.0  ;;  %v3474_v23 = vmul.f32 %v8874_v13, %v8874_v13 }
 0xde1   : > { %v3451_v8 = vsel %vm808_vm4, %v8877_v29, 0.0  ;;  %v3477_v27 = vmul.f32 %v8877_v29, %v8877_v29  ;;  %v3488_v45 = vsel %vm808_vm4, %v3476_v5, 0.0 }
 0xde2   : > { %3452 = vadd.xlane.f32.xlu0 %v3451_v8  ;;  %v3445_v32 = vsel %vm808_vm4, %v8882_v46, 0.0  ;;  %v3475_v37 = vmul.f32 %v8882_v46, %v8882_v46  ;;  %v3482_v51 = vsel %vm808_vm4, %v3474_v23, 0.0 }
 0xde3   : > { %v3491_v43 = vsel %vm808_vm4, %v3477_v27, 0.0 }
 0xde4   : > { %3443 = vadd.xlane.f32.xlu1 %v3442_v31  ;;  %v3485_v50 = vsel %vm808_vm4, %v3475_v37, 0.0 }
 0xde6   : > { %3446 = vadd.xlane.f32.xlu0 %v3445_v32 }
 0xde8   : > { %3489 = vadd.xlane.f32.xlu1 %v3488_v45 }
 0xde9   : > { %v7224_v2 = vpop.f32.mrb[92].mxu0 }
 0xdea   : > { %v3428_v20 = vadd.f32 %v7224_v2, %v6649_v49  ;;  %v3419_v24 = vpop.f32.mrb[93].mxu0  ;;  %3492 = vadd.xlane.f32.xlu0 %v3491_v43 }
 0xdeb   : > { %v7225_v58 = vpop.f32.mrb[94].mxu0  ;;  %v3420_v34 = vadd.f32 %v6649_v49, %v3419_v24 }
 0xdec   : > { %v8901_v11 = vadd.f32 %v3428_v20, %v8844_v40  ;;  %v3431_v25 = vadd.f32 %v7225_v58, %v6649_v49  ;;  %v3422_v39 = vpop.f32.mrb[95].mxu0  ;;  %3483 = vadd.xlane.f32.xlu1 %v3482_v51 }
 0xded   : > { %v3423_v21 = vadd.f32 %v6649_v49, %v3422_v39  ;;  %v8911_v44 = vadd.f32 %v3420_v34, %v8837_v61 }
 0xdee   : > { %v8905_v42 = vadd.f32 %v3431_v25, %v8846_v57  ;;  %v3460_v26 = vsel %vm808_vm4, %v8901_v11, 0.0  ;;  %3486 = vadd.xlane.f32.xlu0 %v3485_v50  ;;  %v9911_v25 = vsub.s32 2, %v8795_v19 }
 0xdef   : > { %v8916_v35 = vadd.f32 %v3423_v21, %v8839_v33  ;;  %v3454_v57 = vsel %vm808_vm4, %v8911_v44, 0.0  ;;  %v3478_v60 = vmul.f32 %v8911_v44, %v8911_v44  ;;  %v3480_v33 = vmul.f32 %v8901_v11, %v8901_v11 }
 0xdf0   : > { %v3463_v40 = vsel %vm808_vm4, %v8905_v42, 0.0  ;;  %3461 = vadd.xlane.f32.xlu1 %v3460_v26  ;;  %v3481_v18 = vmul.f32 %v8905_v42, %v8905_v42 }
 0xdf1   : > { %v3457_v62 = vsel %vm808_vm4, %v8916_v35, 0.0  ;;  %v3479_v61 = vmul.f32 %v8916_v35, %v8916_v35  ;;  %v3494_v63 = vsel %vm808_vm4, %v3478_v60, 0.0  ;;  %v3500_v30 = vsel %vm808_vm4, %v3480_v33, 0.0 }
 0xdf2   : > { %3464 = vadd.xlane.f32.xlu0 %v3463_v40  ;;  %v3503_v55 = vsel %vm808_vm4, %v3481_v18, 0.0 }
 0xdf3   : > { %v3497_v12 = vsel %vm808_vm4, %v3479_v61, 0.0 }
 0xdf4   : > { %3455 = vadd.xlane.f32.xlu1 %v3454_v57 }
 0xdf6   : > { %3458 = vadd.xlane.f32.xlu0 %v3457_v62  ;;  %v8948_v62 = vrot.slane %v8805_v53, %v9911_v25 }
 0xdf8   : > { %3495 = vadd.xlane.f32.xlu1 %v3494_v63 }
 0xdfa   : > { %3498 = vadd.xlane.f32.xlu0 %v3497_v12 }
 0xdfc   : > { %3501 = vadd.xlane.f32.xlu1 %v3500_v30 }
 0xdfe   : > { %3504 = vadd.xlane.f32.xlu0 %v3503_v55 }
 0xe6d   : > { %v3450_v48 = vpop.xlane.xlu1 %3449 }
 0xe6e   : > { %v3468_v22 = vmul.f32 0.03125, %v3450_v48 }
 0xe6f   : > { %v3453_v41 = vpop.xlane.xlu0 %3452 }
 0xe70   : > { %v3469_v47 = vmul.f32 0.03125, %v3453_v41  ;;  %v3516_v7 = vmul.f32 %v3468_v22, %v3468_v22  ;;  %v3532_v12 = vsub.f32 %v8871_v59, %v3468_v22  ;;  %v9910_v41 = vsub.s32 3, %v8795_v19 }
 0xe71   : > { %v3444_v56 = vpop.xlane.xlu1 %3443 }
 0xe72   : > { %v3466_v49 = vmul.f32 0.03125, %v3444_v56  ;;  %v3517_v16 = vmul.f32 %v3469_v47, %v3469_v47  ;;  %v3533_v60 = vsub.f32 %v8877_v29, %v3469_v47 }
 0xe73   : > { %v3447_v3 = vpop.xlane.xlu0 %3446 }
 0xe74   : > { %v3467_v52 = vmul.f32 0.03125, %v3447_v3  ;;  %v3514_v6 = vmul.f32 %v3466_v49, %v3466_v49  ;;  %v3530_v36 = vsub.f32 %v8874_v13, %v3466_v49 }
 0xe75   : > { %v3490_v17 = vpop.xlane.xlu1 %3489 }
 0xe76   : > { %v3508_v0 = vmul.f32 0.03125, %v3490_v17  ;;  %v3515_v32 = vmul.f32 %v3467_v52, %v3467_v52 }
 0xe77   : > { %v3493_v9 = vpop.xlane.xlu0 %3492 }
 0xe78   : > { %v3524_v4 = vsub.f32 %v3508_v0, %v3516_v7  ;;  %v3509_v54 = vmul.f32 0.03125, %v3493_v9  ;;  %v3531_v0 = vsub.f32 %v8882_v46, %v3467_v52 }
 0xe79   : > { %v3484_v15 = vpop.xlane.xlu1 %3483 }
 0xe7a   : > { %v3540_v28 = vadd.f32 1e-05, %v3524_v4  ;;  %v3525_v8 = vsub.f32 %v3509_v54, %v3517_v16  ;;  %v3506_v31 = vmul.f32 0.03125, %v3484_v15 }
 0xe7b   : > { %v3487_v5 = vpop.xlane.xlu0 %3486 }
 0xe7c   : > { %v3541_v27 = vadd.f32 1e-05, %v3525_v8  ;;  %v3522_v45 = vsub.f32 %v3506_v31, %v3514_v6  ;;  %v3507_v23 = vmul.f32 0.03125, %v3487_v5  ;;  %7790 = vrsqrt.f32 %v3540_v28 }
 0xe7d   : > { %v3462_v2 = vpop.xlane.xlu1 %3461  ;;  %v3577_v28 = vrot.slane %v8805_v53, %v9910_v41 }
 0xe7e   : > { %7792 = vrsqrt.f32 %v3541_v27  ;;  %v3538_v20 = vadd.f32 1e-05, %v3522_v45  ;;  %v3523_v24 = vsub.f32 %v3507_v23, %v3515_v32  ;;  %v8942_v21 = vmul.f32 0.03125, %v3462_v2 }
 0xe7f   : > { %v3465_v43 = vpop.xlane.xlu0 %3464 }
 0xe80   : > { %7794 = vrsqrt.f32 %v3538_v20  ;;  %v3539_v37 = vadd.f32 1e-05, %v3523_v24  ;;  %v3473_v61 = vmul.f32 0.03125, %v3465_v43  ;;  %v3520_v48 = vmul.f32 %v8942_v21, %v8942_v21 }
 0xe81   : > { %v3456_v58 = vpop.xlane.xlu1 %3455 }
 0xe82   : > { %7796 = vrsqrt.f32 %v3539_v37  ;;  %v3470_v34 = vmul.f32 0.03125, %v3456_v58  ;;  %v3521_v22 = vmul.f32 %v3473_v61, %v3473_v61 }
 0xe83   : > { %v3459_v39 = vpop.xlane.xlu0 %3458 }
 0xe84   : > { %v3471_v51 = vmul.f32 0.03125, %v3459_v39  ;;  %v3518_v26 = vmul.f32 %v3470_v34, %v3470_v34  ;;  %v3534_v20 = vsub.f32 %v8911_v44, %v3470_v34  ;;  %v3536_v39 = vsub.f32 %v8901_v11, %v8942_v21 }
 0xe85   : > { %v3496_v50 = vpop.xlane.xlu1 %3495 }
 0xe86   : > { %v3510_v40 = vmul.f32 0.03125, %v3496_v50  ;;  %v7791_v57 = vpop.eup %7790  ;;  %v3519_v18 = vmul.f32 %v3471_v51, %v3471_v51  ;;  %v3535_v43 = vsub.f32 %v8916_v35, %v3471_v51 }
 0xe87   : > { %v3499_v63 = vpop.xlane.xlu0 %3498  ;;  %v3556_v3 = vmul.f32 %v7791_v57, %v3532_v12  ;;  %v3537_v57 = vsub.f32 %v8905_v42, %v3473_v61 }
 0xe88   : > { %v7793_v33 = vpop.eup %7792  ;;  %v3526_v30 = vsub.f32 %v3510_v40, %v3518_v26  ;;  %v3511_v55 = vmul.f32 0.03125, %v3499_v63 }
 0xe89   : > { %v3557_v1 = vmul.f32 %v7793_v33, %v3533_v60  ;;  %v3502_v29 = vpop.xlane.xlu1 %3501  ;;  %v3568_v8 = vmul.f32 %v8948_v62, %v3556_v3 }
 0xe8a   : > { %v7795_v56 = vpop.eup %7794  ;;  %v3542_v47 = vadd.f32 1e-05, %v3526_v30  ;;  %v3527_v17 = vsub.f32 %v3511_v55, %v3519_v18  ;;  %v3512_v7 = vmul.f32 0.03125, %v3502_v29  ;;  %v6664_v30 = vld [vmem:[%s9871_s5 + $0x1] ss:$0 sm:$0xff] }
 0xe8b   : > { %v3569_v59 = vmul.f32 %v8948_v62, %v3557_v1  ;;  %v3505_v9 = vpop.xlane.xlu0 %3504  ;;  %v3554_v16 = vmul.f32 %v7795_v56, %v3530_v36  ;;  %v8969_v23 = vadd.f32 %v3577_v28, %v3568_v8 }
 0xe8c   : > { %v7797_v13 = vpop.eup %7796  ;;  %7798 = vrsqrt.f32 %v3542_v47  ;;  %v3543_v49 = vadd.f32 1e-05, %v3527_v17  ;;  %v3528_v4 = vsub.f32 %v3512_v7, %v3520_v48  ;;  %v3513_v54 = vmul.f32 0.03125, %v3505_v9 }
 0xe8d   : > { %v3555_v15 = vmul.f32 %v7797_v13, %v3531_v0  ;;  %v3566_v6 = vmul.f32 %v8948_v62, %v3554_v16  ;;  %v8963_v32 = vadd.f32 %v3577_v28, %v3569_v59  ;;  %9951 = vst [vmem:[#allocation2_spill] sm:$0xff] %v8969_v23 }
 0xe8e   : > { %7800 = vrsqrt.f32 %v3543_v49  ;;  %v3544_v46 = vadd.f32 1e-05, %v3528_v4  ;;  %v3529_v52 = vsub.f32 %v3513_v54, %v3521_v22 }
 0xe8f   : > { %v3567_v31 = vmul.f32 %v8948_v62, %v3555_v15  ;;  %9948 = vst [vmem:[#allocation11_spill] sm:$0xff] %v8963_v32  ;;  %v8965_v27 = vadd.f32 %v3577_v28, %v3566_v6  ;;  %v3589_v2 = vpack.c.bf16 %v8963_v32, %v8969_v23 }
 0xe90   : > { %7802 = vrsqrt.f32 %v3544_v46  ;;  %v3545_v5 = vadd.f32 1e-05, %v3529_v52 }
 0xe91   : > { %9949 = vst [vmem:[#allocation12_spill] sm:$0xff] %v8965_v27  ;;  %v8967_v45 = vadd.f32 %v3577_v28, %v3567_v31 }
 0xe92   : > { %7804 = vrsqrt.f32 %v3545_v5 }
 0xe93   : > { %9950 = vst [vmem:[#allocation4_spill] sm:$0xff] %v8967_v45  ;;  %v3588_v53 = vpack.c.bf16 %v8967_v45, %v8965_v27 }
 0xe95   : > { %7230 = vmatprep.mubr.msk.bf16.mxu1 %vm808_vm4, %v3588_v53 }
 0xe96   : > { %v7799_v24 = vpop.eup %7798  ;;  %7231 = vmatmul.mubr.msk.bf16.vlgmr.msra.gmra.mrb[88].mxu1 %vm808_vm4, %v3589_v2 }
 0xe97   : > { %v3558_v37 = vmul.f32 %v7799_v24, %v3534_v20 }
 0xe98   : > { %v7801_v58 = vpop.eup %7800 }
 0xe99   : > { %v3559_v50 = vmul.f32 %v7801_v58, %v3535_v43  ;;  %v3570_v26 = vmul.f32 %v8948_v62, %v3558_v37 }
 0xe9a   : > { %v7803_v40 = vpop.eup %7802 }
 0xe9b   : > { %v3571_v44 = vmul.f32 %v8948_v62, %v3559_v50  ;;  %v3560_v34 = vmul.f32 %v7803_v40, %v3536_v39  ;;  %v8984_v63 = vadd.f32 %v3577_v28, %v3570_v26 }
 0xe9c   : > { %v7805_v60 = vpop.eup %7804 }
 0xe9d   : > { %9952 = vst [vmem:[#allocation6_spill] sm:$0xff] %v8984_v63  ;;  %v8986_v33 = vadd.f32 %v3577_v28, %v3571_v44  ;;  %v3561_v35 = vmul.f32 %v7805_v60, %v3537_v57  ;;  %v3572_v51 = vmul.f32 %v8948_v62, %v3560_v34 }
 0xe9f   : > { %9953 = vst [vmem:[#allocation3_spill] sm:$0xff] %v8986_v33  ;;  %v3590_v11 = vpack.c.bf16 %v8986_v33, %v8984_v63  ;;  %v3573_v21 = vmul.f32 %v8948_v62, %v3561_v35  ;;  %v8993_v12 = vadd.f32 %v3577_v28, %v3572_v51 }
 0xea1   : > { %7234 = vmatprep.mubr.msk.bf16.mxu1 %vm808_vm4, %v3590_v11  ;;  %9954 = vst [vmem:[#allocation8_spill] sm:$0xff] %v8993_v12  ;;  %v8995_v42 = vadd.f32 %v3577_v28, %v3573_v21 }
 0xea3   : > { %9955 = vst [vmem:[#allocation5_spill] sm:$0xff] %v8995_v42  ;;  %v3591_v61 = vpack.c.bf16 %v8995_v42, %v8993_v12 }
 0xea5   : > { %7235 = vmatmul.mubr.msk.bf16.gmra.mrb[92].mxu1 %vm808_vm4, %v3591_v61 }
 0xea6   : > { %7246 = vmatprep.mubr.msk.bf16.mxu1 %vm7975_vm2, %v9935_v14 }
 0xf69   : > { %v7232_v18 = vpop.f32.mrb[88].mxu1 }
 0xf6a   : > { %v3663_v62 = vpop.f32.mrb[89].mxu1  ;;  %v3672_v36 = vadd.f32 %v7232_v18, %v6664_v30 }
 0xf6b   : > { %v7233_v55 = vpop.f32.mrb[90].mxu1  ;;  %v3664_v29 = vadd.f32 %v6664_v30, %v3663_v62 }
 0xf6c   : > { %v3675_v1 = vadd.f32 %v7233_v55, %v6664_v30  ;;  %v3666_v48 = vpop.f32.mrb[91].mxu1 }
 0xf6d   : > { %v3667_v56 = vadd.f32 %v6664_v30, %v3666_v48 }
 0xf6e   : > { %v9005_v3 = vpack.c.bf16 %v3675_v1, %v3672_v36 }
 0xf6f   : > { %v9007_v47 = vpack.c.bf16 %v3667_v56, %v3664_v29 }
 0xf70   : > { %3749 = vrot.lane.b32.xlu0 %v9005_v3, %s7976_s24 }
 0xf71   : > { %3699 = vrot.lane.b32.xlu1 %v9007_v47, %s7976_s24 }
 0xf74   : > { %4029 = vrot.lane.b32.xlu0 %v9005_v3, %s7977_s25 }
 0xf78   : > { %v7236_v17 = vpop.f32.mrb[92].mxu1 }
 0xf79   : > { %v3679_v7 = vpop.f32.mrb[93].mxu1  ;;  %v3688_v59 = vadd.f32 %v7236_v17, %v6664_v30 }
 0xf7a   : > { %v7237_v0 = vpop.f32.mrb[94].mxu1  ;;  %v3680_v16 = vadd.f32 %v6664_v30, %v3679_v7 }
 0xf7b   : > { %v3691_v22 = vadd.f32 %v7237_v0, %v6664_v30  ;;  %v3682_v9 = vpop.f32.mrb[95].mxu1 }
 0xf7c   : > { %v3683_v13 = vadd.f32 %v6664_v30, %v3682_v9 }
 0xf7d   : > { %v9015_v49 = vpack.c.bf16 %v3691_v22, %v3688_v59 }
 0xf7e   : > { %v9017_v4 = vpack.c.bf16 %v3683_v13, %v3680_v16 }
 0xf80   : > { %3799 = vrot.lane.b32.xlu1 %v9017_v4, %s7976_s24 }
 0xf84   : > { %3849 = vrot.lane.b32.xlu1 %v9015_v49, %s7976_s24  ;;  %s9959_s24 = smov 80  }
 0xf88   : > { %3982 = vrot.lane.b32.xlu1 %v9007_v47, %s7977_s25 }
 0xf8c   : > { %4123 = vrot.lane.b32.xlu1 %v9015_v49, %s7977_s25 }
 0xf90   : > { %4076 = vrot.lane.b32.xlu1 %v9017_v4, %s7977_s25  ;;  %s9960_s25 = smov 112  }
 0xfe2   : > { %v3750_v54 = vpop.permute.xlu0 %3749 }
 0xfe3   : > { %v3755_v15 = vsel %vm893_vm5, %v3750_v54, 0  ;;  %v3700_v6 = vpop.permute.xlu1 %3699 }
 0xfe4   : > { %v3705_v28 = vsel %vm893_vm5, %v3700_v6, 0  ;;  %7245 = vmatpush3.bf16.xpose.msra.mxu1 %v3755_v15 }
 0xfe5   : > { %7239 = vmatpush3.bf16.xpose.msra.mxu0 %v3705_v28  ;;  %7256 = vmatprep.subr.bf16.mxu1 %v9935_v14 }
 0xfe6   : > { %7250 = vmatprep.subr.bf16.mxu0 %v9935_v14  ;;  %v4030_v53 = vpop.permute.xlu0 %4029 }
 0xfeb   : > { %7247 = vmatmul.mubr.msk.bf16.vlgmr.msra.gmra.mrb[96].mxu1 %vm893_vm5, %v9005_v3 }
 0xfec   : > { %7241 = vmatmul.mubr.msk.bf16.vlgmr.msra.gmra.mrb[96].mxu0 %vm893_vm5, %v9007_v47  ;;  %7258 = vmatprep.mubr.msk.bf16.mxu1 %vm7975_vm2, %v9935_v14 }
 0xfed   : > { %7252 = vmatprep.mubr.msk.bf16.mxu0 %vm7975_vm2, %v9935_v14 }
 0xff2   : > { %v3800_v8 = vpop.permute.xlu1 %3799 }
 0xff3   : > { %v3805_v46 = vsel %vm893_vm5, %v3800_v8, 0 }
 0xff4   : > { %7251 = vmatpush3.bf16.xpose.msra.mxu0 %v3805_v46 }
 0xff5   : > { %7262 = vmatprep.subr.bf16.mxu0 %v9935_v14 }
 0xff6   : > { %v3850_v52 = vpop.permute.xlu1 %3849 }
 0xff7   : > { %v3855_v31 = vsel %vm893_vm5, %v3850_v52, 0 }
 0xff8   : > { %7257 = vmatpush3.bf16.xpose.msra.mxu1 %v3855_v31 }
 0xff9   : > { %7268 = vmatprep.subr.bf16.mxu1 %v9935_v14 }
 0xffa   : > { %v3983_v5 = vpop.permute.xlu1 %3982 }
 0xffb   : > { %7253 = vmatmul.mubr.msk.bf16.vlgmr.msra.gmra.mrb[100].mxu0 %vm893_vm5, %v9017_v4 }
 0xffc   : > { %7263 = vmatpush3.bf16.msra.mxu0 %v3983_v5  ;;  %7264 = vmatprep.mubr.msk.bf16.mxu0 %vm7975_vm2, %v9935_v14 }
 0xffd   : > { %7274 = vmatprep.subr.bf16.mxu0 %v9935_v14 }
 0xffe   : > { %v4124_v1 = vpop.permute.xlu1 %4123 }
 0xfff   : > { %7259 = vmatmul.mubr.msk.bf16.vlgmr.msra.gmra.mrb[100].mxu1 %vm893_vm5, %v9015_v49 }
0x1000   : > { %7269 = vmatpush3.bf16.msra.mxu1 %v4030_v53  ;;  %7270 = vmatprep.mubr.msk.bf16.mxu1 %vm7975_vm2, %v9935_v14 }
0x1001   : > { %7280 = vmatprep.subr.bf16.mxu1 %v9935_v14 }
0x1002   : > { %v4077_v48 = vpop.permute.xlu1 %4076 }
0x10be   : > { %v3791_v2 = vpop.f32.mrb[96].mxu1 }
0x10bf   : > { %v3741_v20 = vpop.f32.mrb[96].mxu0  ;;  %v7248_v24 = vpop.f32.mrb[97].mxu1  ;;  %v3904_v43 = vsel %vm612_vm3, %v3791_v2, -inf }
0x10c0   : > { %3905 = vmax.xlane.f32.xlu0 %v3904_v43  ;;  %v7242_v37 = vpop.f32.mrb[97].mxu0  ;;  %v3794_v58 = vpop.f32.mrb[98].mxu1  ;;  %v3898_v57 = vsel %vm612_vm3, %v3741_v20, -inf }
0x10c1   : > { %v3744_v39 = vpop.f32.mrb[98].mxu0  ;;  %v7249_v50 = vpop.f32.mrb[99].mxu1  ;;  %v3907_v44 = vsel %vm612_vm3, %v3794_v58, -inf }
0x10c2   : > { %v7243_v26 = vpop.f32.mrb[99].mxu0  ;;  %v3901_v40 = vsel %vm612_vm3, %v3744_v39, -inf }
0x10c3   : > { %3902 = vmax.xlane.f32.xlu1 %v3901_v40 }
0x10c4   : > { %3899 = vmax.xlane.f32.xlu0 %v3898_v57 }
0x10c8   : > { %3908 = vmax.xlane.f32.xlu0 %v3907_v44 }
0x10ce   : > { %v9059_v34 = vpop.f32.mrb[100].mxu0 }
0x10cf   : > { %v7254_v60 = vpop.f32.mrb[101].mxu0  ;;  %v3910_v55 = vsel %vm612_vm3, %v9059_v34, -inf }
0x10d0   : > { %v9061_v35 = vpop.f32.mrb[102].mxu0 }
0x10d1   : > { %v7255_v51 = vpop.f32.mrb[103].mxu0  ;;  %v3913_v36 = vsel %vm612_vm3, %v9061_v35, -inf }
0x10d2   : > { %v3891_v11 = vpop.f32.mrb[100].mxu1 }
0x10d3   : > { %v7260_v21 = vpop.f32.mrb[101].mxu1  ;;  %v3916_v61 = vsel %vm612_vm3, %v3891_v11, -inf }
0x10d4   : > { %3917 = vmax.xlane.f32.xlu1 %v3916_v61  ;;  %v3894_v18 = vpop.f32.mrb[102].mxu1 }
0x10d5   : > { %v7261_v30 = vpop.f32.mrb[103].mxu1  ;;  %v3919_v62 = vsel %vm612_vm3, %v3894_v18, -inf }
0x10d6   : > { %3920 = vmax.xlane.f32.xlu0 %v3919_v62 }
0x10d8   : > { %3911 = vmax.xlane.f32.xlu1 %v3910_v55 }
0x10da   : > { %3914 = vmax.xlane.f32.xlu0 %v3913_v36 }
0x10e9   : > { %4231 = vrot.lane.b32.xlu1 %v9005_v3, %s7978_s26 }
0x10ed   : > { %4282 = vrot.lane.b32.xlu1 %v9017_v4, %s7978_s26 }
0x10f0   : > { %4180 = vrot.lane.b32.xlu0 %v9007_v47, %s7978_s26 }
0x10f1   : > { %4333 = vrot.lane.b32.xlu1 %v9015_v49, %s7978_s26  ;;  %s9961_s26 = smov 48  }
0x10f4   : > { %4178 = vrot.lane.b32.xlu0 %v9007_v47, %s7979_s27 }
0x10f5   : > { %4331 = vrot.lane.b32.xlu1 %v9015_v49, %s7979_s27 }
0x10f8   : > { %4229 = vrot.lane.b32.xlu0 %v9005_v3, %s7979_s27 }
0x10f9   : > { %4466 = vrot.lane.b32.xlu1 %v9007_v47, %s7980_s28 }
0x10fc   : > { %4280 = vrot.lane.b32.xlu0 %v9017_v4, %s7979_s27  ;;  %s9962_s27 = smov 72  }
0x10fd   : > { %4560 = vrot.lane.b32.xlu1 %v9017_v4, %s7980_s28 }
0x1100   : > { %4513 = vrot.lane.b32.xlu0 %v9005_v3, %s7980_s28 }
0x1101   : > { %4607 = vrot.lane.b32.xlu1 %v9015_v49, %s7980_s28  ;;  %s9963_s28 = smov 104  }
0x114d   : > { %v3906_v29 = vpop.xlane.xlu0 %3905 }
0x114e   : > { %v3924_v17 = vsub.f32 %v3791_v2, %v3906_v29 }
0x1150   : > { %v3903_v56 = vpop.xlane.xlu1 %3902  ;;  %v3934_v16 = vmul.f32 1.442695, %v3924_v17 }
0x1151   : > { %v3923_v7 = vsub.f32 %v3744_v39, %v3903_v56  ;;  %v3900_v0 = vpop.xlane.xlu0 %3899 }
0x1152   : > { %v3922_v59 = vsub.f32 %v3741_v20, %v3900_v0 }
0x1153   : > { %v3932_v22 = vmul.f32 1.442695, %v3923_v7 }
0x1154   : > { %v3930_v9 = vmul.f32 1.442695, %v3922_v59 }
0x1155   : > { %7806 = vpow2.f32 %v3932_v22  ;;  %v3909_v13 = vpop.xlane.xlu0 %3908 }
0x1156   : > { %7808 = vpow2.f32 %v3930_v9  ;;  %v3925_v54 = vsub.f32 %v3794_v58, %v3909_v13 }
0x1157   : > { %7810 = vpow2.f32 %v3934_v16 }
0x1158   : > { %v3936_v15 = vmul.f32 1.442695, %v3925_v54 }
0x115a   : > { %7812 = vpow2.f32 %v3936_v15 }
0x115f   : > { %v9093_v6 = vpop.eup %7806 }
0x1160   : > { %v9095_v28 = vpop.eup %7808 }
0x1161   : > { %v3918_v8 = vpop.xlane.xlu1 %3917  ;;  %v3978_v46 = vpack.c.bf16 %v9093_v6, %v9095_v28  ;;  %v9099_v31 = vpop.eup %7810 }
0x1162   : > { %v3928_v52 = vsub.f32 %v3891_v11, %v3918_v8 }
0x1163   : > { %v3921_v5 = vpop.xlane.xlu0 %3920  ;;  %7265 = vmatmul.mubr.msk.bf16.vlgmr.msra.gmra.mrb[104].mxu0 %vm612_vm3, %v3978_v46 }
0x1164   : > { %v9102_v53 = vpop.eup %7812  ;;  %v3942_v2 = vmul.f32 1.442695, %v3928_v52  ;;  %v3929_v20 = vsub.f32 %v3894_v18, %v3921_v5  ;;  %7275 = vmatpush3.bf16.msra.mxu0 %v4077_v48  ;;  %7276 = vmatprep.mubr.msk.bf16.mxu0 %vm7975_vm2, %v9935_v14 }
0x1165   : > { %v3912_v24 = vpop.xlane.xlu1 %3911  ;;  %v3979_v43 = vpack.c.bf16 %v9102_v53, %v9099_v31  ;;  %7286 = vmatprep.subr.bf16.mxu0 %v9935_v14 }
0x1166   : > { %v3944_v37 = vmul.f32 1.442695, %v3929_v20  ;;  %v3926_v58 = vsub.f32 %v9059_v34, %v3912_v24  ;;  %7814 = vpow2.f32 %v3942_v2 }
0x1167   : > { %7271 = vmatmul.mubr.msk.bf16.vlgmr.msra.gmra.mrb[104].mxu1 %vm612_vm3, %v3979_v43  ;;  %v3915_v39 = vpop.xlane.xlu0 %3914 }
0x1168   : > { %7816 = vpow2.f32 %v3944_v37  ;;  %v3938_v50 = vmul.f32 1.442695, %v3926_v58  ;;  %v3927_v26 = vsub.f32 %v9061_v35, %v3915_v39  ;;  %7281 = vmatpush3.bf16.msra.mxu1 %v4124_v1  ;;  %7282 = vmatprep.mubr.msk.bf16.mxu1 %vm7975_vm2, %v9935_v14 }
0x1169   : > { %7292 = vmatprep.subr.bf16.mxu1 %v9935_v14  ;;  %v4232_v44 = vpop.permute.xlu1 %4231 }
0x116a   : > { %v3940_v40 = vmul.f32 1.442695, %v3927_v26  ;;  %7818 = vpow2.f32 %v3938_v50  ;;  %v4237_v61 = vsel %vm893_vm5, %v4232_v44, 0 }
0x116b   : > { %v4181_v57 = vpop.permute.xlu0 %4180 }
0x116c   : > { %7820 = vpow2.f32 %v3940_v40  ;;  %v4186_v62 = vsel %vm893_vm5, %v4181_v57, 0 }
0x116d   : > { %v4283_v35 = vpop.permute.xlu1 %4282 }
0x116e   : > { %v4288_v29 = vsel %vm893_vm5, %v4283_v35, 0 }
0x116f   : > { %v4179_v51 = vpop.permute.xlu0 %4178 }
0x1170   : > { %v9115_v34 = vpop.eup %7814 }
0x1171   : > { %v4334_v36 = vpop.permute.xlu1 %4333 }
0x1172   : > { %v9117_v60 = vpop.eup %7816  ;;  %v4339_v1 = vsel %vm893_vm5, %v4334_v36, 0 }
0x1173   : > { %v3981_v11 = vpack.c.bf16 %v9117_v60, %v9115_v34  ;;  %v4230_v55 = vpop.permute.xlu0 %4229 }
0x1174   : > { %v9121_v21 = vpop.eup %7818 }
0x1175   : > { %7283 = vmatmul.mubr.msk.bf16.vlgmr.msra.gmra.mrb[108].mxu1 %vm612_vm3, %v3981_v11  ;;  %v4332_v56 = vpop.permute.xlu1 %4331 }
0x1176   : > { %v9125_v18 = vpop.eup %7820  ;;  %7293 = vmatpush3.bf16.xpose.msra.mxu1 %v4237_v61  ;;  %7294 = vmatprep.mubr.msk.bf16.mxu1 %vm7975_vm2, %v9935_v14 }
0x1177   : > { %v3980_v30 = vpack.c.bf16 %v9125_v18, %v9121_v21  ;;  %7304 = vmatprep.subr.bf16.mxu1 %v9935_v14  ;;  %v4281_v48 = vpop.permute.xlu0 %4280 }
0x1179   : > { %7277 = vmatmul.mubr.msk.bf16.vlgmr.msra.gmra.mrb[108].mxu0 %vm612_vm3, %v3980_v30  ;;  %v4467_v7 = vpop.permute.xlu1 %4466 }
0x117a   : > { %7287 = vmatpush3.bf16.xpose.msra.mxu0 %v4186_v62  ;;  %7288 = vmatprep.mubr.msk.bf16.mxu0 %vm7975_vm2, %v9935_v14 }
0x117b   : > { %7298 = vmatprep.subr.bf16.mxu0 %v9935_v14  ;;  %v4514_v17 = vpop.permute.xlu0 %4513 }
0x117d   : > { %7295 = vmatmul.mubr.msk.bf16.vlgmr.msra.gmra.mrb[112].mxu1 %vm893_vm5, %v4230_v55 }
0x117e   : > { %7305 = vmatpush3.bf16.xpose.msra.mxu1 %v4339_v1  ;;  %7306 = vmatprep.mubr.msk.bf16.mxu1 %vm7975_vm2, %v9935_v14 }
0x117f   : > { %7316 = vmatprep.subr.bf16.mxu1 %v9935_v14 }
0x1181   : > { %7289 = vmatmul.mubr.msk.bf16.vlgmr.msra.gmra.mrb[112].mxu0 %vm893_vm5, %v4179_v51 }
0x1182   : > { %7299 = vmatpush3.bf16.xpose.msra.mxu0 %v4288_v29  ;;  %7300 = vmatprep.mubr.msk.bf16.mxu0 %vm7975_vm2, %v9935_v14 }
0x1183   : > { %7310 = vmatprep.subr.bf16.mxu0 %v9935_v14 }
0x1185   : > { %7307 = vmatmul.mubr.msk.bf16.vlgmr.msra.gmra.mrb[116].mxu1 %vm893_vm5, %v4332_v56 }
0x1186   : > { %7317 = vmatpush3.bf16.msra.mxu1 %v4514_v17  ;;  %7318 = vmatprep.mubr.msk.bf16.mxu1 %vm7975_vm2, %v9935_v14 }
0x1187   : > { %7328 = vmatprep.subr.bf16.mxu1 %v9935_v14 }
0x1189   : > { %7301 = vmatmul.mubr.msk.bf16.vlgmr.msra.gmra.mrb[116].mxu0 %vm893_vm5, %v4281_v48 }
0x118a   : > { %7311 = vmatpush3.bf16.msra.mxu0 %v4467_v7  ;;  %7312 = vmatprep.mubr.msk.bf16.mxu0 %vm7975_vm2, %v9935_v14 }
0x118b   : > { %7322 = vmatprep.subr.bf16.mxu0 %v9935_v14 }
0x1236   : > { %v9155_v0 = vpop.f32.mrb[104].mxu0 }
0x1237   : > { %v7266_v59 = vpop.f32.mrb[105].mxu0 }
0x1238   : > { %v9157_v22 = vpop.f32.mrb[106].mxu0 }
0x1239   : > { %v7267_v9 = vpop.f32.mrb[107].mxu0 }
0x123a   : > { %v9159_v16 = vpop.f32.mrb[104].mxu1 }
0x123b   : > { %v7272_v13 = vpop.f32.mrb[105].mxu1 }
0x123c   : > { %v9161_v54 = vpop.f32.mrb[106].mxu1  ;;  %v4561_v13 = vpop.permute.xlu1 %4560 }
0x123d   : > { %v7273_v15 = vpop.f32.mrb[107].mxu1 }
0x1248   : > { %v9163_v8 = vpop.f32.mrb[108].mxu1 }
0x1249   : > { %9956 = vst [vmem:[#allocation9_spill] sm:$0xff] %v9163_v8  ;;  %v7284_v46 = vpop.f32.mrb[109].mxu1 }
0x124a   : > { %v9165_v52 = vpop.f32.mrb[110].mxu1  ;;  %v4608_v46 = vpop.permute.xlu1 %4607 }
0x124b   : > { %9957 = vst [vmem:[#allocation7_spill] sm:$0xff] %v9165_v52  ;;  %v7285_v5 = vpop.f32.mrb[111].mxu1 }
0x124c   : > { %v9167_v2 = vpop.f32.mrb[108].mxu0 }
0x124d   : > { %9958 = vst [vmem:[#allocation13_spill] sm:$0xff] %v9167_v2  ;;  %v7278_v20 = vpop.f32.mrb[109].mxu0 }
0x124e   : > { %v9169_v24 = vpop.f32.mrb[110].mxu0 }
0x124f   : > { %v7279_v43 = vpop.f32.mrb[111].mxu0 }
0x1250   : > { %v4273_v37 = vpop.f32.mrb[112].mxu1 }
0x1251   : > { %v7296_v58 = vpop.f32.mrb[113].mxu1  ;;  %v4388_v39 = vsel %vm612_vm3, %v4273_v37, -inf }
0x1252   : > { %4389 = vmax.xlane.f32.xlu0 %v4388_v39  ;;  %v4276_v50 = vpop.f32.mrb[114].mxu1 }
0x1253   : > { %v7297_v26 = vpop.f32.mrb[115].mxu1  ;;  %v4391_v62 = vsel %vm612_vm3, %v4276_v50, -inf }
0x1254   : > { %v4222_v40 = vpop.f32.mrb[112].mxu0 }
0x1255   : > { %v7290_v57 = vpop.f32.mrb[113].mxu0  ;;  %v4382_v44 = vsel %vm612_vm3, %v4222_v40, -inf }
0x1256   : > { %v4225_v51 = vpop.f32.mrb[114].mxu0  ;;  %4383 = vmax.xlane.f32.xlu0 %v4382_v44 }
0x1257   : > { %v7291_v11 = vpop.f32.mrb[115].mxu0  ;;  %v4385_v35 = vsel %vm612_vm3, %v4225_v51, -inf }
0x1258   : > { %4386 = vmax.xlane.f32.xlu1 %v4385_v35  ;;  %v4375_v61 = vpop.f32.mrb[116].mxu1 }
0x1259   : > { %v7308_v30 = vpop.f32.mrb[117].mxu1  ;;  %v4400_v1 = vsel %vm612_vm3, %v4375_v61, -inf }
0x125a   : > { %4392 = vmax.xlane.f32.xlu0 %v4391_v62  ;;  %v4378_v55 = vpop.f32.mrb[118].mxu1 }
0x125b   : > { %v7309_v36 = vpop.f32.mrb[119].mxu1  ;;  %v4403_v56 = vsel %vm612_vm3, %v4378_v55, -inf }
0x125c   : > { %v4324_v48 = vpop.f32.mrb[116].mxu0  ;;  %4401 = vmax.xlane.f32.xlu1 %v4400_v1 }
0x125d   : > { %v7302_v29 = vpop.f32.mrb[117].mxu0  ;;  %v4394_v59 = vsel %vm612_vm3, %v4324_v48, -inf }
0x125e   : > { %v4327_v17 = vpop.f32.mrb[118].mxu0  ;;  %4404 = vmax.xlane.f32.xlu0 %v4403_v56 }
0x125f   : > { %v7303_v7 = vpop.f32.mrb[119].mxu0  ;;  %v4397_v9 = vsel %vm612_vm3, %v4327_v17, -inf }
0x1260   : > { %4395 = vmax.xlane.f32.xlu1 %v4394_v59 }
0x1262   : > { %4398 = vmax.xlane.f32.xlu0 %v4397_v9 }
0x1271   : > { %4715 = vrot.lane.b32.xlu1 %v9005_v3, %s9959_s24 }
0x1275   : > { %4766 = vrot.lane.b32.xlu1 %v9017_v4, %s9959_s24 }
0x1278   : > { %4664 = vrot.lane.b32.xlu0 %v9007_v47, %s9959_s24 }
0x1279   : > { %4817 = vrot.lane.b32.xlu1 %v9015_v49, %s9959_s24 }
0x127c   : > { %4662 = vrot.lane.b32.xlu0 %v9007_v47, %s9960_s25 }
0x127d   : > { %4815 = vrot.lane.b32.xlu1 %v9015_v49, %s9960_s25 }
0x1280   : > { %4713 = vrot.lane.b32.xlu0 %v9005_v3, %s9960_s25 }
0x1281   : > { %4950 = vrot.lane.b32.xlu1 %v9007_v47, %s9961_s26 }
0x1284   : > { %4764 = vrot.lane.b32.xlu0 %v9017_v4, %s9960_s25 }
0x1285   : > { %5044 = vrot.lane.b32.xlu1 %v9017_v4, %s9961_s26 }
0x1288   : > { %4997 = vrot.lane.b32.xlu0 %v9005_v3, %s9961_s26 }
0x1289   : > { %5091 = vrot.lane.b32.xlu1 %v9015_v49, %s9961_s26 }
0x12df   : > { %v4390_v15 = vpop.xlane.xlu0 %4389 }
0x12e0   : > { %v4408_v5 = vsub.f32 %v4273_v37, %v4390_v15 }
0x12e2   : > { %v4418_v57 = vmul.f32 1.442695, %v4408_v5 }
0x12e3   : > { %v4384_v20 = vpop.xlane.xlu0 %4383 }
0x12e4   : > { %v4406_v43 = vsub.f32 %v4222_v40, %v4384_v20 }
0x12e5   : > { %v4387_v58 = vpop.xlane.xlu1 %4386 }
0x12e6   : > { %v4414_v39 = vmul.f32 1.442695, %v4406_v43  ;;  %v4407_v26 = vsub.f32 %v4225_v51, %v4387_v58 }
0x12e7   : > { %v4393_v44 = vpop.xlane.xlu0 %4392 }
0x12e8   : > { %v4416_v11 = vmul.f32 1.442695, %v4407_v26  ;;  %v4409_v35 = vsub.f32 %v4276_v50, %v4393_v44  ;;  %7822 = vpow2.f32 %v4414_v39 }
0x12e9   : > { %v4402_v30 = vpop.xlane.xlu1 %4401 }
0x12ea   : > { %7824 = vpow2.f32 %v4416_v11  ;;  %v4420_v62 = vmul.f32 1.442695, %v4409_v35  ;;  %v4412_v36 = vsub.f32 %v4375_v61, %v4402_v30 }
0x12eb   : > { %7826 = vpow2.f32 %v4418_v57  ;;  %v4405_v1 = vpop.xlane.xlu0 %4404 }
0x12ec   : > { %7828 = vpow2.f32 %v4420_v62  ;;  %v4426_v29 = vmul.f32 1.442695, %v4412_v36  ;;  %v4413_v56 = vsub.f32 %v4378_v55, %v4405_v1 }
0x12ed   : > { %v4396_v37 = vpop.xlane.xlu1 %4395 }
0x12ee   : > { %v4428_v7 = vmul.f32 1.442695, %v4413_v56  ;;  %v4410_v40 = vsub.f32 %v4324_v48, %v4396_v37  ;;  %7830 = vpow2.f32 %v4426_v29 }
0x12ef   : > { %v4399_v59 = vpop.xlane.xlu0 %4398 }
0x12f0   : > { %7832 = vpow2.f32 %v4428_v7  ;;  %v4422_v51 = vmul.f32 1.442695, %v4410_v40  ;;  %v4411_v9 = vsub.f32 %v4327_v17, %v4399_v59 }
0x12f1   : > { %v4716_v43 = vpop.permute.xlu1 %4715 }
0x12f2   : > { %v4424_v15 = vmul.f32 1.442695, %v4411_v9  ;;  %v9203_v50 = vpop.eup %7822  ;;  %7834 = vpow2.f32 %v4422_v51 }
0x12f3   : > { %v4665_v39 = vpop.permute.xlu0 %4664 }
0x12f4   : > { %v9205_v5 = vpop.eup %7824  ;;  %7836 = vpow2.f32 %v4424_v15  ;;  %v4670_v30 = vsel %vm893_vm5, %v4665_v39, 0 }
0x12f5   : > { %v9207_v61 = vpop.eup %7826  ;;  %v4462_v55 = vpack.c.bf16 %v9205_v5, %v9203_v50  ;;  %v4767_v44 = vpop.permute.xlu1 %4766 }
0x12f6   : > { %v9211_v20 = vpop.eup %7828  ;;  %v4772_v1 = vsel %vm893_vm5, %v4767_v44, 0 }
0x12f7   : > { %7313 = vmatmul.mubr.msk.bf16.vlgmr.msra.gmra.mrb[120].mxu0 %vm612_vm3, %v4462_v55  ;;  %v4463_v48 = vpack.c.bf16 %v9211_v20, %v9207_v61  ;;  %v4663_v35 = vpop.permute.xlu0 %4662 }
0x12f8   : > { %7323 = vmatpush3.bf16.msra.mxu0 %v4561_v13  ;;  %7324 = vmatprep.mubr.msk.bf16.mxu0 %vm7975_vm2, %v9935_v14  ;;  %v9218_v17 = vpop.eup %7830 }
0x12f9   : > { %7319 = vmatmul.mubr.msk.bf16.vlgmr.msra.gmra.mrb[120].mxu1 %vm612_vm3, %v4463_v48  ;;  %7334 = vmatprep.subr.bf16.mxu0 %v9935_v14  ;;  %v4818_v62 = vpop.permute.xlu1 %4817 }
0x12fa   : > { %v9222_v58 = vpop.eup %7832  ;;  %7329 = vmatpush3.bf16.msra.mxu1 %v4608_v46  ;;  %7330 = vmatprep.mubr.msk.bf16.mxu1 %vm7975_vm2, %v9935_v14  ;;  %v4721_v46 = vsel %vm893_vm5, %v4716_v43, 0  ;;  %v4823_v29 = vsel %vm893_vm5, %v4818_v62, 0 }
0x12fb   : > { %v4465_v13 = vpack.c.bf16 %v9222_v58, %v9218_v17  ;;  %7340 = vmatprep.subr.bf16.mxu1 %v9935_v14  ;;  %v4714_v36 = vpop.permute.xlu0 %4713 }
0x12fc   : > { %v9229_v26 = vpop.eup %7834 }
0x12fd   : > { %v4816_v56 = vpop.permute.xlu1 %4815 }
0x12fe   : > { %v9231_v57 = vpop.eup %7836 }
0x12ff   : > { %v4464_v11 = vpack.c.bf16 %v9231_v57, %v9229_v26  ;;  %v4765_v37 = vpop.permute.xlu0 %4764 }
0x1301   : > { %7325 = vmatmul.mubr.msk.bf16.vlgmr.msra.gmra.mrb[124].mxu0 %vm612_vm3, %v4464_v11  ;;  %7331 = vmatmul.mubr.msk.bf16.vlgmr.msra.gmra.mrb[124].mxu1 %vm612_vm3, %v4465_v13  ;;  %v4951_v7 = vpop.permute.xlu1 %4950 }
0x1302   : > { %7335 = vmatpush3.bf16.xpose.msra.mxu0 %v4670_v30  ;;  %7336 = vmatprep.mubr.msk.bf16.mxu0 %vm7975_vm2, %v9935_v14 }
0x1303   : > { %7341 = vmatpush3.bf16.xpose.msra.mxu1 %v4721_v46  ;;  %7342 = vmatprep.mubr.msk.bf16.mxu1 %vm7975_vm2, %v9935_v14  ;;  %v4998_v40 = vpop.permute.xlu0 %4997 }
0x1304   : > { %7346 = vmatprep.subr.bf16.mxu0 %v9935_v14  ;;  %7352 = vmatprep.subr.bf16.mxu1 %v9935_v14 }
0x1309   : > { %7337 = vmatmul.mubr.msk.bf16.vlgmr.msra.gmra.mrb[128].mxu0 %vm893_vm5, %v4663_v35 }
0x130a   : > { %7343 = vmatmul.mubr.msk.bf16.vlgmr.msra.gmra.mrb[128].mxu1 %vm893_vm5, %v4714_v36  ;;  %7347 = vmatpush3.bf16.xpose.msra.mxu0 %v4772_v1 }
0x130b   : > { %7353 = vmatpush3.bf16.xpose.msra.mxu1 %v4823_v29  ;;  %7348 = vmatprep.mubr.msk.bf16.mxu0 %vm7975_vm2, %v9935_v14 }
0x130c   : > { %7354 = vmatprep.mubr.msk.bf16.mxu1 %vm7975_vm2, %v9935_v14  ;;  %7358 = vmatprep.subr.bf16.mxu0 %v9935_v14 }
0x130d   : > { %7364 = vmatprep.subr.bf16.mxu1 %v9935_v14 }
0x1311   : > { %7349 = vmatmul.mubr.msk.bf16.vlgmr.msra.gmra.mrb[132].mxu0 %vm893_vm5, %v4765_v37 }
0x1312   : > { %7355 = vmatmul.mubr.msk.bf16.vlgmr.msra.gmra.mrb[132].mxu1 %vm893_vm5, %v4816_v56  ;;  %7359 = vmatpush3.bf16.msra.mxu0 %v4951_v7 }
0x1313   : > { %7365 = vmatpush3.bf16.msra.mxu1 %v4998_v40  ;;  %7360 = vmatprep.mubr.msk.bf16.mxu0 %vm7975_vm2, %v9935_v14 }
0x1314   : > { %7370 = vmatprep.subr.bf16.mxu0 %v9935_v14  ;;  %7366 = vmatprep.mubr.msk.bf16.mxu1 %vm7975_vm2, %v9935_v14 }
0x1315   : > { %7376 = vmatprep.subr.bf16.mxu1 %v9935_v14 }
0x13ca   : > { %v9263_v59 = vpop.f32.mrb[120].mxu0 }
0x13cb   : > { %v7314_v51 = vpop.f32.mrb[121].mxu0 }
0x13cc   : > { %v9265_v9 = vpop.f32.mrb[122].mxu0  ;;  %v9267_v15 = vpop.f32.mrb[120].mxu1 }
0x13cd   : > { %v7315_v55 = vpop.f32.mrb[123].mxu0  ;;  %v7320_v48 = vpop.f32.mrb[121].mxu1 }
0x13ce   : > { %v9269_v43 = vpop.f32.mrb[122].mxu1 }
0x13cf   : > { %v7321_v39 = vpop.f32.mrb[123].mxu1 }
0x13d4   : > { %v9271_v13 = vpop.f32.mrb[124].mxu0  ;;  %v9273_v44 = vpop.f32.mrb[124].mxu1 }
0x13d5   : > { %v7326_v11 = vpop.f32.mrb[125].mxu0  ;;  %v7332_v35 = vpop.f32.mrb[125].mxu1 }
0x13d6   : > { %v9275_v30 = vpop.f32.mrb[126].mxu0  ;;  %v9277_v46 = vpop.f32.mrb[126].mxu1 }
0x13d7   : > { %v7327_v62 = vpop.f32.mrb[127].mxu0  ;;  %v7333_v36 = vpop.f32.mrb[127].mxu1 }
0x13dc   : > { %v4706_v1 = vpop.f32.mrb[128].mxu0 }
0x13dd   : > { %v4757_v29 = vpop.f32.mrb[128].mxu1  ;;  %v7338_v56 = vpop.f32.mrb[129].mxu0  ;;  %v4866_v11 = vsel %vm612_vm3, %v4706_v1, -inf }
0x13de   : > { %v7344_v37 = vpop.f32.mrb[129].mxu1  ;;  %v4709_v7 = vpop.f32.mrb[130].mxu0  ;;  %v4872_v40 = vsel %vm612_vm3, %v4757_v29, -inf }
0x13df   : > { %4873 = vmax.xlane.f32.xlu0 %v4872_v40  ;;  %v4760_v51 = vpop.f32.mrb[130].mxu1  ;;  %v7339_v55 = vpop.f32.mrb[131].mxu0  ;;  %v4869_v48 = vsel %vm612_vm3, %v4709_v7, -inf }
0x13e0   : > { %v7345_v39 = vpop.f32.mrb[131].mxu1  ;;  %4870 = vmax.xlane.f32.xlu1 %v4869_v48  ;;  %v4875_v56 = vsel %vm612_vm3, %v4760_v51, -inf }
0x13e3   : > { %4867 = vmax.xlane.f32.xlu0 %v4866_v11 }
0x13e4   : > { %v4808_v35 = vpop.f32.mrb[132].mxu0 }
0x13e5   : > { %v4859_v62 = vpop.f32.mrb[132].mxu1  ;;  %v7350_v36 = vpop.f32.mrb[133].mxu0  ;;  %v4878_v39 = vsel %vm612_vm3, %v4808_v35, -inf }
0x13e6   : > { %v7356_v41 = vpop.f32.mrb[133].mxu1  ;;  %v4811_v37 = vpop.f32.mrb[134].mxu0  ;;  %v4884_v25 = vsel %vm612_vm3, %v4859_v62, -inf }
0x13e7   : > { %4876 = vmax.xlane.f32.xlu0 %v4875_v56  ;;  %4885 = vmax.xlane.f32.xlu1 %v4884_v25  ;;  %v4862_v40 = vpop.f32.mrb[134].mxu1  ;;  %v7351_v55 = vpop.f32.mrb[135].mxu0  ;;  %v4881_v11 = vsel %vm612_vm3, %v4811_v37, -inf }
0x13e8   : > { %v7357_v10 = vpop.f32.mrb[135].mxu1  ;;  %v4887_v48 = vsel %vm612_vm3, %v4862_v40, -inf }
0x13e9   : > { %v5045_v10 = vpop.permute.xlu1 %5044 }
0x13eb   : > { %4879 = vmax.xlane.f32.xlu1 %v4878_v39  ;;  %4888 = vmax.xlane.f32.xlu0 %v4887_v48 }
0x13ed   : > { %v5092_v25 = vpop.permute.xlu1 %5091 }
0x13ef   : > { %4882 = vmax.xlane.f32.xlu0 %v4881_v11 }
0x13fc   : > { %5199 = vrot.lane.b32.xlu1 %v9005_v3, %s9962_s27 }
0x1400   : > { %5250 = vrot.lane.b32.xlu1 %v9017_v4, %s9962_s27 }
0x1404   : > { %5301 = vrot.lane.b32.xlu1 %v9015_v49, %s9962_s27 }
0x1405   : > { %5148 = vrot.lane.b32.xlu0 %v9007_v47, %s9962_s27  ;;  %s497_s27 = scalar_lea.vmem %s9881_s15, %s6585_s17 }
0x1408   : > { %5299 = vrot.lane.b32.xlu1 %v9015_v49, %s9963_s28 }
0x1409   : > { %5146 = vrot.lane.b32.xlu0 %v9007_v47, %s9963_s28 }
0x140c   : > { %5434 = vrot.lane.b32.xlu1 %v9007_v47, %s9964_s29 }
0x140d   : > { %5197 = vrot.lane.b32.xlu0 %v9005_v3, %s9963_s28 }
0x1411   : > { %5248 = vrot.lane.b32.xlu0 %v9017_v4, %s9963_s28 }
0x146c   : > { %v4874_v41 = vpop.xlane.xlu0 %4873 }
0x146d   : > { %v4871_v36 = vpop.xlane.xlu1 %4870  ;;  %v4892_v55 = vsub.f32 %v4757_v29, %v4874_v41 }
0x146e   : > { %v4891_v56 = vsub.f32 %v4709_v7, %v4871_v36 }
0x146f   : > { %v4902_v19 = vmul.f32 1.442695, %v4892_v55 }
0x1470   : > { %v4900_v39 = vmul.f32 1.442695, %v4891_v56  ;;  %v4868_v48 = vpop.xlane.xlu0 %4867 }
0x1471   : > { %v4890_v11 = vsub.f32 %v4706_v1, %v4868_v48 }
0x1472   : > { %7838 = vpow2.f32 %v4900_v39 }
0x1473   : > { %v4898_v38 = vmul.f32 1.442695, %v4890_v11 }
0x1474   : > { %v4877_v33 = vpop.xlane.xlu0 %4876  ;;  %v4886_v47 = vpop.xlane.xlu1 %4885 }
0x1475   : > { %7840 = vpow2.f32 %v4898_v38  ;;  %v4893_v42 = vsub.f32 %v4760_v51, %v4877_v33  ;;  %v4896_v63 = vsub.f32 %v4859_v62, %v4886_v47 }
0x1476   : > { %7842 = vpow2.f32 %v4902_v19 }
0x1477   : > { %v4904_v12 = vmul.f32 1.442695, %v4893_v42  ;;  %v4910_v32 = vmul.f32 1.442695, %v4896_v63 }
0x1478   : > { %v4889_v45 = vpop.xlane.xlu0 %4888  ;;  %v4880_v27 = vpop.xlane.xlu1 %4879 }
0x1479   : > { %7844 = vpow2.f32 %v4904_v12  ;;  %v4897_v23 = vsub.f32 %v4862_v40, %v4889_v45  ;;  %v4894_v7 = vsub.f32 %v4808_v35, %v4880_v27 }
0x147a   : > { %7846 = vpow2.f32 %v4910_v32 }
0x147b   : > { %v4912_v29 = vmul.f32 1.442695, %v4897_v23  ;;  %v4906_v41 = vmul.f32 1.442695, %v4894_v7 }
0x147c   : > { %v4883_v1 = vpop.xlane.xlu0 %4882  ;;  %v9305_v56 = vpop.eup %7838 }
0x147d   : > { %7848 = vpow2.f32 %v4912_v29  ;;  %v4895_v36 = vsub.f32 %v4811_v37, %v4883_v1  ;;  %v5200_v23 = vpop.permute.xlu1 %5199 }
0x147e   : > { %7850 = vpow2.f32 %v4906_v41 }
0x147f   : > { %v9307_v55 = vpop.eup %7840  ;;  %v4908_v38 = vmul.f32 1.442695, %v4895_v36 }
0x1480   : > { %v4946_v19 = vpack.c.bf16 %v9305_v56, %v9307_v55  ;;  %v9311_v63 = vpop.eup %7842  ;;  %v5149_v51 = vpop.permute.xlu0 %5148 }
0x1481   : > { %7852 = vpow2.f32 %v4908_v38  ;;  %v5251_v62 = vpop.permute.xlu1 %5250  ;;  %v5154_v40 = vsel %vm893_vm5, %v5149_v51, 0 }
0x1482   : > { %7361 = vmatmul.mubr.msk.bf16.vlgmr.msra.gmra.mrb[136].mxu0 %vm612_vm3, %v4946_v19  ;;  %v5256_v48 = vsel %vm893_vm5, %v5251_v62, 0 }
0x1483   : > { %v9314_v27 = vpop.eup %7844  ;;  %7371 = vmatpush3.bf16.msra.mxu0 %v5045_v10  ;;  %7372 = vmatprep.mubr.msk.bf16.mxu0 %vm7975_vm2, %v9935_v14  ;;  %v5205_v10 = vsel %vm893_vm5, %v5200_v23, 0 }
0x1484   : > { %v4947_v32 = vpack.c.bf16 %v9314_v27, %v9311_v63  ;;  %7382 = vmatprep.subr.bf16.mxu0 %v9935_v14  ;;  %v9321_v45 = vpop.eup %7846 }
0x1485   : > { %v5302_v39 = vpop.permute.xlu1 %5301 }
0x1486   : > { %7367 = vmatmul.mubr.msk.bf16.vlgmr.msra.gmra.mrb[136].mxu1 %vm612_vm3, %v4947_v32  ;;  %v5307_v47 = vsel %vm893_vm5, %v5302_v39, 0 }
0x1487   : > { %v9324_v33 = vpop.eup %7848  ;;  %7377 = vmatpush3.bf16.msra.mxu1 %v5092_v25  ;;  %7378 = vmatprep.mubr.msk.bf16.mxu1 %vm7975_vm2, %v9935_v14  ;;  %v5147_v25 = vpop.permute.xlu0 %5146 }
0x1488   : > { %v4949_v12 = vpack.c.bf16 %v9324_v33, %v9321_v45  ;;  %7388 = vmatprep.subr.bf16.mxu1 %v9935_v14  ;;  %v9331_v42 = vpop.eup %7850 }
0x1489   : > { %v5300_v7 = vpop.permute.xlu1 %5299 }
0x148b   : > { %v9333_v35 = vpop.eup %7852  ;;  %v5198_v11 = vpop.permute.xlu0 %5197 }
0x148c   : > { %v4948_v37 = vpack.c.bf16 %v9333_v35, %v9331_v42 }
0x148d   : > { %v5435_v41 = vpop.permute.xlu1 %5434 }
0x148e   : > { %7373 = vmatmul.mubr.msk.bf16.vlgmr.msra.gmra.mrb[140].mxu0 %vm612_vm3, %v4948_v37  ;;  %7379 = vmatmul.mubr.msk.bf16.vlgmr.msra.gmra.mrb[140].mxu1 %vm612_vm3, %v4949_v12 }
0x148f   : > { %7383 = vmatpush3.bf16.xpose.msra.mxu0 %v5154_v40  ;;  %7384 = vmatprep.mubr.msk.bf16.mxu0 %vm7975_vm2, %v9935_v14  ;;  %v5249_v29 = vpop.permute.xlu0 %5248 }
0x1490   : > { %7389 = vmatpush3.bf16.xpose.msra.mxu1 %v5205_v10  ;;  %7390 = vmatprep.mubr.msk.bf16.mxu1 %vm7975_vm2, %v9935_v14 }
0x1491   : > { %7394 = vmatprep.subr.bf16.mxu0 %v9935_v14  ;;  %7400 = vmatprep.subr.bf16.mxu1 %v9935_v14 }
0x1496   : > { %7385 = vmatmul.mubr.msk.bf16.vlgmr.msra.gmra.mrb[144].mxu0 %vm893_vm5, %v5147_v25 }
0x1497   : > { %7391 = vmatmul.mubr.msk.bf16.vlgmr.msra.gmra.mrb[144].mxu1 %vm893_vm5, %v5198_v11  ;;  %7395 = vmatpush3.bf16.xpose.msra.mxu0 %v5256_v48 }
0x1498   : > { %7401 = vmatpush3.bf16.xpose.msra.mxu1 %v5307_v47  ;;  %7396 = vmatprep.mubr.msk.bf16.mxu0 %vm7975_vm2, %v9935_v14 }
0x1499   : > { %7402 = vmatprep.mubr.msk.bf16.mxu1 %vm7975_vm2, %v9935_v14  ;;  %7406 = vmatprep.subr.bf16.mxu0 %v9935_v14 }
0x149a   : > { %7412 = vmatprep.subr.bf16.mxu1 %v9935_v14 }
0x149e   : > { %7397 = vmatmul.mubr.msk.bf16.vlgmr.msra.gmra.mrb[148].mxu0 %vm893_vm5, %v5249_v29 }
0x149f   : > { %7403 = vmatmul.mubr.msk.bf16.vlgmr.msra.gmra.mrb[148].mxu1 %vm893_vm5, %v5300_v7  ;;  %7407 = vmatpush3.bf16.msra.mxu0 %v5435_v41 }
0x14a0   : > { %7408 = vmatprep.mubr.msk.bf16.mxu0 %vm7975_vm2, %v9935_v14  ;;  %7418 = vmatprep.subr.bf16.mxu0 %v9935_v14 }
0x14a1   : > { %7414 = vmatprep.mubr.msk.bf16.mxu1 %vm7975_vm2, %v9935_v14 }
0x1555   : > { %v9364_v1 = vpop.f32.mrb[136].mxu0 }
0x1556   : > { %v7362_v36 = vpop.f32.mrb[137].mxu0 }
0x1557   : > { %v9366_v38 = vpop.f32.mrb[138].mxu0 }
0x1558   : > { %v7363_v19 = vpop.f32.mrb[139].mxu0 }
0x1559   : > { %v9368_v32 = vpop.f32.mrb[136].mxu1 }
0x155a   : > { %v7368_v23 = vpop.f32.mrb[137].mxu1 }
0x155b   : > { %v9370_v12 = vpop.f32.mrb[138].mxu1 }
0x155c   : > { %v7369_v51 = vpop.f32.mrb[139].mxu1 }
0x1561   : > { %v9372_v62 = vpop.f32.mrb[140].mxu0  ;;  %v9374_v37 = vpop.f32.mrb[140].mxu1 }
0x1562   : > { %v7374_v40 = vpop.f32.mrb[141].mxu0  ;;  %v7380_v10 = vpop.f32.mrb[141].mxu1 }
0x1563   : > { %v9376_v25 = vpop.f32.mrb[142].mxu0  ;;  %v9378_v39 = vpop.f32.mrb[142].mxu1 }
0x1564   : > { %v7375_v48 = vpop.f32.mrb[143].mxu0  ;;  %v7381_v11 = vpop.f32.mrb[143].mxu1 }
0x1569   : > { %v9380_v47 = vpop.f32.mrb[144].mxu0 }
0x156a   : > { %v9382_v7 = vpop.f32.mrb[144].mxu1  ;;  %v7386_v29 = vpop.f32.mrb[145].mxu0  ;;  %v5350_v48 = vsel %vm612_vm3, %v9380_v47, -inf }
0x156b   : > { %v7392_v41 = vpop.f32.mrb[145].mxu1  ;;  %v9384_v36 = vpop.f32.mrb[146].mxu0  ;;  %v5356_v19 = vsel %vm612_vm3, %v9382_v7, -inf }
0x156c   : > { %5357 = vmax.xlane.f32.xlu0 %v5356_v19  ;;  %v9388_v23 = vpop.f32.mrb[146].mxu1  ;;  %v7387_v51 = vpop.f32.mrb[147].mxu0  ;;  %v5353_v40 = vsel %vm612_vm3, %v9384_v36, -inf }
0x156d   : > { %v7393_v10 = vpop.f32.mrb[147].mxu1  ;;  %5354 = vmax.xlane.f32.xlu1 %v5353_v40  ;;  %v5359_v19 = vsel %vm612_vm3, %v9388_v23, -inf }
0x1570   : > { %5351 = vmax.xlane.f32.xlu0 %v5350_v48 }
0x1571   : > { %v9394_v11 = vpop.f32.mrb[148].mxu0 }
0x1572   : > { %v9396_v29 = vpop.f32.mrb[148].mxu1  ;;  %v7398_v41 = vpop.f32.mrb[149].mxu0  ;;  %v5362_v2 = vsel %vm612_vm3, %v9394_v11, -inf }
0x1573   : > { %v7404_v52 = vpop.f32.mrb[149].mxu1  ;;  %v9400_v8 = vpop.f32.mrb[150].mxu0  ;;  %v5368_v51 = vsel %vm612_vm3, %v9396_v29, -inf }
0x1574   : > { %5360 = vmax.xlane.f32.xlu0 %v5359_v19  ;;  %5369 = vmax.xlane.f32.xlu1 %v5368_v51  ;;  %v9404_v40 = vpop.f32.mrb[150].mxu1  ;;  %v7399_v10 = vpop.f32.mrb[151].mxu0  ;;  %v5365_v41 = vsel %vm612_vm3, %v9400_v8, -inf  ;;  %v4433_v19 = vsel %vm612_vm3, %v9205_v5, 0.0  ;;  %v4914_v51 = vsel %vm612_vm3, %v9307_v55, 0.0  ;;  %v4917_v5 = vsel %vm612_vm3, %v9305_v56, 0.0 }
0x1575   : > { %v7405_v48 = vpop.f32.mrb[151].mxu1  ;;  %v5371_v52 = vsel %vm612_vm3, %v9404_v40, -inf  ;;  %v4923_v55 = vsel %vm612_vm3, %v9314_v27, 0.0 }
0x1578   : > { %5363 = vmax.xlane.f32.xlu1 %v5362_v2  ;;  %5372 = vmax.xlane.f32.xlu0 %v5371_v52  ;;  %v4430_v2 = vsel %vm612_vm3, %v9203_v50, 0.0  ;;  %v4442_v50 = vsel %vm612_vm3, %v9229_v26, 0.0  ;;  %v4451_v26 = vsel %vm612_vm3, %v9222_v58, 0.0 }
0x157c   : > { %5366 = vmax.xlane.f32.xlu0 %v5365_v41 }
0x1589   : > { %5528 = vrot.lane.b32.xlu1 %v9017_v4, %s9964_s29  ;;  %v4436_v4 = vsel %vm612_vm3, %v9207_v61, 0.0  ;;  %v4448_v61 = vsel %vm612_vm3, %v9218_v17, 0.0  ;;  %v4929_v17 = vsel %vm612_vm3, %v9333_v35, 0.0 }
0x158d   : > { %5575 = vrot.lane.b32.xlu1 %v9015_v49, %s9964_s29  ;;  %v4920_v49 = vsel %vm612_vm3, %v9311_v63, 0.0  ;;  %v4445_v63 = vsel %vm612_vm3, %v9231_v57, 0.0 }
0x1592   : > { %5481 = vrot.lane.b32.xlu0 %v9005_v3, %s9964_s29  ;;  %v4439_v3 = vsel %vm612_vm3, %v9211_v20, 0.0  ;;  %v4926_v20 = vsel %vm612_vm3, %v9331_v42, 0.0 }
0x15b1   : > { %4434 = vadd.xlane.f32.xlu1 %v4433_v19  ;;  %4431 = vadd.xlane.f32.xlu0 %v4430_v2 }
0x15b5   : > { %4915 = vadd.xlane.f32.xlu1 %v4914_v51  ;;  %4437 = vadd.xlane.f32.xlu0 %v4436_v4 }
0x15b9   : > { %4921 = vadd.xlane.f32.xlu1 %v4920_v49  ;;  %4440 = vadd.xlane.f32.xlu0 %v4439_v3 }
0x15bd   : > { %4443 = vadd.xlane.f32.xlu1 %v4442_v50  ;;  %4918 = vadd.xlane.f32.xlu0 %v4917_v5 }
0x15c1   : > { %4449 = vadd.xlane.f32.xlu1 %v4448_v61  ;;  %4924 = vadd.xlane.f32.xlu0 %v4923_v55 }
0x15c5   : > { %4927 = vadd.xlane.f32.xlu1 %v4926_v20  ;;  %4446 = vadd.xlane.f32.xlu0 %v4445_v63 }
0x15c9   : > { %4452 = vadd.xlane.f32.xlu0 %v4451_v26 }
0x15cd   : > { %4930 = vadd.xlane.f32.xlu0 %v4929_v17 }
0x15f9   : > { %v5358_v56 = vpop.xlane.xlu0 %5357 }
0x15fa   : > { %v5376_v27 = vsub.f32 %v9382_v7, %v5358_v56  ;;  %v5355_v10 = vpop.xlane.xlu1 %5354 }
0x15fb   : > { %v5375_v48 = vsub.f32 %v9384_v36, %v5355_v10 }
0x15fc   : > { %v5386_v42 = vmul.f32 1.442695, %v5376_v27 }
0x15fd   : > { %v5384_v52 = vmul.f32 1.442695, %v5375_v48  ;;  %v5352_v41 = vpop.xlane.xlu0 %5351 }
0x15fe   : > { %7854 = vpow2.f32 %v5386_v42  ;;  %v5374_v57 = vsub.f32 %v9380_v47, %v5352_v41 }
0x15ff   : > { %7856 = vpow2.f32 %v5384_v52 }
0x1600   : > { %v5382_v19 = vmul.f32 1.442695, %v5374_v57 }
0x1601   : > { %v5361_v58 = vpop.xlane.xlu0 %5360  ;;  %v5370_v2 = vpop.xlane.xlu1 %5369 }
0x1602   : > { %7858 = vpow2.f32 %v5382_v19  ;;  %v5377_v35 = vsub.f32 %v9388_v23, %v5361_v58  ;;  %v5380_v51 = vsub.f32 %v9396_v29, %v5370_v2 }
0x1604   : > { %v5388_v4 = vmul.f32 1.442695, %v5377_v35  ;;  %v5394_v7 = vmul.f32 1.442695, %v5380_v51  ;;  %v4935_v35 = vsel %vm612_vm3, %v9324_v33, 0.0  ;;  %v3952_v33 = vsel %vm612_vm3, %v9099_v31, 0.0 }
0x1605   : > { %v5373_v49 = vpop.xlane.xlu0 %5372  ;;  %v5364_v3 = vpop.xlane.xlu1 %5363  ;;  %v3961_v31 = vsel %vm612_vm3, %v9125_v18, 0.0 }
0x1606   : > { %7860 = vpow2.f32 %v5388_v4  ;;  %v5381_v36 = vsub.f32 %v9404_v40, %v5373_v49  ;;  %v5378_v50 = vsub.f32 %v9394_v11, %v5364_v3  ;;  %v3946_v49 = vsel %vm612_vm3, %v9095_v28, 0.0 }
0x1607   : > { %7862 = vpow2.f32 %v5394_v7  ;;  %v3964_v28 = vsel %vm612_vm3, %v9115_v34, 0.0 }
0x1608   : > { %v7855_v5 = vpop.eup %7854  ;;  %v5396_v47 = vmul.f32 1.442695, %v5381_v36  ;;  %v5390_v61 = vmul.f32 1.442695, %v5378_v50  ;;  %v3949_v36 = vsel %vm612_vm3, %v9093_v6, 0.0  ;;  %v3958_v50 = vsel %vm612_vm3, %v9121_v21, 0.0 }
0x1609   : > { %v5367_v55 = vpop.xlane.xlu0 %5366  ;;  %v5404_v20 = vsel %vm612_vm3, %v7855_v5, 0.0  ;;  %v7857_v29 = vpop.eup %7856  ;;  %v3967_v6 = vsel %vm612_vm3, %v9117_v60, 0.0 }
0x160a   : > { %7864 = vpow2.f32 %v5396_v47  ;;  %v5379_v23 = vsub.f32 %v9400_v8, %v5367_v55  ;;  %5405 = vadd.xlane.f32.xlu1 %v5404_v20  ;;  %v5529_v17 = vpop.permute.xlu1 %5528  ;;  %v4932_v8 = vsel %vm612_vm3, %v9321_v45, 0.0  ;;  %v5401_v19 = vsel %vm612_vm3, %v7857_v29, 0.0 }
0x160b   : > { %7866 = vpow2.f32 %v5390_v61 }
0x160c   : > { %v7859_v63 = vpop.eup %7858  ;;  %v5392_v26 = vmul.f32 1.442695, %v5379_v23 }
0x160d   : > { %v5482_v56 = vpop.permute.xlu0 %5481  ;;  %v5398_v40 = vsel %vm612_vm3, %v7859_v63, 0.0  ;;  %v5430_v11 = vpack.c.bf16 %v7857_v29, %v7859_v63 }
0x160e   : > { %7868 = vpow2.f32 %v5392_v26  ;;  %5399 = vadd.xlane.f32.xlu1 %v5398_v40  ;;  %7413 = vmatpush3.bf16.msra.mxu1 %v5482_v56  ;;  %v5576_v52 = vpop.permute.xlu1 %5575 }
0x160f   : > { %7409 = vmatmul.mubr.msk.bf16.vlgmr.msra.gmra.mrb[152].mxu0 %vm612_vm3, %v5430_v11  ;;  %7424 = vmatprep.subr.bf16.mxu1 %v9935_v14 }
0x1610   : > { %v7861_v27 = vpop.eup %7860  ;;  %7419 = vmatpush3.bf16.msra.mxu0 %v5529_v17  ;;  %7420 = vmatprep.mubr.msk.bf16.mxu0 %vm7975_vm2, %v9935_v14 }
0x1611   : > { %v5407_v10 = vsel %vm612_vm3, %v7861_v27, 0.0  ;;  %v5431_v48 = vpack.c.bf16 %v7861_v27, %v7855_v5  ;;  %v7863_v42 = vpop.eup %7862  ;;  %v3955_v5 = vsel %vm612_vm3, %v9102_v53, 0.0 }
0x1612   : > { %4933 = vadd.xlane.f32.xlu1 %v4932_v8  ;;  %5408 = vadd.xlane.f32.xlu0 %v5407_v10  ;;  %v5416_v4 = vsel %vm612_vm3, %v7863_v42, 0.0 }
0x1613   : > { %7415 = vmatmul.mubr.msk.bf16.vlgmr.msra.gmra.mrb[152].mxu1 %vm612_vm3, %v5431_v48 }
0x1614   : > { %v7865_v41 = vpop.eup %7864  ;;  %7425 = vmatpush3.bf16.msra.mxu1 %v5576_v52  ;;  %7426 = vmatprep.mubr.msk.bf16.mxu1 %vm7975_vm2, %v9935_v14 }
0x1615   : > { %v7867_v57 = vpop.eup %7866  ;;  %v5433_v58 = vpack.c.bf16 %v7865_v41, %v7863_v42  ;;  %v5419_v3 = vsel %vm612_vm3, %v7865_v41, 0.0 }
0x1616   : > { %5402 = vadd.xlane.f32.xlu0 %v5401_v19  ;;  %v5410_v45 = vsel %vm612_vm3, %v7867_v57, 0.0 }
0x1617   : > { %5411 = vadd.xlane.f32.xlu1 %v5410_v45 }
0x1618   : > { %v7869_v2 = vpop.eup %7868 }
0x1619   : > { %v5432_v51 = vpack.c.bf16 %v7869_v2, %v7867_v57  ;;  %v5413_v7 = vsel %vm612_vm3, %v7869_v2, 0.0 }
0x161a   : > { %4936 = vadd.xlane.f32.xlu0 %v4935_v35 }
0x161b   : > { %5417 = vadd.xlane.f32.xlu1 %v5416_v4  ;;  %7421 = vmatmul.mubr.msk.bf16.vlgmr.msra.gmra.mrb[156].mxu0 %vm612_vm3, %v5432_v51 }
0x161c   : > { %7427 = vmatmul.mubr.msk.bf16.vlgmr.msra.gmra.mrb[156].mxu1 %vm612_vm3, %v5433_v58 }
0x161e   : > { %5414 = vadd.xlane.f32.xlu0 %v5413_v7 }
0x161f   : > { %3947 = vadd.xlane.f32.xlu1 %v3946_v49 }
0x1622   : > { %5420 = vadd.xlane.f32.xlu0 %v5419_v3 }
0x1623   : > { %3953 = vadd.xlane.f32.xlu1 %v3952_v33 }
0x1626   : > { %3950 = vadd.xlane.f32.xlu0 %v3949_v36 }
0x1627   : > { %3959 = vadd.xlane.f32.xlu1 %v3958_v50 }
0x162a   : > { %3956 = vadd.xlane.f32.xlu0 %v3955_v5 }
0x162b   : > { %3965 = vadd.xlane.f32.xlu1 %v3964_v28 }
0x162e   : > { %3962 = vadd.xlane.f32.xlu0 %v3961_v31 }
0x1632   : > { %3968 = vadd.xlane.f32.xlu0 %v3967_v6 }
0x163e   : > { %v4432_v47 = vpop.xlane.xlu0 %4431  ;;  %v4435_v61 = vpop.xlane.xlu1 %4434 }
0x163f   : > { %7870 = vrcp.f32 %v4432_v47 }
0x1640   : > { %7872 = vrcp.f32 %v4435_v61 }
0x1642   : > { %v4438_v21 = vpop.xlane.xlu0 %4437  ;;  %v4916_v55 = vpop.xlane.xlu1 %4915 }
0x1643   : > { %7874 = vrcp.f32 %v4438_v21 }
0x1646   : > { %v4441_v53 = vpop.xlane.xlu0 %4440  ;;  %v4922_v20 = vpop.xlane.xlu1 %4921 }
0x1647   : > { %7876 = vrcp.f32 %v4441_v53 }
0x1648   : > { %7878 = vrcp.f32 %v4916_v55 }
0x1649   : > { %v7871_v34 = vpop.eup %7870 }
0x164a   : > { %v7873_v23 = vpop.eup %7872  ;;  %v4919_v29 = vpop.xlane.xlu0 %4918  ;;  %v4654_v63 = vmul.f32 %v7871_v34, %v9263_v59 }
0x164b   : > { %v4444_v18 = vpop.xlane.xlu1 %4443  ;;  %7880 = vrcp.f32 %v4919_v29  ;;  %v4655_v60 = vmul.f32 %v7873_v23, %v9265_v9  ;;  %v7637_v23 = vld [vmem:[%s9872_s6 + $0x18] sm:$0xff]  }
0x164c   : > { %7882 = vrcp.f32 %v4922_v20 }
0x164d   : > { %v7563_v26 = vpack.i.bf16 %v4655_v60, %v4654_v63  ;;  %v7875_v56 = vpop.eup %7874 }
0x164e   : > { %v4925_v17 = vpop.xlane.xlu0 %4924  ;;  %v4656_v8 = vmul.f32 %v7875_v56, %v9267_v15 }
0x164f   : > { %7884 = vrcp.f32 %v4925_v17  ;;  %7564 = vrot.lane.b32.xlu1 %v7563_v26, %s9965_s30  ;;  %v4450_v40 = vpop.xlane.xlu1 %4449 }
0x1650   : > { %7886 = vrcp.f32 %v4444_v18 }
0x1651   : > { %v7877_v11 = vpop.eup %7876 }
0x1652   : > { %v4447_v27 = vpop.xlane.xlu0 %4446  ;;  %v4657_v10 = vmul.f32 %v7877_v11, %v9269_v43  ;;  %v7879_v48 = vpop.eup %7878 }
0x1653   : > { %7888 = vrcp.f32 %v4447_v27  ;;  %v4928_v9 = vpop.xlane.xlu1 %4927  ;;  %v5138_v41 = vmul.f32 %v7879_v48, %v9364_v1 }
0x1654   : > { %v7568_v59 = vpack.i.bf16 %v4657_v10, %v4656_v8  ;;  %7890 = vrcp.f32 %v4450_v40 }
0x1655   : > { %v7881_v42 = vpop.eup %7880 }
0x1656   : > { %v4453_v52 = vpop.xlane.xlu0 %4452  ;;  %7569 = vrot.lane.b32.xlu0 %v7568_v59, %s9965_s30  ;;  %v5139_v57 = vmul.f32 %v7881_v42, %v9366_v38  ;;  %v7883_v19 = vpop.eup %7882 }
0x1657   : > { %7892 = vrcp.f32 %v4453_v52  ;;  %v5140_v43 = vmul.f32 %v7883_v19, %v9368_v32 }
0x1658   : > { %v7573_v58 = vpack.i.bf16 %v5139_v57, %v5138_v41  ;;  %7894 = vrcp.f32 %v4928_v9 }
0x1659   : > { %v7885_v45 = vpop.eup %7884 }
0x165a   : > { %v4931_v15 = vpop.xlane.xlu0 %4930  ;;  %7574 = vrot.lane.b32.xlu1 %v7573_v58, %s9966_s16  ;;  %v5141_v2 = vmul.f32 %v7885_v45, %v9370_v12  ;;  %v7887_v35 = vpop.eup %7886 }
0x165b   : > { %7896 = vrcp.f32 %v4931_v15  ;;  %v4658_v1 = vmul.f32 %v7887_v35, %v9271_v13 }
0x165c   : > { %v7578_v51 = vpack.i.bf16 %v5141_v2, %v5140_v43 }
0x165d   : > { %v7889_v4 = vpop.eup %7888 }
0x165e   : > { %7579 = vrot.lane.b32.xlu1 %v7578_v51, %s9966_s16  ;;  %v4659_v38 = vmul.f32 %v7889_v4, %v9275_v30  ;;  %v7891_v7 = vpop.eup %7890 }
0x165f   : > { %v4660_v33 = vmul.f32 %v7891_v7, %v9273_v44 }
0x1660   : > { %v7583_v49 = vpack.i.bf16 %v4659_v38, %v4658_v1 }
0x1661   : > { %v7893_v3 = vpop.eup %7892 }
0x1662   : > { %7584 = vrot.lane.b32.xlu0 %v7583_v49, %s9965_s30  ;;  %v4661_v32 = vmul.f32 %v7893_v3, %v9277_v46  ;;  %v7895_v12 = vpop.eup %7894 }
0x1663   : > { %v5142_v5 = vmul.f32 %v7895_v12, %v9372_v62 }
0x1664   : > { %v7588_v36 = vpack.i.bf16 %v4661_v32, %v4660_v33 }
0x1665   : > { %v7897_v50 = vpop.eup %7896 }
0x1666   : > { %7589 = vrot.lane.b32.xlu1 %v7588_v36, %s9965_s30  ;;  %v5143_v13 = vmul.f32 %v7897_v50, %v9376_v25  ;;  %v7636_v25 = vld [vmem:[%s9872_s6 + $0x10] sm:$0xff]  }
0x1667   : > { %7430 = vmatprep.subr.bf16.mxu0 %v7636_v25 }
0x1668   : > { %v7603_v28 = vpack.i.bf16 %v5143_v13, %v5142_v5  ;;  %7431 = vmatpush3.bf16.msra.mxu0 %v7636_v25 }
0x1669   : > { %7432 = vmatprep.subr.bf16.mxu0 %v7637_v23 }
0x166c   : > { %7433 = vmatpush3.bf16.msra.mxu0 %v7637_v23 }
0x1697   : > { %v5406_v30 = vpop.xlane.xlu1 %5405 }
0x169b   : > { %v5400_v31 = vpop.xlane.xlu1 %5399 }
0x169f   : > { %v5409_v6 = vpop.xlane.xlu0 %5408  ;;  %v4934_v47 = vpop.xlane.xlu1 %4933 }
0x16a0   : > { %7898 = vrcp.f32 %v4934_v47 }
0x16a3   : > { %v5403_v61 = vpop.xlane.xlu0 %5402 }
0x16a4   : > { %v5412_v62 = vpop.xlane.xlu1 %5411 }
0x16a7   : > { %v4937_v21 = vpop.xlane.xlu0 %4936 }
0x16a8   : > { %7900 = vrcp.f32 %v4937_v21 }
0x16a9   : > { %7902 = vrcp.f32 %v5400_v31 }
0x16aa   : > { %v7899_v44 = vpop.eup %7898  ;;  %7904 = vrcp.f32 %v5403_v61 }
0x16ab   : > { %v5144_v55 = vmul.f32 %v7899_v44, %v9374_v37  ;;  %7906 = vrcp.f32 %v5406_v30  ;;  %v5415_v34 = vpop.xlane.xlu0 %5414  ;;  %v5418_v37 = vpop.xlane.xlu1 %5417 }
0x16ac   : > { %7908 = vrcp.f32 %v5409_v6 }
0x16ad   : > { %7910 = vrcp.f32 %v5412_v62 }
0x16ae   : > { %7912 = vrcp.f32 %v5418_v37 }
0x16af   : > { %v5421_v60 = vpop.xlane.xlu0 %5420  ;;  %7914 = vrcp.f32 %v5415_v34  ;;  %v3948_v36 = vpop.xlane.xlu1 %3947 }
0x16b0   : > { %7916 = vrcp.f32 %v5421_v60 }
0x16b1   : > { %7918 = vrcp.f32 %v3948_v36 }
0x16b2   : > { %v7901_v46 = vpop.eup %7900 }
0x16b3   : > { %v5145_v53 = vmul.f32 %v7901_v46, %v9378_v39  ;;  %v7903_v39 = vpop.eup %7902  ;;  %v3954_v50 = vpop.xlane.xlu1 %3953 }
0x16b4   : > { %v7905_v63 = vpop.eup %7904  ;;  %v3951_v5 = vpop.xlane.xlu0 %3950 }
0x16b5   : > { %v7608_v20 = vpack.i.bf16 %v5145_v53, %v5144_v55  ;;  %v7907_v27 = vpop.eup %7906  ;;  %7920 = vrcp.f32 %v3951_v5 }
0x16b6   : > { %v7909_v48 = vpop.eup %7908  ;;  %7922 = vrcp.f32 %v3954_v50 }
0x16b7   : > { %v7911_v57 = vpop.eup %7910  ;;  %v3960_v13 = vpop.xlane.xlu1 %3959 }
0x16b8   : > { %v7913_v58 = vpop.eup %7912 }
0x16b9   : > { %v7915_v43 = vpop.eup %7914 }
0x16ba   : > { %v7917_v51 = vpop.eup %7916 }
0x16bb   : > { %v3966_v30 = vpop.xlane.xlu1 %3965  ;;  %v7919_v44 = vpop.eup %7918 }
0x16bc   : > { %v4170_v25 = vmul.f32 %v7919_v44, %v9155_v0 }
0x16bf   : > { %v7921_v46 = vpop.eup %7920 }
0x16c0   : > { %v4171_v34 = vmul.f32 %v7921_v46, %v9157_v22 }
0x16c1   : > { %v7565_v6 = vpop.permute.xlu1 %7564 }
0x16c2   : > { %v7567_v55 = vunpack.i.h.bf16 %v7565_v6  ;;  %v7566_v53 = vunpack.i.l.bf16 %v7565_v6 }
0x16cc   : > { %v7575_v61 = vpop.permute.xlu1 %7574 }
0x16cd   : > { %v7577_v23 = vunpack.i.h.bf16 %v7575_v61  ;;  %v7576_v37 = vunpack.i.l.bf16 %v7575_v61 }
0x16e2   : > { %v5474_v29 = vpop.f32.mrb[152].mxu0 }
0x16e3   : > { %v7410_v18 = vpop.f32.mrb[153].mxu0  ;;  %v5622_v17 = vmul.f32 %v7903_v39, %v5474_v29  ;;  %v7923_v29 = vpop.eup %7922 }
0x16e4   : > { %v5477_v26 = vpop.f32.mrb[154].mxu0  ;;  %v5727_v18 = vsel %vm893_vm5, %v4171_v34, %v7567_v55 }
0x16e5   : > { %v5623_v56 = vmul.f32 %v7905_v63, %v5477_v26  ;;  %v7411_v40 = vpop.f32.mrb[155].mxu0  ;;  %v5726_v63 = vsel %vm893_vm5, %v4170_v25, %v7566_v53  ;;  %v5735_v0 = vsel %vm612_vm3, %v5727_v18, %v7577_v23 }
0x16e6   : > { %v5521_v11 = vpop.f32.mrb[152].mxu1 }
0x16e7   : > { %v7598_v8 = vpack.i.bf16 %v5623_v56, %v5622_v17  ;;  %v7416_v10 = vpop.f32.mrb[153].mxu1  ;;  %v5624_v42 = vmul.f32 %v7907_v27, %v5521_v11  ;;  %v5734_v27 = vsel %vm612_vm3, %v5726_v63, %v7576_v37 }
0x16e8   : > { %v5524_v59 = vpop.f32.mrb[154].mxu1 }
0x16e9   : > { %v5625_v9 = vmul.f32 %v7909_v48, %v5524_v59  ;;  %v7417_v52 = vpop.f32.mrb[155].mxu1  ;;  %7599 = vrot.lane.b32.xlu0 %v7598_v8, %s9967_s21  ;;  %v4172_v48 = vmul.f32 %v7923_v29, %v9159_v16 }
0x16eb   : > { %v7593_v41 = vpack.i.bf16 %v5625_v9, %v5624_v42 }
0x16ed   : > { %7594 = vrot.lane.b32.xlu1 %v7593_v41, %s9967_s21  ;;  %7604 = vrot.lane.b32.xlu0 %v7603_v28, %s9966_s16  ;;  %v3957_v28 = vpop.xlane.xlu0 %3956 }
0x16ee   : > { %v5568_v19 = vpop.f32.mrb[156].mxu0  ;;  %7924 = vrcp.f32 %v3957_v28 }
0x16ef   : > { %v5615_v45 = vpop.f32.mrb[156].mxu1  ;;  %v7422_v15 = vpop.f32.mrb[157].mxu0  ;;  %v5626_v4 = vmul.f32 %v7911_v57, %v5568_v19  ;;  %7926 = vrcp.f32 %v3960_v13  ;;  %v9969_v13 = vld [vmem:[#allocation9_spill] sm:$0xff] }
0x16f0   : > { %v7428_v2 = vpop.f32.mrb[157].mxu1  ;;  %v5571_v35 = vpop.f32.mrb[158].mxu0  ;;  %v5628_v49 = vmul.f32 %v7913_v58, %v5615_v45  ;;  %7928 = vrcp.f32 %v3966_v30  ;;  %v9970_v30 = vld [vmem:[#allocation7_spill] sm:$0xff] }
0x16f1   : > { %v5627_v1 = vmul.f32 %v7915_v43, %v5571_v35  ;;  %v5618_v38 = vpop.f32.mrb[158].mxu1  ;;  %v7423_v7 = vpop.f32.mrb[159].mxu0  ;;  %7609 = vrot.lane.b32.xlu1 %v7608_v20, %s9966_s16 }
0x16f2   : > { %v5629_v3 = vmul.f32 %v7917_v51, %v5618_v38  ;;  %v7429_v33 = vpop.f32.mrb[159].mxu1  ;;  %v3963_v31 = vpop.xlane.xlu0 %3962 }
0x16f3   : > { %v7613_v32 = vpack.i.bf16 %v5627_v1, %v5626_v4  ;;  %v7580_v20 = vpop.permute.xlu1 %7579  ;;  %7930 = vrcp.f32 %v3963_v31 }
0x16f4   : > { %v7618_v12 = vpack.i.bf16 %v5629_v3, %v5628_v49  ;;  %v7582_v8 = vunpack.i.h.bf16 %v7580_v20  ;;  %v7581_v22 = vunpack.i.l.bf16 %v7580_v20 }
0x16f5   : > { %7614 = vrot.lane.b32.xlu0 %v7613_v32, %s9967_s21 }
0x16f6   : > { %7619 = vrot.lane.b32.xlu1 %v7618_v12, %s9967_s21  ;;  %v3969_v47 = vpop.xlane.xlu0 %3968  ;;  %v9968_v12 = vld [vmem:[#allocation13_spill] sm:$0xff] }
0x16f7   : > { %7932 = vrcp.f32 %v3969_v47  ;;  %v7590_v60 = vpop.permute.xlu1 %7589 }
0x16f8   : > { %v7925_v39 = vpop.eup %7924  ;;  %v7592_v3 = vunpack.i.h.bf16 %v7590_v60  ;;  %v7591_v33 = vunpack.i.l.bf16 %v7590_v60 }
0x16f9   : > { %v4173_v10 = vmul.f32 %v7925_v39, %v9161_v54  ;;  %v7927_v41 = vpop.eup %7926 }
0x16fa   : > { %v7570_v21 = vpop.permute.xlu0 %7569  ;;  %v7929_v15 = vpop.eup %7928  ;;  %v4174_v36 = vmul.f32 %v7927_v41, %v9968_v12 }
0x16fb   : > { %v7572_v17 = vunpack.i.h.bf16 %v7570_v21  ;;  %v7571_v56 = vunpack.i.l.bf16 %v7570_v21  ;;  %v4176_v28 = vmul.f32 %v7929_v15, %v9969_v13  ;;  %v9974_v15 = vld [vmem:[#allocation11_spill] sm:$0xff]  ;;  %v9976_v13 = vld [vmem:[#allocation6_spill] sm:$0xff] }
0x16fd   : > { %v5729_v57 = vsel %vm893_vm5, %v4173_v10, %v7572_v17  ;;  %v5728_v19 = vsel %vm893_vm5, %v4172_v48, %v7571_v56  ;;  %v7931_v16 = vpop.eup %7930  ;;  %v6708_v56 = vld [vmem:[%s9873_s7 + $0x1] ss:$0 sm:$0xff] }
0x16fe   : > { %v7585_v62 = vpop.permute.xlu0 %7584  ;;  %v5737_v43 = vsel %vm612_vm3, %v5729_v57, %v7582_v8  ;;  %v5736_v54 = vsel %vm612_vm3, %v5728_v19, %v7581_v22  ;;  %v4175_v32 = vmul.f32 %v7931_v16, %v9169_v24  ;;  %v5732_v24 = vsel %vm893_vm5, %v4176_v28, %v7591_v33  ;;  %v9971_v22 = vld [vmem:[#allocation2_spill] sm:$0xff]  ;;  %v9973_v19 = vld [vmem:[#allocation4_spill] sm:$0xff] }
0x16ff   : > { %v7587_v1 = vunpack.i.h.bf16 %v7585_v62  ;;  %v7586_v38 = vunpack.i.l.bf16 %v7585_v62 }
0x1701   : > { %v7933_v4 = vpop.eup %7932  ;;  %v5731_v61 = vsel %vm893_vm5, %v4175_v32, %v7587_v1  ;;  %v5730_v21 = vsel %vm893_vm5, %v4174_v36, %v7586_v38 }
0x1702   : > { %v4177_v31 = vmul.f32 %v7933_v4, %v9970_v30 }
0x1704   : > { %v5733_v46 = vsel %vm893_vm5, %v4177_v31, %v7592_v3  ;;  %v9975_v3 = vld [vmem:[#allocation8_spill] sm:$0xff]  ;;  %v9977_v31 = vld [vmem:[#allocation5_spill] sm:$0xff] }
0x175b   : > { %v7600_v26 = vpop.permute.xlu0 %7599 }
0x175c   : > { %v7602_v40 = vunpack.i.h.bf16 %v7600_v26  ;;  %v7601_v11 = vunpack.i.l.bf16 %v7600_v26 }
0x175e   : > { %v5742_v59 = vsel %vm2935_vm6, %v5734_v27, %v7601_v11  ;;  %v5743_v42 = vsel %vm2935_vm6, %v5735_v0, %v7602_v40 }
0x175f   : > { %v5750_v9 = vpack.c.bf16 %v5743_v42, %v5742_v59  ;;  %v7595_v52 = vpop.permute.xlu1 %7594  ;;  %v7605_v2 = vpop.permute.xlu0 %7604  ;;  %v9972_v42 = vld [vmem:[#allocation12_spill] sm:$0xff] }
0x1760   : > { %v7597_v58 = vunpack.i.h.bf16 %v7595_v52  ;;  %v7596_v45 = vunpack.i.l.bf16 %v7595_v52  ;;  %v7607_v50 = vunpack.i.h.bf16 %v7605_v2  ;;  %v7606_v5 = vunpack.i.l.bf16 %v7605_v2 }
0x1761   : > { %7434 = vmatprep.mubr.msk.bf16.mxu0 %vm808_vm4, %v5750_v9 }
0x1762   : > { %v5744_v35 = vsel %vm2935_vm6, %v5736_v54, %v7596_v45  ;;  %v5745_v51 = vsel %vm2935_vm6, %v5737_v43, %v7597_v58  ;;  %v5739_v62 = vsel %vm612_vm3, %v5731_v61, %v7607_v50  ;;  %v5738_v25 = vsel %vm612_vm3, %v5730_v21, %v7606_v5 }
0x1763   : > { %v5751_v7 = vpack.c.bf16 %v5745_v51, %v5744_v35  ;;  %v7610_v49 = vpop.permute.xlu1 %7609 }
0x1764   : > { %v7612_v6 = vunpack.i.h.bf16 %v7610_v49  ;;  %v7611_v47 = vunpack.i.l.bf16 %v7610_v49 }
0x1765   : > { %7435 = vmatmul.mubr.msk.bf16.vlgmr.msra.gmra.mrb[160].mxu0 %vm808_vm4, %v5751_v7 }
0x1766   : > { %v5740_v37 = vsel %vm612_vm3, %v5732_v24, %v7611_v47  ;;  %v5741_v29 = vsel %vm612_vm3, %v5733_v46, %v7612_v6  ;;  %v9978_v46 = vld [vmem:[#allocation3_spill] sm:$0xff] }
0x1767   : > { %v7615_v44 = vpop.permute.xlu0 %7614 }
0x1768   : > { %v7617_v55 = vunpack.i.h.bf16 %v7615_v44  ;;  %v7616_v53 = vunpack.i.l.bf16 %v7615_v44  ;;  %v7620_v20 = vpop.permute.xlu1 %7619 }
0x1769   : > { %v7622_v34 = vunpack.i.h.bf16 %v7620_v20  ;;  %v7621_v23 = vunpack.i.l.bf16 %v7620_v20 }
0x176a   : > { %v5747_v39 = vsel %vm2935_vm6, %v5739_v62, %v7617_v55  ;;  %v5746_v18 = vsel %vm2935_vm6, %v5738_v25, %v7616_v53 }
0x176b   : > { %v5752_v63 = vpack.c.bf16 %v5747_v39, %v5746_v18  ;;  %v5748_v60 = vsel %vm2935_vm6, %v5740_v37, %v7621_v23  ;;  %v5749_v26 = vsel %vm2935_vm6, %v5741_v29, %v7622_v34  ;;  %v7638_v39 = vld [vmem:[%s9874_s8 + $0x10] sm:$0xff]   ;;  %v7639_v18 = vld [vmem:[%s9874_s8 + $0x18] sm:$0xff]  }
0x176c   : > { %v5753_v17 = vpack.c.bf16 %v5749_v26, %v5748_v60  ;;  %7442 = vmatprep.subr.bf16.mxu1 %v7638_v39  ;;  %v7641_v60 = vld [vmem:[%s9876_s10 + $0x28] sm:$0xff]  }
0x176d   : > { %7438 = vmatprep.mubr.msk.bf16.mxu0 %vm808_vm4, %v5752_v63  ;;  %7443 = vmatpush3.bf16.msra.mxu1 %v7638_v39  ;;  %v7640_v63 = vld [vmem:[%s9876_s10 + $0x20] sm:$0xff]  }
0x176e   : > { %7439 = vmatmul.mubr.msk.bf16.gmra.mrb[164].mxu0 %vm808_vm4, %v5753_v17  ;;  %7444 = vmatprep.subr.bf16.mxu1 %v7639_v18 }
0x176f   : > { %7454 = vmatprep.subr.bf16.mxu0 %v7640_v63 }
0x1770   : > { %7455 = vmatpush3.bf16.msra.mxu0 %v7640_v63 }
0x1771   : > { %7445 = vmatpush3.bf16.msra.mxu1 %v7639_v18  ;;  %7456 = vmatprep.subr.bf16.mxu0 %v7641_v60 }
0x1772   : > { %7470 = vmatprep.subr.bf16.mxu1 %v9935_v14 }
0x1774   : > { %7457 = vmatpush3.bf16.msra.mxu0 %v7641_v60 }
0x1838   : > { %v7436_v40 = vpop.f32.mrb[160].mxu0 }
0x1839   : > { %v5834_v11 = vadd.f32 %v7436_v40, %v6708_v56  ;;  %v5825_v27 = vpop.f32.mrb[161].mxu0 }
0x183a   : > { %v5826_v0 = vadd.f32 %v6708_v56, %v5825_v27  ;;  %v7437_v8 = vpop.f32.mrb[162].mxu0 }
0x183b   : > { %v9565_v10 = vadd.f32 %v5834_v11, %v9971_v22  ;;  %v5828_v48 = vpop.f32.mrb[163].mxu0  ;;  %v5837_v52 = vadd.f32 %v7437_v8, %v6708_v56 }
0x183c   : > { %v5829_v59 = vadd.f32 %v6708_v56, %v5828_v48  ;;  %v9568_v9 = vadd.f32 %v5826_v0, %v9972_v42 }
0x183d   : > { %v5870_v41 = vsel %vm808_vm4, %v9565_v10, 0.0  ;;  %v5898_v57 = vmul.f32 %v9565_v10, %v9565_v10  ;;  %v9579_v43 = vadd.f32 %v5837_v52, %v9974_v15 }
0x183e   : > { %5871 = vadd.xlane.f32.xlu0 %v5870_v41  ;;  %v9575_v58 = vadd.f32 %v5829_v59, %v9973_v19  ;;  %v5864_v16 = vsel %vm808_vm4, %v9568_v9, 0.0  ;;  %v5896_v1 = vmul.f32 %v9568_v9, %v9568_v9 }
0x183f   : > { %v5910_v45 = vsel %vm808_vm4, %v5898_v57, 0.0  ;;  %v5873_v7 = vsel %vm808_vm4, %v9579_v43, 0.0  ;;  %v5899_v49 = vmul.f32 %v9579_v43, %v9579_v43 }
0x1840   : > { %5911 = vadd.xlane.f32.xlu1 %v5910_v45  ;;  %v5867_v4 = vsel %vm808_vm4, %v9575_v58, 0.0  ;;  %v5904_v12 = vsel %vm808_vm4, %v5896_v1, 0.0  ;;  %v5897_v5 = vmul.f32 %v9575_v58, %v9575_v58 }
0x1841   : > { %v7440_v54 = vpop.f32.mrb[164].mxu0  ;;  %v5913_v50 = vsel %vm808_vm4, %v5899_v49, 0.0 }
0x1842   : > { %v5841_v2 = vpop.f32.mrb[165].mxu0  ;;  %5865 = vadd.xlane.f32.xlu0 %v5864_v16  ;;  %v5850_v35 = vadd.f32 %v7440_v54, %v6708_v56  ;;  %v5907_v61 = vsel %vm808_vm4, %v5897_v5, 0.0 }
0x1843   : > { %v7441_v51 = vpop.f32.mrb[166].mxu0  ;;  %v5842_v32 = vadd.f32 %v6708_v56, %v5841_v2 }
0x1844   : > { %v5844_v38 = vpop.f32.mrb[167].mxu0  ;;  %5868 = vadd.xlane.f32.xlu1 %v5867_v4  ;;  %v9592_v33 = vadd.f32 %v5850_v35, %v9975_v3  ;;  %v5853_v36 = vadd.f32 %v7441_v51, %v6708_v56 }
0x1845   : > { %v9599_v28 = vadd.f32 %v5842_v32, %v9976_v13  ;;  %v5845_v47 = vadd.f32 %v6708_v56, %v5844_v38 }
0x1846   : > { %5874 = vadd.xlane.f32.xlu0 %v5873_v7  ;;  %v5882_v30 = vsel %vm808_vm4, %v9592_v33, 0.0  ;;  %v9604_v6 = vadd.f32 %v5853_v36, %v9977_v31  ;;  %v5902_v20 = vmul.f32 %v9592_v33, %v9592_v33 }
0x1847   : > { %v5876_v21 = vsel %vm808_vm4, %v9599_v28, 0.0  ;;  %v5900_v44 = vmul.f32 %v9599_v28, %v9599_v28  ;;  %v9612_v24 = vadd.f32 %v5845_v47, %v9978_v46 }
0x1848   : > { %5905 = vadd.xlane.f32.xlu1 %v5904_v12  ;;  %v5885_v55 = vsel %vm808_vm4, %v9604_v6, 0.0  ;;  %v5922_v34 = vsel %vm808_vm4, %v5902_v20, 0.0  ;;  %v5903_v37 = vmul.f32 %v9604_v6, %v9604_v6 }
0x1849   : > { %v5916_v53 = vsel %vm808_vm4, %v5900_v44, 0.0  ;;  %v5879_v62 = vsel %vm808_vm4, %v9612_v24, 0.0  ;;  %v5901_v25 = vmul.f32 %v9612_v24, %v9612_v24 }
0x184a   : > { %5914 = vadd.xlane.f32.xlu0 %v5913_v50  ;;  %v5925_v29 = vsel %vm808_vm4, %v5903_v37, 0.0 }
0x184b   : > { %v5919_v23 = vsel %vm808_vm4, %v5901_v25, 0.0 }
0x184c   : > { %5883 = vadd.xlane.f32.xlu1 %v5882_v30 }
0x184e   : > { %5908 = vadd.xlane.f32.xlu0 %v5907_v61 }
0x1850   : > { %5877 = vadd.xlane.f32.xlu1 %v5876_v21 }
0x1852   : > { %5886 = vadd.xlane.f32.xlu0 %v5885_v55 }
0x1854   : > { %5917 = vadd.xlane.f32.xlu1 %v5916_v53 }
0x1856   : > { %5880 = vadd.xlane.f32.xlu0 %v5879_v62 }
0x1858   : > { %5923 = vadd.xlane.f32.xlu1 %v5922_v34 }
0x185a   : > { %5920 = vadd.xlane.f32.xlu0 %v5919_v23 }
0x185e   : > { %5926 = vadd.xlane.f32.xlu0 %v5925_v29  ;;  %v9654_v29 = vld [vmem:[%s9878_s12 + $0x4] sm:$0xf] }
0x18cb   : > { %v5872_v26 = vpop.xlane.xlu0 %5871 }
0x18cc   : > { %v9641_v17 = vmul.f32 0.03125, %v5872_v26 }
0x18cd   : > { %v5912_v56 = vpop.xlane.xlu1 %5911 }
0x18ce   : > { %v5938_v11 = vmul.f32 %v9641_v17, %v9641_v17  ;;  %v5930_v27 = vmul.f32 0.03125, %v5912_v56  ;;  %v5954_v60 = vsub.f32 %v9565_v10, %v9641_v17 }
0x18cf   : > { %v5866_v40 = vpop.xlane.xlu0 %5865 }
0x18d0   : > { %v5888_v8 = vmul.f32 0.03125, %v5866_v40  ;;  %v5946_v48 = vsub.f32 %v5930_v27, %v5938_v11 }
0x18d1   : > { %v5869_v0 = vpop.xlane.xlu1 %5868 }
0x18d2   : > { %v5936_v52 = vmul.f32 %v5888_v8, %v5888_v8  ;;  %v5962_v19 = vadd.f32 1e-05, %v5946_v48  ;;  %v5889_v16 = vmul.f32 0.03125, %v5869_v0  ;;  %v5952_v62 = vsub.f32 %v9568_v9, %v5888_v8  ;;  %v9979_v0 = vld [vmem:[#allocation10_spill] sm:$0xff] }
0x18d3   : > { %v5875_v22 = vpop.xlane.xlu0 %5874  ;;  %v9980_v8 = vsub.s32 0, %v9979_v0 }
0x18d4   : > { %v5891_v59 = vmul.f32 0.03125, %v5875_v22  ;;  %7934 = vrsqrt.f32 %v5962_v19  ;;  %v5937_v38 = vmul.f32 %v5889_v16, %v5889_v16  ;;  %v5953_v11 = vsub.f32 %v9575_v58, %v5889_v16 }
0x18d5   : > { %v5906_v42 = vpop.xlane.xlu1 %5905  ;;  %v5987_v22 = vrot.slane %v9654_v29, %v9980_v8  ;;  %v9981_v19 = vsub.s32 1, %v9979_v0 }
0x18d6   : > { %v5928_v41 = vmul.f32 0.03125, %v5906_v42  ;;  %v5939_v45 = vmul.f32 %v5891_v59, %v5891_v59  ;;  %v5955_v25 = vsub.f32 %v9579_v43, %v5891_v59 }
0x18d7   : > { %v5915_v57 = vpop.xlane.xlu0 %5914 }
0x18d8   : > { %v5944_v15 = vsub.f32 %v5928_v41, %v5936_v52  ;;  %v5931_v54 = vmul.f32 0.03125, %v5915_v57 }
0x18d9   : > { %v5884_v2 = vpop.xlane.xlu1 %5883 }
0x18da   : > { %v5960_v35 = vadd.f32 1e-05, %v5944_v15  ;;  %v5947_v51 = vsub.f32 %v5931_v54, %v5939_v45  ;;  %v9645_v5 = vmul.f32 0.03125, %v5884_v2  ;;  %v5999_v45 = vrot.slane %v9654_v29, %v9981_v19 }
0x18db   : > { %v5909_v4 = vpop.xlane.xlu0 %5908 }
0x18dc   : > { %v5963_v1 = vadd.f32 1e-05, %v5947_v51  ;;  %7936 = vrsqrt.f32 %v5960_v35  ;;  %v5929_v7 = vmul.f32 0.03125, %v5909_v4  ;;  %v5942_v46 = vmul.f32 %v9645_v5, %v9645_v5 }
0x18dd   : > { %v5878_v49 = vpop.xlane.xlu1 %5877 }
0x18de   : > { %7938 = vrsqrt.f32 %v5963_v1  ;;  %v5892_v3 = vmul.f32 0.03125, %v5878_v49  ;;  %v5945_v32 = vsub.f32 %v5929_v7, %v5937_v38  ;;  %v7935_v44 = vpop.eup %7934 }
0x18df   : > { %v5887_v12 = vpop.xlane.xlu0 %5886  ;;  %v5978_v43 = vmul.f32 %v7935_v44, %v5954_v60 }
0x18e0   : > { %v5961_v36 = vadd.f32 1e-05, %v5945_v32  ;;  %v5940_v13 = vmul.f32 %v5892_v3, %v5892_v3  ;;  %v5895_v34 = vmul.f32 0.03125, %v5887_v12  ;;  %v5956_v4 = vsub.f32 %v9599_v28, %v5892_v3 }
0x18e1   : > { %v5918_v50 = vpop.xlane.xlu1 %5917  ;;  %v5990_v58 = vmul.f32 %v5987_v22, %v5978_v43  ;;  %v5958_v12 = vsub.f32 %v9592_v33, %v9645_v5 }
0x18e2   : > { %v5932_v30 = vmul.f32 0.03125, %v5918_v50  ;;  %7940 = vrsqrt.f32 %v5961_v36  ;;  %v5943_v48 = vmul.f32 %v5895_v34, %v5895_v34 }
0x18e3   : > { %v5881_v31 = vpop.xlane.xlu0 %5880  ;;  %v9672_v1 = vadd.f32 %v5999_v45, %v5990_v58 }
0x18e4   : > { %v5948_v47 = vsub.f32 %v5932_v30, %v5940_v13  ;;  %v5893_v61 = vmul.f32 0.03125, %v5881_v31  ;;  %v5959_v30 = vsub.f32 %v9604_v6, %v5895_v34 }
0x18e5   : > { %v5924_v21 = vpop.xlane.xlu1 %5923 }
0x18e6   : > { %v5964_v55 = vadd.f32 1e-05, %v5948_v47  ;;  %v5934_v53 = vmul.f32 0.03125, %v5924_v21  ;;  %v7937_v20 = vpop.eup %7936  ;;  %v5941_v39 = vmul.f32 %v5893_v61, %v5893_v61  ;;  %v5957_v36 = vsub.f32 %v9612_v24, %v5893_v61 }
0x18e7   : > { %v5921_v23 = vpop.xlane.xlu0 %5920  ;;  %v5976_v40 = vmul.f32 %v7937_v20, %v5952_v62  ;;  %v7643_v20 = vld [vmem:[%s9876_s10 + $0x38] sm:$0xff]   ;;  %v6720_v62 = vld [vmem:[%s9875_s9 + $0x1] ss:$0 sm:$0xff] }
0x18e8   : > { %v7939_v37 = vpop.eup %7938  ;;  %7942 = vrsqrt.f32 %v5964_v55  ;;  %v5950_v18 = vsub.f32 %v5934_v53, %v5942_v46  ;;  %v5933_v63 = vmul.f32 0.03125, %v5921_v23  ;;  %v7642_v53 = vld [vmem:[%s9876_s10 + $0x30] sm:$0xff]  }
0x18e9   : > { %v5979_v26 = vmul.f32 %v7939_v37, %v5955_v25  ;;  %v5988_v57 = vmul.f32 %v5987_v22, %v5976_v40  ;;  %7458 = vmatprep.subr.bf16.mxu0 %v7642_v53 }
0x18ea   : > { %v5966_v56 = vadd.f32 1e-05, %v5950_v18  ;;  %v5949_v9 = vsub.f32 %v5933_v63, %v5941_v39  ;;  %7459 = vmatpush3.bf16.msra.mxu0 %v7642_v53 }
0x18eb   : > { %v5927_v27 = vpop.xlane.xlu0 %5926  ;;  %v5991_v41 = vmul.f32 %v5987_v22, %v5979_v26  ;;  %v9667_v35 = vadd.f32 %v5999_v45, %v5988_v57  ;;  %7460 = vmatprep.subr.bf16.mxu0 %v7643_v20 }
0x18ec   : > { %7944 = vrsqrt.f32 %v5966_v56  ;;  %v5965_v59 = vadd.f32 1e-05, %v5949_v9  ;;  %v5935_v42 = vmul.f32 0.03125, %v5927_v27  ;;  %v7941_v52 = vpop.eup %7940 }
0x18ed   : > { %v5977_v17 = vmul.f32 %v7941_v52, %v5953_v11  ;;  %v9665_v16 = vadd.f32 %v5999_v45, %v5991_v41 }
0x18ee   : > { %7946 = vrsqrt.f32 %v5965_v59  ;;  %v5951_v10 = vsub.f32 %v5935_v42, %v5943_v48  ;;  %7461 = vmatpush3.bf16.msra.mxu0 %v7643_v20 }
0x18ef   : > { %v5989_v54 = vmul.f32 %v5987_v22, %v5977_v17  ;;  %v6009_v7 = vpack.c.bf16 %v9665_v16, %v9672_v1 }
0x18f0   : > { %v5967_v15 = vadd.f32 1e-05, %v5951_v10 }
0x18f1   : > { %v9669_v51 = vadd.f32 %v5999_v45, %v5989_v54 }
0x18f2   : > { %v7943_v2 = vpop.eup %7942  ;;  %7948 = vrsqrt.f32 %v5967_v15  ;;  %v6736_v15 = vld [vmem:[%s9877_s11 + $0x1] ss:$0 sm:$0xff] }
0x18f3   : > { %v6008_v38 = vpack.c.bf16 %v9669_v51, %v9667_v35  ;;  %v5980_v49 = vmul.f32 %v7943_v2, %v5956_v4 }
0x18f5   : > { %7446 = vmatprep.mubr.msk.bf16.mxu1 %vm808_vm4, %v6008_v38  ;;  %v5992_v50 = vmul.f32 %v5987_v22, %v5980_v49 }
0x18f6   : > { %v7945_v32 = vpop.eup %7944  ;;  %7447 = vmatmul.mubr.msk.bf16.vlgmr.msra.gmra.mrb[160].mxu1 %vm808_vm4, %v6009_v7 }
0x18f7   : > { %v5982_v13 = vmul.f32 %v7945_v32, %v5958_v12  ;;  %v9684_v21 = vadd.f32 %v5999_v45, %v5992_v50 }
0x18f8   : > { %v7947_v28 = vpop.eup %7946 }
0x18f9   : > { %v5981_v3 = vmul.f32 %v7947_v28, %v5957_v36  ;;  %v5994_v55 = vmul.f32 %v5987_v22, %v5982_v13 }
0x18fb   : > { %v5993_v31 = vmul.f32 %v5987_v22, %v5981_v3  ;;  %v9691_v5 = vadd.f32 %v5999_v45, %v5994_v55 }
0x18fc   : > { %v7949_v47 = vpop.eup %7948 }
0x18fd   : > { %v9686_v44 = vadd.f32 %v5999_v45, %v5993_v31  ;;  %v5983_v46 = vmul.f32 %v7949_v47, %v5959_v30 }
0x18ff   : > { %v6010_v33 = vpack.c.bf16 %v9686_v44, %v9684_v21  ;;  %v5995_v24 = vmul.f32 %v5987_v22, %v5983_v46 }
0x1901   : > { %7450 = vmatprep.mubr.msk.bf16.mxu1 %vm808_vm4, %v6010_v33  ;;  %v9693_v61 = vadd.f32 %v5999_v45, %v5995_v24 }
0x1903   : > { %v6011_v6 = vpack.c.bf16 %v9693_v61, %v9691_v5 }
0x1905   : > { %7451 = vmatmul.mubr.msk.bf16.gmra.mrb[164].mxu1 %vm808_vm4, %v6011_v6 }
0x1906   : > { %7474 = vmatprep.mubr.msk.bf16.mxu1 %vm7975_vm2, %v9935_v14 }
0x19c9   : > { %v7448_v25 = vpop.f32.mrb[160].mxu1 }
0x19ca   : > { %v6092_v34 = vadd.f32 %v7448_v25, %v6720_v62  ;;  %v6083_v23 = vpop.f32.mrb[161].mxu1 }
0x19cb   : > { %v6084_v37 = vadd.f32 %v6720_v62, %v6083_v23  ;;  %v7449_v39 = vpop.f32.mrb[162].mxu1 }
0x19cc   : > { %v6095_v18 = vadd.f32 %v7449_v39, %v6720_v62  ;;  %v6086_v63 = vpop.f32.mrb[163].mxu1  ;;  %v6116_v26 = vmax.f32 %v6092_v34, 0.0 }
0x19cd   : > { %v6087_v60 = vadd.f32 %v6720_v62, %v6086_v63  ;;  %v6114_v9 = vmax.f32 %v6084_v37, 0.0 }
0x19ce   : > { %v6117_v56 = vmax.f32 %v6095_v18, 0.0 }
0x19cf   : > { %v6115_v40 = vmax.f32 %v6087_v60, 0.0 }
0x19d0   : > { %v6123_v43 = vpack.c.bf16 %v6117_v56, %v6116_v26 }
0x19d1   : > { %v6122_v11 = vpack.c.bf16 %v6115_v40, %v6114_v9 }
0x19d3   : > { %7462 = vmatprep.mubr.msk.bf16.mxu0 %vm3356_vm7, %v6122_v11 }
0x19d4   : > { %7463 = vmatmul.mubr.msk.bf16.vlgmr.msra.gmra.mrb[168].mxu0 %vm3356_vm7, %v6123_v43 }
0x19d8   : > { %v7452_v27 = vpop.f32.mrb[164].mxu1 }
0x19d9   : > { %v6108_v8 = vadd.f32 %v7452_v27, %v6720_v62  ;;  %v6099_v22 = vpop.f32.mrb[165].mxu1 }
0x19da   : > { %v6100_v48 = vadd.f32 %v6720_v62, %v6099_v22  ;;  %v7453_v59 = vpop.f32.mrb[166].mxu1  ;;  %v7644_v22 = vld [vmem:[%s9879_s13] sm:$0xff]  }
0x19db   : > { %v6111_v42 = vadd.f32 %v7453_v59, %v6720_v62  ;;  %v6102_v52 = vpop.f32.mrb[167].mxu1  ;;  %v6120_v10 = vmax.f32 %v6108_v8, 0.0  ;;  %7471 = vmatpush3.bf16.msra.mxu1 %v7644_v22 }
0x19dc   : > { %v6103_v41 = vadd.f32 %v6720_v62, %v6102_v52  ;;  %v6118_v57 = vmax.f32 %v6100_v48, 0.0  ;;  %v7645_v48 = vld [vmem:[%s9879_s13 + $0x8] sm:$0xff]   ;;  %7472 = vmatprep.subr.bf16.mxu1 %v9935_v14 }
0x19dd   : > { %v6121_v17 = vmax.f32 %v6111_v42, 0.0 }
0x19de   : > { %v6119_v19 = vmax.f32 %v6103_v41, 0.0 }
0x19df   : > { %v6125_v45 = vpack.c.bf16 %v6121_v17, %v6120_v10  ;;  %7473 = vmatpush3.bf16.msra.mxu1 %v7645_v48 }
0x19e0   : > { %v6124_v58 = vpack.c.bf16 %v6119_v19, %v6118_v57 }
0x19e2   : > { %7466 = vmatprep.mubr.msk.bf16.mxu0 %vm3356_vm7, %v6124_v58 }
0x19e3   : > { %7467 = vmatmul.mubr.msk.bf16.gmra.mrb[172].mxu0 %vm3356_vm7, %v6125_v45 }
0x1aa7   : > { %v7464_v54 = vpop.f32.mrb[168].mxu0 }
0x1aa8   : > { %v6222_v2 = vadd.f32 %v7464_v54, %v6736_v15  ;;  %v6213_v4 = vpop.f32.mrb[169].mxu0 }
0x1aa9   : > { %v6214_v38 = vadd.f32 %v6736_v15, %v6213_v4  ;;  %v7465_v7 = vpop.f32.mrb[170].mxu0 }
0x1aaa   : > { %v9717_v49 = vadd.f32 %v6222_v2, %v9672_v1  ;;  %v6225_v32 = vadd.f32 %v7465_v7, %v6736_v15  ;;  %v6216_v12 = vpop.f32.mrb[171].mxu0 }
0x1aab   : > { %v6217_v36 = vadd.f32 %v6736_v15, %v6216_v12  ;;  %v9720_v28 = vadd.f32 %v6214_v38, %v9667_v35 }
0x1aac   : > { %v9723_v3 = vadd.f32 %v6225_v32, %v9665_v16  ;;  %v6258_v50 = vsel %vm808_vm4, %v9717_v49, 0.0  ;;  %v6286_v35 = vmul.f32 %v9717_v49, %v9717_v49 }
0x1aad   : > { %6259 = vadd.xlane.f32.xlu1 %v6258_v50  ;;  %v9728_v13 = vadd.f32 %v6217_v36, %v9669_v51  ;;  %v6252_v30 = vsel %vm808_vm4, %v9720_v28, 0.0  ;;  %v6284_v47 = vmul.f32 %v9720_v28, %v9720_v28 }
0x1aae   : > { %v6261_v1 = vsel %vm808_vm4, %v9723_v3, 0.0  ;;  %v6287_v31 = vmul.f32 %v9723_v3, %v9723_v3  ;;  %v6298_v51 = vsel %vm808_vm4, %v6286_v35, 0.0 }
0x1aaf   : > { %6262 = vadd.xlane.f32.xlu0 %v6261_v1  ;;  %v6255_v16 = vsel %vm808_vm4, %v9728_v13, 0.0  ;;  %v6285_v6 = vmul.f32 %v9728_v13, %v9728_v13  ;;  %v6292_v34 = vsel %vm808_vm4, %v6284_v47, 0.0 }
0x1ab0   : > { %v6301_v33 = vsel %vm808_vm4, %v6287_v31, 0.0 }
0x1ab1   : > { %6253 = vadd.xlane.f32.xlu1 %v6252_v30  ;;  %v6295_v18 = vsel %vm808_vm4, %v6285_v6, 0.0 }
0x1ab3   : > { %6256 = vadd.xlane.f32.xlu0 %v6255_v16 }
0x1ab5   : > { %6299 = vadd.xlane.f32.xlu1 %v6298_v51 }
0x1ab6   : > { %v7468_v46 = vpop.f32.mrb[172].mxu0 }
0x1ab7   : > { %v6238_v55 = vadd.f32 %v7468_v46, %v6736_v15  ;;  %v6229_v24 = vpop.f32.mrb[173].mxu0  ;;  %6302 = vadd.xlane.f32.xlu0 %v6301_v33 }
0x1ab8   : > { %v7469_v53 = vpop.f32.mrb[174].mxu0  ;;  %v6230_v62 = vadd.f32 %v6736_v15, %v6229_v24 }
0x1ab9   : > { %v9747_v20 = vadd.f32 %v6238_v55, %v9691_v5  ;;  %v6241_v25 = vadd.f32 %v7469_v53, %v6736_v15  ;;  %v6232_v23 = vpop.f32.mrb[175].mxu0  ;;  %6293 = vadd.xlane.f32.xlu1 %v6292_v34 }
0x1aba   : > { %v6233_v39 = vadd.f32 %v6736_v15, %v6232_v23  ;;  %v9757_v60 = vadd.f32 %v6230_v62, %v9684_v21 }
0x1abb   : > { %v9751_v37 = vadd.f32 %v6241_v25, %v9693_v61  ;;  %v6270_v63 = vsel %vm808_vm4, %v9747_v20, 0.0  ;;  %6296 = vadd.xlane.f32.xlu0 %v6295_v18  ;;  %v9982_v25 = vsub.s32 2, %v9979_v0 }
0x1abc   : > { %v9762_v26 = vadd.f32 %v6233_v39, %v9686_v44  ;;  %v6264_v61 = vsel %vm808_vm4, %v9757_v60, 0.0  ;;  %v6288_v56 = vmul.f32 %v9757_v60, %v9757_v60  ;;  %v6290_v44 = vmul.f32 %v9747_v20, %v9747_v20 }
0x1abd   : > { %v6273_v5 = vsel %vm808_vm4, %v9751_v37, 0.0  ;;  %6271 = vadd.xlane.f32.xlu1 %v6270_v63  ;;  %v6291_v11 = vmul.f32 %v9751_v37, %v9751_v37  ;;  %v9799_v34 = vrot.slane %v9654_v29, %v9982_v25 }
0x1abe   : > { %v6267_v9 = vsel %vm808_vm4, %v9762_v26, 0.0  ;;  %v6289_v21 = vmul.f32 %v9762_v26, %v9762_v26  ;;  %v6304_v40 = vsel %vm808_vm4, %v6288_v56, 0.0  ;;  %v6310_v27 = vsel %vm808_vm4, %v6290_v44, 0.0 }
0x1abf   : > { %6274 = vadd.xlane.f32.xlu0 %v6273_v5  ;;  %v6313_v8 = vsel %vm808_vm4, %v6291_v11, 0.0 }
0x1ac0   : > { %v6307_v43 = vsel %vm808_vm4, %v6289_v21, 0.0 }
0x1ac1   : > { %6265 = vadd.xlane.f32.xlu1 %v6264_v61  ;;  %v9983_v61 = vsub.s32 3, %v9979_v0 }
0x1ac3   : > { %6268 = vadd.xlane.f32.xlu0 %v6267_v9  ;;  %v9808_v56 = vrot.slane %v9654_v29, %v9983_v61 }
0x1ac5   : > { %6305 = vadd.xlane.f32.xlu1 %v6304_v40 }
0x1ac7   : > { %6308 = vadd.xlane.f32.xlu0 %v6307_v43 }
0x1ac9   : > { %6311 = vadd.xlane.f32.xlu1 %v6310_v27 }
0x1acb   : > { %6314 = vadd.xlane.f32.xlu0 %v6313_v8 }
0x1b3a   : > { %v6260_v59 = vpop.xlane.xlu1 %6259 }
0x1b3b   : > { %v6278_v41 = vmul.f32 0.03125, %v6260_v59 }
0x1b3c   : > { %v6263_v42 = vpop.xlane.xlu0 %6262 }
0x1b3d   : > { %v6279_v17 = vmul.f32 0.03125, %v6263_v42  ;;  %v6326_v19 = vmul.f32 %v6278_v41, %v6278_v41  ;;  %v6342_v62 = vsub.f32 %v9717_v49, %v6278_v41 }
0x1b3e   : > { %v6254_v52 = vpop.xlane.xlu1 %6253 }
0x1b3f   : > { %v6276_v45 = vmul.f32 0.03125, %v6254_v52  ;;  %v6327_v2 = vmul.f32 %v6279_v17, %v6279_v17  ;;  %v6343_v49 = vsub.f32 %v9723_v3, %v6279_v17 }
0x1b40   : > { %v6257_v10 = vpop.xlane.xlu0 %6256 }
0x1b41   : > { %v9787_v15 = vmul.f32 0.03125, %v6257_v10  ;;  %v6324_v32 = vmul.f32 %v6276_v45, %v6276_v45  ;;  %v6340_v8 = vsub.f32 %v9720_v28, %v6276_v45 }
0x1b42   : > { %v6300_v57 = vpop.xlane.xlu1 %6299 }
0x1b43   : > { %v6318_v58 = vmul.f32 0.03125, %v6300_v57  ;;  %v6325_v50 = vmul.f32 %v9787_v15, %v9787_v15  ;;  %v6341_v0 = vsub.f32 %v9728_v13, %v9787_v15 }
0x1b44   : > { %v6303_v54 = vpop.xlane.xlu0 %6302 }
0x1b45   : > { %v6334_v4 = vsub.f32 %v6318_v58, %v6326_v19  ;;  %v6319_v38 = vmul.f32 0.03125, %v6303_v54 }
0x1b46   : > { %v6294_v7 = vpop.xlane.xlu1 %6293 }
0x1b47   : > { %v6350_v14 = vadd.f32 1e-05, %v6334_v4  ;;  %v6335_v12 = vsub.f32 %v6319_v38, %v6327_v2  ;;  %v6316_v36 = vmul.f32 0.03125, %v6294_v7 }
0x1b48   : > { %v6297_v1 = vpop.xlane.xlu0 %6296 }
0x1b49   : > { %7950 = vrsqrt.f32 %v6350_v14  ;;  %v6351_v30 = vadd.f32 1e-05, %v6335_v12  ;;  %v6332_v35 = vsub.f32 %v6316_v36, %v6324_v32  ;;  %v6317_v16 = vmul.f32 0.03125, %v6297_v1 }
0x1b4a   : > { %v6272_v31 = vpop.xlane.xlu1 %6271 }
0x1b4b   : > { %7952 = vrsqrt.f32 %v6351_v30  ;;  %v6348_v51 = vadd.f32 1e-05, %v6332_v35  ;;  %v6333_v47 = vsub.f32 %v6317_v16, %v6325_v50  ;;  %v9801_v18 = vmul.f32 0.03125, %v6272_v31 }
0x1b4c   : > { %v6275_v46 = vpop.xlane.xlu0 %6274 }
0x1b4d   : > { %7954 = vrsqrt.f32 %v6348_v51  ;;  %v6349_v55 = vadd.f32 1e-05, %v6333_v47  ;;  %v9811_v21 = vmul.f32 0.03125, %v6275_v46  ;;  %v6330_v59 = vmul.f32 %v9801_v18, %v9801_v18 }
0x1b4e   : > { %v6266_v33 = vpop.xlane.xlu1 %6265 }
0x1b4f   : > { %7956 = vrsqrt.f32 %v6349_v55  ;;  %v9791_v24 = vmul.f32 0.03125, %v6266_v33  ;;  %v6331_v28 = vmul.f32 %v9811_v21, %v9811_v21 }
0x1b50   : > { %v6269_v6 = vpop.xlane.xlu0 %6268 }
0x1b51   : > { %v9793_v53 = vmul.f32 0.03125, %v6269_v6  ;;  %v6328_v63 = vmul.f32 %v9791_v24, %v9791_v24  ;;  %v6344_v47 = vsub.f32 %v9757_v60, %v9791_v24  ;;  %v6347_v60 = vsub.f32 %v9751_v37, %v9811_v21 }
0x1b52   : > { %v6306_v23 = vpop.xlane.xlu1 %6305 }
0x1b53   : > { %v7951_v39 = vpop.eup %7950  ;;  %v6320_v5 = vmul.f32 0.03125, %v6306_v23  ;;  %v6329_v43 = vmul.f32 %v9793_v53, %v9793_v53  ;;  %v6345_v33 = vsub.f32 %v9762_v26, %v9793_v53 }
0x1b54   : > { %v6366_v9 = vmul.f32 %v7951_v39, %v6342_v62  ;;  %v6309_v40 = vpop.xlane.xlu0 %6308  ;;  %v6346_v39 = vsub.f32 %v9747_v20, %v9801_v18 }
0x1b55   : > { %v7953_v44 = vpop.eup %7952  ;;  %v6336_v11 = vsub.f32 %v6320_v5, %v6328_v63  ;;  %v6321_v27 = vmul.f32 0.03125, %v6309_v40 }
0x1b56   : > { %v6378_v29 = vmul.f32 %v9799_v34, %v6366_v9  ;;  %v6367_v22 = vmul.f32 %v7953_v44, %v6343_v49  ;;  %v6312_v48 = vpop.xlane.xlu1 %6311 }
0x1b57   : > { %v7955_v3 = vpop.eup %7954  ;;  %v6352_v42 = vadd.f32 1e-05, %v6336_v11  ;;  %v6337_v52 = vsub.f32 %v6321_v27, %v6329_v43  ;;  %v6322_v41 = vmul.f32 0.03125, %v6312_v48 }
0x1b58   : > { %v6390_v10 = vadd.f32 %v9808_v56, %v6378_v29  ;;  %v6379_v17 = vmul.f32 %v9799_v34, %v6367_v22  ;;  %v6364_v57 = vmul.f32 %v7955_v3, %v6340_v8  ;;  %v6315_v13 = vpop.xlane.xlu0 %6314 }
0x1b59   : > { %v7957_v19 = vpop.eup %7956  ;;  %7958 = vrsqrt.f32 %v6352_v42  ;;  %v6353_v45 = vadd.f32 1e-05, %v6337_v52  ;;  %v6338_v58 = vsub.f32 %v6322_v41, %v6330_v59  ;;  %v6323_v15 = vmul.f32 0.03125, %v6315_v13 }
0x1b5a   : > { %v6391_v54 = vadd.f32 %v9808_v56, %v6379_v17  ;;  %v6376_v2 = vmul.f32 %v9799_v34, %v6364_v57  ;;  %v6365_v4 = vmul.f32 %v7957_v19, %v6341_v0  ;;  %v6405_v32 = vsel %vm808_vm4, %v6390_v10, 0.0 }
0x1b5b   : > { %7960 = vrsqrt.f32 %v6353_v45  ;;  %v6354_v38 = vadd.f32 1e-05, %v6338_v58  ;;  %v6339_v7 = vsub.f32 %v6323_v15, %v6331_v28 }
0x1b5c   : > { %v6406_v14 = vsel %vm808_vm4, %v6391_v54, 0.0  ;;  %v6388_v12 = vadd.f32 %v9808_v56, %v6376_v2  ;;  %v6377_v36 = vmul.f32 %v9799_v34, %v6365_v4 }
0x1b5d   : > { %v6407_v50 = vadd.f32 %v6406_v14, %v6405_v32  ;;  %7962 = vrsqrt.f32 %v6354_v38  ;;  %v6355_v1 = vadd.f32 1e-05, %v6339_v7 }
0x1b5e   : > { %v6389_v30 = vadd.f32 %v9808_v56, %v6377_v36  ;;  %v6396_v35 = vsel %vm808_vm4, %v6388_v12, 0.0 }
0x1b5f   : > { %7964 = vrsqrt.f32 %v6355_v1  ;;  %v6408_v31 = vrot.slane %v6407_v50, 4 }
0x1b60   : > { %v6397_v16 = vsel %vm808_vm4, %v6389_v30, 0.0 }
0x1b61   : > { %v6398_v51 = vadd.f32 %v6397_v16, %v6396_v35  ;;  %v6409_v25 = vadd.f32 %v6408_v31, %v6407_v50 }
0x1b63   : > { %v7959_v46 = vpop.eup %7958  ;;  %v6399_v55 = vrot.slane %v6398_v51, 4  ;;  %v6410_v40 = vrot.slane %v6409_v25, 2 }
0x1b64   : > { %v6368_v6 = vmul.f32 %v7959_v46, %v6344_v47  ;;  %v6745_v46 = vld [vmem:[%s9880_s14] ss:$0 sm:$0xff] }
0x1b65   : > { %v7961_v62 = vpop.eup %7960  ;;  %v6400_v23 = vadd.f32 %v6399_v55, %v6398_v51  ;;  %v6411_v21 = vadd.f32 %v6410_v40, %v6409_v25 }
0x1b66   : > { %v6380_v63 = vmul.f32 %v9799_v34, %v6368_v6  ;;  %v6369_v5 = vmul.f32 %v7961_v62, %v6345_v33 }
0x1b67   : > { %v7963_v61 = vpop.eup %7962  ;;  %v6401_v49 = vrot.slane %v6400_v23, 2  ;;  %v6412_v42 = vrot.slane %v6411_v21, 1 }
0x1b68   : > { %v6392_v24 = vadd.f32 %v9808_v56, %v6380_v63  ;;  %v6381_v9 = vmul.f32 %v9799_v34, %v6369_v5  ;;  %v6370_v26 = vmul.f32 %v7963_v61, %v6346_v39 }
0x1b69   : > { %v7965_v53 = vpop.eup %7964  ;;  %v6402_v18 = vadd.f32 %v6401_v49, %v6400_v23  ;;  %v6413_v28 = vadd.f32 %v6412_v42, %v6411_v21 }
0x1b6a   : > { %v6393_v44 = vadd.f32 %v9808_v56, %v6381_v9  ;;  %v6382_v43 = vmul.f32 %v9799_v34, %v6370_v26  ;;  %v6371_v20 = vmul.f32 %v7965_v53, %v6347_v60  ;;  %v6414_v11 = vsel %vm808_vm4, %v6392_v24, 0.0 }
0x1b6b   : > { %v6403_v22 = vrot.slane %v6402_v18, 1  ;;  %v6434_v54 = vmul.f32 0.0625, %v6413_v28 }
0x1b6c   : > { %v6415_v27 = vsel %vm808_vm4, %v6393_v44, 0.0  ;;  %v6394_v8 = vadd.f32 %v9808_v56, %v6382_v43  ;;  %v6383_v37 = vmul.f32 %v9799_v34, %v6371_v20 }
0x1b6d   : > { %v6416_v0 = vadd.f32 %v6415_v27, %v6414_v11  ;;  %v6404_v10 = vadd.f32 %v6403_v22, %v6402_v18  ;;  %v6438_v32 = vpack.c.bf16 %v6434_v54, %v6434_v54 }
0x1b6e   : > { %v6395_v29 = vadd.f32 %v9808_v56, %v6383_v37  ;;  %v6423_v3 = vsel %vm808_vm4, %v6394_v8, 0.0 }
0x1b6f   : > { %v6417_v48 = vrot.slane %v6416_v0, 4  ;;  %v6433_v58 = vmul.f32 0.0625, %v6404_v10  ;;  %v6457_v30 = vunpack.c.l.b16 %v6438_v32 }
0x1b70   : > { %v6424_v59 = vsel %vm808_vm4, %v6395_v29, 0.0 }
0x1b71   : > { %v6418_v52 = vadd.f32 %v6417_v48, %v6416_v0  ;;  %v6425_v41 = vadd.f32 %v6424_v59, %v6423_v3  ;;  %v6437_v38 = vpack.c.bf16 %v6433_v58, %v6433_v58 }
0x1b73   : > { %v6419_v17 = vrot.slane %v6418_v52, 2  ;;  %v6426_v57 = vrot.slane %v6425_v41, 4  ;;  %v6456_v36 = vunpack.c.l.b16 %v6437_v38 }
0x1b75   : > { %v6420_v13 = vadd.f32 %v6419_v17, %v6418_v52  ;;  %v6427_v19 = vadd.f32 %v6426_v57, %v6425_v41  ;;  %v6461_v16 = vsel %vm6460_vm8, %v6457_v30, %v6456_v36 }
0x1b77   : > { %v6421_v34 = vrot.slane %v6420_v13, 1  ;;  %v6428_v45 = vrot.slane %v6427_v19, 2 }
0x1b79   : > { %v6429_v15 = vadd.f32 %v6428_v45, %v6427_v19  ;;  %v6422_v56 = vadd.f32 %v6421_v34, %v6420_v13 }
0x1b7b   : > { %v6430_v2 = vrot.slane %v6429_v15, 1  ;;  %v6435_v4 = vmul.f32 0.0625, %v6422_v56 }
0x1b7d   : > { %v6431_v7 = vadd.f32 %v6430_v2, %v6429_v15  ;;  %v6439_v14 = vpack.c.bf16 %v6435_v4, %v6435_v4 }
0x1b7f   : > { %v6436_v12 = vmul.f32 0.0625, %v6431_v7  ;;  %v6458_v50 = vunpack.c.l.b16 %v6439_v14 }
0x1b81   : > { %v6440_v1 = vpack.c.bf16 %v6436_v12, %v6436_v12  ;;  %v6463_v31 = vsel %vm6462_vm9, %v6458_v50, %v6461_v16 }
0x1b83   : > { %v6459_v35 = vunpack.c.l.b16 %v6440_v1 }
0x1b85   : > { %v6465_v51 = vsel %vm6464_vm10, %v6459_v35, %v6463_v31 }
0x1b86   : > { %v6466_v47 = vpack.c.b16 %v6465_v51, %v6465_v51 }
0x1b88   : > { %7475 = vmatmul.mubr.msk.bf16.vlgmr.msra.gmra.mrb[168].mxu1 %vm808_vm4, %v6466_v47 }
0x1c5b   : > { %v6516_v55 = vpop.f32.mrb[168].mxu1 }
0x1c5c   : > { %v6517_v33 = vadd.f32 %v6745_v46, %v6516_v55  ;;  %v7476_v6 = vpop.f32.mrb[169].mxu1 }
0x1c5d   : > { %v6519_v62 = vpop.f32.mrb[170].mxu1 }
0x1c5e   : > { %6523 = vst.msk [vmem:[%s497_s27] sm:$0xf] %vm6522_vm11, %v6517_v33  ;;  %v7477_v25 = vpop.f32.mrb[171].mxu1 }
0x1c5f PF: > { %s25_s18 = sadd.s32 1, %s7972_s18  }
0x1c60   : > { %p22_p5 = scmp.ge.s32.totalorder %s25_s18, 4  }
0x1c62   :  { %24 = sbr.rel (!%p22_p5) target bundleno = 1 (0x1), region = 119 }

</bundles_post_ra>
